<compile_context>
chip_gen: v6e
topology: v6e:2x2x1
jax: 0.10.0
libtpu: 0.0.40
codegen_flags: <defaults>
</compile_context>

<pallas_src>
import functools

import jax
import jax.numpy as jnp
from jax import lax
from jax.experimental import pallas as pl
from jax.experimental.pallas import tpu as pltpu


# ---------------------------------------------------------------------------
# Kernel: one grid step = (batch b, query tile qi, kv tile ki); heads in-body.
# ---------------------------------------------------------------------------
def _attn_kernel(xq_ref, xkv_ref, wq_ref, wkv_ref, wout_ref, g_ref, b_ref,
                 o_ref, qs_ref, m_ref, l_ref, acc_ref, *,
                 heads, dim_head, eps):
    ki = pl.program_id(2)
    num_kv = pl.num_programs(2)
    hidden = heads * dim_head

    def rmsnorm(x):                                        # x: (C, t) f32
        ss = jnp.sum(x * x, axis=0, keepdims=True)         # (1, t)
        inv = lax.rsqrt(jnp.maximum(ss, eps * eps))        # == 1 / max(||x||2, eps)
        return x * inv * g_ref[...]                        # sqrt(C) folded into g

    # ---- per-(b, qi) prologue: cache projected q, reset online-softmax state
    @pl.when(ki == 0)
    def _():
        xnq = rmsnorm(xq_ref[0]).astype(jnp.bfloat16)                      # (C, tq)
        qs_ref[...] = jnp.dot(wq_ref[...], xnq,
                              preferred_element_type=jnp.float32)          # (hidden, tq)
        m_ref[...] = jnp.full(m_ref.shape, -jnp.inf, dtype=m_ref.dtype)
        l_ref[...] = jnp.zeros(l_ref.shape, dtype=l_ref.dtype)
        acc_ref[...] = jnp.zeros(acc_ref.shape, dtype=acc_ref.dtype)

    # ---- kv-side RMSNorm + k/v projection, shared across all heads
    xnk = rmsnorm(xkv_ref[0]).astype(jnp.bfloat16)                          # (C, tk)
    kv = jnp.dot(wkv_ref[...], xnk,
                 preferred_element_type=jnp.float32).astype(jnp.bfloat16)   # (2*hidden, tk)
    q_all = qs_ref[...].astype(jnp.bfloat16)                                # (hidden, tq)

    # ---- per-head flash-attention update (static unroll over heads)
    for h in range(heads):
        lo, hi = h * dim_head, (h + 1) * dim_head
        q_h = q_all[lo:hi]                                                  # (dh, tq)
        k_h = kv[lo:hi]                                                     # (dh, tk)
        v_h = kv[hidden + lo:hidden + hi]                                   # (dh, tk)

        # sim[j, i] = sum_d k[d, j] * q[d, i]  -> (tk, tq): q index on lanes.
        sim = lax.dot_general(k_h, q_h, (((0,), (0,)), ((), ())),
                              preferred_element_type=jnp.float32)

        m_prev = m_ref[h:h + 1, :]                                          # (1, tq)
        m_new = jnp.maximum(m_prev, jnp.max(sim, axis=0, keepdims=True))    # (1, tq)
        alpha = jnp.exp(m_prev - m_new)                                     # (1, tq)
        p = jnp.exp(sim - m_new)                                            # (tk, tq) f32
        l_ref[h:h + 1, :] = alpha * l_ref[h:h + 1, :] + jnp.sum(
            p, axis=0, keepdims=True)
        # acc[d, i] = alpha * acc[d, i] + sum_j v[d, j] * p[j, i]  (lane-dense)
        acc_ref[lo:hi, :] = alpha * acc_ref[lo:hi, :] + jnp.dot(
            v_h, p.astype(jnp.bfloat16), preferred_element_type=jnp.float32)
        m_ref[h:h + 1, :] = m_new

    # ---- epilogue: normalize, one all-heads out-projection, residual + bias
    @pl.when(ki == num_kv - 1)
    def _():
        for h in range(heads):
            lo, hi = h * dim_head, (h + 1) * dim_head
            acc_ref[lo:hi, :] = acc_ref[lo:hi, :] * (1.0 / l_ref[h:h + 1, :])
        y = jnp.dot(wout_ref[...], acc_ref[...].astype(jnp.bfloat16),
                    preferred_element_type=jnp.float32)                     # (C, tq)
        o_ref[0] = (y + xq_ref[0] + b_ref[...]).astype(o_ref.dtype)


# ---------------------------------------------------------------------------
# Wrapper: weight re-layout (host-side, free) + pallas_call
# ---------------------------------------------------------------------------
def _pick_tile(n, preferred):
    for t in preferred:
        if t is not None and n % t == 0:
            return t
    return n  # single full-length tile (block == full dim is always legal)


def attention_pallas(x_nchw, g, w_qkv, w_out, b_out, *,
                     heads, dim_head, q_tile=None, kv_tile=None):
    B, C, H, W = x_nchw.shape
    N = H * W
    hidden = heads * dim_head
    scale = dim_head ** -0.5

    # NCHW -> (B, C, N): free reshape, no HBM transpose.
    x = x_nchw.reshape(B, C, N).astype(jnp.float32)

    # Big tiles amortize the ~0.35 us/step grid overhead; for small/medium N
    # this collapses to a single (tq = tk = N) tile with no kv loop at all.
    tq = _pick_tile(N, (q_tile, 512, 256, 128))
    tk = _pick_tile(N, (kv_tile, 2048, 1024, 512, 256, 128))
    nq, nk = N // tq, N // tk

    # Weight re-layout: rows of w_qkv are [q(heads*dh) | k | v]; fold the
    # softmax scale into the q rows so the kernel never multiplies by it.
    w2 = w_qkv.reshape(3 * hidden, C).astype(jnp.float32)
    wq = (w2[:hidden] * scale).astype(jnp.bfloat16)          # (hidden, C)
    wkv = w2[hidden:].astype(jnp.bfloat16)                   # (2*hidden, C) = [k; v]
    wout = w_out.reshape(C, hidden).astype(jnp.bfloat16)     # (C, hidden)

    # RMSNorm gain with sqrt(C) folded in; out-conv bias.
    g2 = (g.reshape(C, 1) * (C ** 0.5)).astype(jnp.float32)
    b2 = b_out.reshape(C, 1).astype(jnp.float32)

    kernel = functools.partial(_attn_kernel, heads=heads, dim_head=dim_head,
                               eps=1e-12)

    out = pl.pallas_call(
        kernel,
        out_shape=jax.ShapeDtypeStruct((B, C, N), jnp.float32),
        grid_spec=pltpu.PrefetchScalarGridSpec(
            num_scalar_prefetch=0,
            grid=(B, nq, nk),
            in_specs=[
                pl.BlockSpec((1, C, tq), lambda b, qi, ki: (b, 0, qi)),   # x (q tile / residual)
                pl.BlockSpec((1, C, tk), lambda b, qi, ki: (b, 0, ki)),   # x (kv tile)
                pl.BlockSpec((hidden, C), lambda b, qi, ki: (0, 0)),      # Wq (scale folded)
                pl.BlockSpec((2 * hidden, C), lambda b, qi, ki: (0, 0)),  # Wk;Wv
                pl.BlockSpec((C, hidden), lambda b, qi, ki: (0, 0)),      # Wout
                pl.BlockSpec((C, 1), lambda b, qi, ki: (0, 0)),           # g * sqrt(C)
                pl.BlockSpec((C, 1), lambda b, qi, ki: (0, 0)),           # out-conv bias
            ],
            out_specs=pl.BlockSpec((1, C, tq), lambda b, qi, ki: (b, 0, qi)),
            scratch_shapes=[
                pltpu.VMEM((hidden, tq), jnp.float32),       # cached q projection
                pltpu.VMEM((heads, tq), jnp.float32),        # running max per head
                pltpu.VMEM((heads, tq), jnp.float32),        # running denom per head
                pltpu.VMEM((hidden, tq), jnp.float32),       # channels-first out accum
            ],
        ),
        compiler_params=pltpu.CompilerParams(
            dimension_semantics=("parallel", "parallel", "arbitrary"),
            vmem_limit_bytes=64 * 1024 * 1024),
    )(x, x, wq, wkv, wout, g2, b2)

    return out.reshape(B, C, H, W)


# ---------------------------------------------------------------------------
# Pure-JAX reference (mirrors the PyTorch forward exactly, f32)
# ---------------------------------------------------------------------------
def attention_ref(x, g, w_qkv, w_out, b_out, *, heads, dim_head):
    B, C, H, W = x.shape
    N = H * W
    hidden = heads * dim_head
    scale = dim_head ** -0.5

    l2 = jnp.sqrt(jnp.sum(x * x, axis=1, keepdims=True))
    xn = x / jnp.maximum(l2, 1e-12) * g * (C ** 0.5)

    qkv = jnp.einsum('bchw,oc->bohw', xn, w_qkv.reshape(3 * hidden, C))
    q, k, v = jnp.split(qkv, 3, axis=1)
    resh = lambda t: t.reshape(B, heads, dim_head, N)
    q, k, v = resh(q), resh(k), resh(v)

    q = q * scale
    sim = jnp.einsum('bhdi,bhdj->bhij', q, k)
    attn = jax.nn.softmax(sim, axis=-1)
    out = jnp.einsum('bhij,bhdj->bhid', attn, v)              # (B, heads, N, dh)
    out = jnp.transpose(out, (0, 1, 3, 2)).reshape(B, hidden, H, W)

    y = jnp.einsum('bihw,oi->bohw', out, w_out.reshape(C, hidden))
    y = y + b_out.reshape(1, C, 1, 1)
    return y + x


if __name__ == "__main__":
    # Small config consistent with the module defaults (heads=4, dim_head=32).
    B, DIM, H, W = 2, 8, 16, 16          # N = 256
    HEADS, DIM_HEAD = 4, 32
    HIDDEN = HEADS * DIM_HEAD

    key = jax.random.PRNGKey(0)
    kx, kg, kq, kw, kb = jax.random.split(key, 5)

    x = jax.random.normal(kx, (B, DIM, H, W), dtype=jnp.float32)
    g = 1.0 + 0.1 * jax.random.normal(kg, (1, DIM, 1, 1), dtype=jnp.float32)
    w_qkv = 0.05 * jax.random.normal(kq, (3 * HIDDEN, DIM, 1, 1), dtype=jnp.float32)
    w_out = 0.05 * jax.random.normal(kw, (DIM, HIDDEN, 1, 1), dtype=jnp.float32)
    b_out = 0.05 * jax.random.normal(kb, (DIM,), dtype=jnp.float32)

    ref = attention_ref(x, g, w_qkv, w_out, b_out,
                        heads=HEADS, dim_head=DIM_HEAD)
    ref = jax.block_until_ready(ref)

    # Default tiling: tq = tk = N -> grid (B, 1, 1), no kv loop.
    out = attention_pallas(x, g, w_qkv, w_out, b_out,
                           heads=HEADS, dim_head=DIM_HEAD)
    out = jax.block_until_ready(out)
    assert out.shape == (B, DIM, H, W)
    # bf16 MXU operands -> relaxed tolerance vs f32 reference.
    assert jnp.allclose(out, ref, atol=2e-2, rtol=2e-2), \
        f"single-tile max abs err {jnp.max(jnp.abs(out - ref))}"

    # Forced small tiles: exercises the multi-tile online-softmax path.
    out2 = attention_pallas(x, g, w_qkv, w_out, b_out,
                            heads=HEADS, dim_head=DIM_HEAD,
                            q_tile=128, kv_tile=128)
    out2 = jax.block_until_ready(out2)
    assert jnp.allclose(out2, ref, atol=2e-2, rtol=2e-2), \
        f"tiled max abs err {jnp.max(jnp.abs(out2 - ref))}"

    print("KERNEL_OK")
</pallas_src>

<mosaic_0001>
module attributes {stable_mosaic.version = 11 : i64} {
  func.func @_attn_kernel(%arg0: i32, %arg1: i32, %arg2: i32, %arg3: memref<1x8x256xf32, #tpu.memory_space<vmem>>, %arg4: memref<1x8x256xf32, #tpu.memory_space<vmem>>, %arg5: memref<128x8xbf16, #tpu.memory_space<vmem>>, %arg6: memref<256x8xbf16, #tpu.memory_space<vmem>>, %arg7: memref<8x128xbf16, #tpu.memory_space<vmem>>, %arg8: memref<8x1xf32, #tpu.memory_space<vmem>>, %arg9: memref<8x1xf32, #tpu.memory_space<vmem>>, %arg10: memref<1x8x256xf32, #tpu.memory_space<vmem>>, %arg11: memref<128x256xf32, #tpu.memory_space<vmem>>, %arg12: memref<4x256xf32, #tpu.memory_space<vmem>>, %arg13: memref<4x256xf32, #tpu.memory_space<vmem>>, %arg14: memref<128x256xf32, #tpu.memory_space<vmem>>) attributes {dimension_semantics = [#tpu.dimension_semantics<parallel>, #tpu.dimension_semantics<parallel>, #tpu.dimension_semantics<arbitrary>], iteration_bounds = array<i64: 2, 1, 1>, scalar_prefetch = 0 : i64, scratch_operands = 4 : i64, tpu.core_type = #tpu.core_type<tc>, window_params = [{transform_indices = @transform_0, window_bounds = array<i64: 1, 8, 256>}, {transform_indices = @transform_1, window_bounds = array<i64: 1, 8, 256>}, {pipeline_mode = #tpu.pipeline_mode<synchronous>, transform_indices = @transform_2, window_bounds = array<i64: 128, 8>}, {pipeline_mode = #tpu.pipeline_mode<synchronous>, transform_indices = @transform_3, window_bounds = array<i64: 256, 8>}, {pipeline_mode = #tpu.pipeline_mode<synchronous>, transform_indices = @transform_4, window_bounds = array<i64: 8, 128>}, {pipeline_mode = #tpu.pipeline_mode<synchronous>, transform_indices = @transform_5, window_bounds = array<i64: 8, 1>}, {pipeline_mode = #tpu.pipeline_mode<synchronous>, transform_indices = @transform_6, window_bounds = array<i64: 8, 1>}, {transform_indices = @transform_7, window_bounds = array<i64: 1, 8, 256>}]} {
    %c0_i32 = arith.constant 0 : i32
    %0 = arith.cmpi eq, %arg2, %c0_i32 : i32
    %1 = arith.extui %0 : i1 to i32
    %c0_i32_0 = arith.constant 0 : i32
    %2 = arith.cmpi ne, %1, %c0_i32_0 : i32
    scf.if %2 {
      %c0_71 = arith.constant 0 : index
      %c0_72 = arith.constant 0 : index
      %c0_73 = arith.constant 0 : index
      %133 = vector.load %arg3[%c0_71, %c0_72, %c0_73] : memref<1x8x256xf32, #tpu.memory_space<vmem>>, vector<1x8x256xf32>
      %134 = vector.shape_cast %133 : vector<1x8x256xf32> to vector<8x256xf32>
      %135 = arith.mulf %134, %134 : vector<8x256xf32>
      %cst_74 = arith.constant dense<0.000000e+00> : vector<256xf32>
      %136 = vector.multi_reduction <add>, %135, %cst_74 [0] : vector<8x256xf32> to vector<256xf32>
      %137 = vector.shape_cast %136 : vector<256xf32> to vector<1x256xf32>
      %cst_75 = arith.constant 1.000000e-24 : f32
      %138 = vector.broadcast %cst_75 : f32 to vector<1x256xf32>
      %139 = arith.maximumf %137, %138 : vector<1x256xf32>
      %140 = math.rsqrt %139 : vector<1x256xf32>
      %141 = vector.broadcast %140 : vector<1x256xf32> to vector<8x256xf32>
      %142 = arith.mulf %134, %141 : vector<8x256xf32>
      %c0_76 = arith.constant 0 : index
      %c0_77 = arith.constant 0 : index
      %143 = vector.load %arg8[%c0_76, %c0_77] : memref<8x1xf32, #tpu.memory_space<vmem>>, vector<8x1xf32>
      %144 = vector.broadcast %143 : vector<8x1xf32> to vector<8x256xf32>
      %145 = arith.mulf %142, %144 : vector<8x256xf32>
      %146 = arith.truncf %145 : vector<8x256xf32> to vector<8x256xbf16>
      %c0_78 = arith.constant 0 : index
      %c0_79 = arith.constant 0 : index
      %147 = vector.load %arg5[%c0_78, %c0_79] : memref<128x8xbf16, #tpu.memory_space<vmem>>, vector<128x8xbf16>
      %cst_80 = arith.constant dense<0.000000e+00> : vector<128x256xf32>
      %148 = tpu.matmul %147, %146, %cst_80 {dimension_numbers = #tpu.dot_dimension_numbers<[1], [0], [0], [1], [0, 0, 1, 1], [], []>} : vector<128x8xbf16>, vector<8x256xbf16>, vector<128x256xf32> -> vector<128x256xf32>
      %c0_81 = arith.constant 0 : index
      %c0_82 = arith.constant 0 : index
      %149 = vector.load %arg11[%c0_81, %c0_82] : memref<128x256xf32, #tpu.memory_space<vmem>>, vector<128x256xf32>
      tpu.vector_store %arg11[%c0_81, %c0_82], %148 {strides = array<i32>} : memref<128x256xf32, #tpu.memory_space<vmem>>, vector<128x256xf32>,
      %cst_83 = arith.constant 0xFF800000 : f32
      %150 = vector.broadcast %cst_83 : f32 to vector<4x256xf32>
      %c0_84 = arith.constant 0 : index
      %c0_85 = arith.constant 0 : index
      %151 = vector.load %arg12[%c0_84, %c0_85] : memref<4x256xf32, #tpu.memory_space<vmem>>, vector<4x256xf32>
      tpu.vector_store %arg12[%c0_84, %c0_85], %150 {strides = array<i32>} : memref<4x256xf32, #tpu.memory_space<vmem>>, vector<4x256xf32>,
      %cst_86 = arith.constant 0.000000e+00 : f32
      %152 = vector.broadcast %cst_86 : f32 to vector<4x256xf32>
      %c0_87 = arith.constant 0 : index
      %c0_88 = arith.constant 0 : index
      %153 = vector.load %arg13[%c0_87, %c0_88] : memref<4x256xf32, #tpu.memory_space<vmem>>, vector<4x256xf32>
      tpu.vector_store %arg13[%c0_87, %c0_88], %152 {strides = array<i32>} : memref<4x256xf32, #tpu.memory_space<vmem>>, vector<4x256xf32>,
      %cst_89 = arith.constant 0.000000e+00 : f32
      %154 = vector.broadcast %cst_89 : f32 to vector<128x256xf32>
      %c0_90 = arith.constant 0 : index
      %c0_91 = arith.constant 0 : index
      %155 = vector.load %arg14[%c0_90, %c0_91] : memref<128x256xf32, #tpu.memory_space<vmem>>, vector<128x256xf32>
      tpu.vector_store %arg14[%c0_90, %c0_91], %154 {strides = array<i32>} : memref<128x256xf32, #tpu.memory_space<vmem>>, vector<128x256xf32>,
    } else {
    }
    %c0 = arith.constant 0 : index
    %c0_1 = arith.constant 0 : index
    %c0_2 = arith.constant 0 : index
    %3 = vector.load %arg4[%c0, %c0_1, %c0_2] : memref<1x8x256xf32, #tpu.memory_space<vmem>>, vector<1x8x256xf32>
    %4 = vector.shape_cast %3 : vector<1x8x256xf32> to vector<8x256xf32>
    %5 = arith.mulf %4, %4 : vector<8x256xf32>
    %cst = arith.constant dense<0.000000e+00> : vector<256xf32>
    %6 = vector.multi_reduction <add>, %5, %cst [0] : vector<8x256xf32> to vector<256xf32>
    %7 = vector.shape_cast %6 : vector<256xf32> to vector<1x256xf32>
    %cst_3 = arith.constant 1.000000e-24 : f32
    %8 = vector.broadcast %cst_3 : f32 to vector<1x256xf32>
    %9 = arith.maximumf %7, %8 : vector<1x256xf32>
    %10 = math.rsqrt %9 : vector<1x256xf32>
    %11 = vector.broadcast %10 : vector<1x256xf32> to vector<8x256xf32>
    %12 = arith.mulf %4, %11 : vector<8x256xf32>
    %c0_4 = arith.constant 0 : index
    %c0_5 = arith.constant 0 : index
    %13 = vector.load %arg8[%c0_4, %c0_5] : memref<8x1xf32, #tpu.memory_space<vmem>>, vector<8x1xf32>
    %14 = vector.broadcast %13 : vector<8x1xf32> to vector<8x256xf32>
    %15 = arith.mulf %12, %14 : vector<8x256xf32>
    %16 = arith.truncf %15 : vector<8x256xf32> to vector<8x256xbf16>
    %c0_6 = arith.constant 0 : index
    %c0_7 = arith.constant 0 : index
    %17 = vector.load %arg6[%c0_6, %c0_7] : memref<256x8xbf16, #tpu.memory_space<vmem>>, vector<256x8xbf16>
    %cst_8 = arith.constant dense<0.000000e+00> : vector<256x256xf32>
    %18 = tpu.matmul %17, %16, %cst_8 {dimension_numbers = #tpu.dot_dimension_numbers<[1], [0], [0], [1], [0, 0, 1, 1], [], []>} : vector<256x8xbf16>, vector<8x256xbf16>, vector<256x256xf32> -> vector<256x256xf32>
    %19 = arith.truncf %18 : vector<256x256xf32> to vector<256x256xbf16>
    %c0_9 = arith.constant 0 : index
    %c0_10 = arith.constant 0 : index
    %20 = vector.load %arg11[%c0_9, %c0_10] : memref<128x256xf32, #tpu.memory_space<vmem>>, vector<128x256xf32>
    %21 = arith.truncf %20 : vector<128x256xf32> to vector<128x256xbf16>
    %22 = vector.extract_strided_slice %21 {offsets = [0, 0], sizes = [32, 256], strides = [1, 1]} : vector<128x256xbf16> to vector<32x256xbf16>
    %23 = vector.extract_strided_slice %19 {offsets = [0, 0], sizes = [32, 256], strides = [1, 1]} : vector<256x256xbf16> to vector<32x256xbf16>
    %24 = vector.extract_strided_slice %19 {offsets = [128, 0], sizes = [32, 256], strides = [1, 1]} : vector<256x256xbf16> to vector<32x256xbf16>
    %cst_11 = arith.constant dense<0.000000e+00> : vector<256x256xf32>
    %25 = tpu.matmul %23, %22, %cst_11 {dimension_numbers = #tpu.dot_dimension_numbers<[0], [0], [1], [1], [0, 1, 1, 1], [], []>} : vector<32x256xbf16>, vector<32x256xbf16>, vector<256x256xf32> -> vector<256x256xf32>
    %c0_12 = arith.constant 0 : index
    %c0_13 = arith.constant 0 : index
    %26 = vector.load %arg12[%c0_12, %c0_13] : memref<4x256xf32, #tpu.memory_space<vmem>>, vector<1x256xf32>
    %cst_14 = arith.constant dense<0xFF800000> : vector<256xf32>
    %27 = vector.multi_reduction <maximumf>, %25, %cst_14 [0] : vector<256x256xf32> to vector<256xf32>
    %28 = vector.shape_cast %27 : vector<256xf32> to vector<1x256xf32>
    %29 = arith.maximumf %26, %28 : vector<1x256xf32>
    %30 = arith.subf %26, %29 : vector<1x256xf32>
    %31 = math.exp %30 : vector<1x256xf32>
    %32 = vector.broadcast %29 : vector<1x256xf32> to vector<256x256xf32>
    %33 = arith.subf %25, %32 : vector<256x256xf32>
    %34 = math.exp %33 : vector<256x256xf32>
    %c0_15 = arith.constant 0 : index
    %c0_16 = arith.constant 0 : index
    %35 = vector.load %arg13[%c0_15, %c0_16] : memref<4x256xf32, #tpu.memory_space<vmem>>, vector<1x256xf32>
    %36 = arith.mulf %31, %35 : vector<1x256xf32>
    %cst_17 = arith.constant dense<0.000000e+00> : vector<256xf32>
    %37 = vector.multi_reduction <add>, %34, %cst_17 [0] : vector<256x256xf32> to vector<256xf32>
    %38 = vector.shape_cast %37 : vector<256xf32> to vector<1x256xf32>
    %39 = arith.addf %36, %38 : vector<1x256xf32>
    %c0_18 = arith.constant 0 : index
    %c0_19 = arith.constant 0 : index
    %40 = vector.load %arg13[%c0_18, %c0_19] : memref<4x256xf32, #tpu.memory_space<vmem>>, vector<1x256xf32>
    tpu.vector_store %arg13[%c0_18, %c0_19], %39 {strides = array<i32>} : memref<4x256xf32, #tpu.memory_space<vmem>>, vector<1x256xf32>,
    %c0_20 = arith.constant 0 : index
    %c0_21 = arith.constant 0 : index
    %41 = vector.load %arg14[%c0_20, %c0_21] : memref<128x256xf32, #tpu.memory_space<vmem>>, vector<32x256xf32>
    %42 = vector.broadcast %31 : vector<1x256xf32> to vector<32x256xf32>
    %43 = arith.mulf %42, %41 : vector<32x256xf32>
    %44 = arith.truncf %34 : vector<256x256xf32> to vector<256x256xbf16>
    %cst_22 = arith.constant dense<0.000000e+00> : vector<32x256xf32>
    %45 = tpu.matmul %24, %44, %cst_22 {dimension_numbers = #tpu.dot_dimension_numbers<[1], [0], [0], [1], [0, 0, 1, 1], [], []>} : vector<32x256xbf16>, vector<256x256xbf16>, vector<32x256xf32> -> vector<32x256xf32>
    %46 = arith.addf %43, %45 : vector<32x256xf32>
    %c0_23 = arith.constant 0 : index
    %c0_24 = arith.constant 0 : index
    %47 = vector.load %arg14[%c0_23, %c0_24] : memref<128x256xf32, #tpu.memory_space<vmem>>, vector<32x256xf32>
    tpu.vector_store %arg14[%c0_23, %c0_24], %46 {strides = array<i32>} : memref<128x256xf32, #tpu.memory_space<vmem>>, vector<32x256xf32>,
    %c0_25 = arith.constant 0 : index
    %c0_26 = arith.constant 0 : index
    %48 = vector.load %arg12[%c0_25, %c0_26] : memref<4x256xf32, #tpu.memory_space<vmem>>, vector<1x256xf32>
    tpu.vector_store %arg12[%c0_25, %c0_26], %29 {strides = array<i32>} : memref<4x256xf32, #tpu.memory_space<vmem>>, vector<1x256xf32>,
    %49 = vector.extract_strided_slice %21 {offsets = [32, 0], sizes = [32, 256], strides = [1, 1]} : vector<128x256xbf16> to vector<32x256xbf16>
    %50 = vector.extract_strided_slice %19 {offsets = [32, 0], sizes = [32, 256], strides = [1, 1]} : vector<256x256xbf16> to vector<32x256xbf16>
    %51 = vector.extract_strided_slice %19 {offsets = [160, 0], sizes = [32, 256], strides = [1, 1]} : vector<256x256xbf16> to vector<32x256xbf16>
    %cst_27 = arith.constant dense<0.000000e+00> : vector<256x256xf32>
    %52 = tpu.matmul %50, %49, %cst_27 {dimension_numbers = #tpu.dot_dimension_numbers<[0], [0], [1], [1], [0, 1, 1, 1], [], []>} : vector<32x256xbf16>, vector<32x256xbf16>, vector<256x256xf32> -> vector<256x256xf32>
    %c1 = arith.constant 1 : index
    %c0_28 = arith.constant 0 : index
    %53 = vector.load %arg12[%c1, %c0_28] : memref<4x256xf32, #tpu.memory_space<vmem>>, vector<1x256xf32>
    %cst_29 = arith.constant dense<0xFF800000> : vector<256xf32>
    %54 = vector.multi_reduction <maximumf>, %52, %cst_29 [0] : vector<256x256xf32> to vector<256xf32>
    %55 = vector.shape_cast %54 : vector<256xf32> to vector<1x256xf32>
    %56 = arith.maximumf %53, %55 : vector<1x256xf32>
    %57 = arith.subf %53, %56 : vector<1x256xf32>
    %58 = math.exp %57 : vector<1x256xf32>
    %59 = vector.broadcast %56 : vector<1x256xf32> to vector<256x256xf32>
    %60 = arith.subf %52, %59 : vector<256x256xf32>
    %61 = math.exp %60 : vector<256x256xf32>
    %c1_30 = arith.constant 1 : index
    %c0_31 = arith.constant 0 : index
    %62 = vector.load %arg13[%c1_30, %c0_31] : memref<4x256xf32, #tpu.memory_space<vmem>>, vector<1x256xf32>
    %63 = arith.mulf %58, %62 : vector<1x256xf32>
    %cst_32 = arith.constant dense<0.000000e+00> : vector<256xf32>
    %64 = vector.multi_reduction <add>, %61, %cst_32 [0] : vector<256x256xf32> to vector<256xf32>
    %65 = vector.shape_cast %64 : vector<256xf32> to vector<1x256xf32>
    %66 = arith.addf %63, %65 : vector<1x256xf32>
    %c1_33 = arith.constant 1 : index
    %c0_34 = arith.constant 0 : index
    %67 = vector.load %arg13[%c1_33, %c0_34] : memref<4x256xf32, #tpu.memory_space<vmem>>, vector<1x256xf32>
    tpu.vector_store %arg13[%c1_33, %c0_34], %66 {strides = array<i32>} : memref<4x256xf32, #tpu.memory_space<vmem>>, vector<1x256xf32>,
    %c32 = arith.constant 32 : index
    %c0_35 = arith.constant 0 : index
    %68 = vector.load %arg14[%c32, %c0_35] : memref<128x256xf32, #tpu.memory_space<vmem>>, vector<32x256xf32>
    %69 = vector.broadcast %58 : vector<1x256xf32> to vector<32x256xf32>
    %70 = arith.mulf %69, %68 : vector<32x256xf32>
    %71 = arith.truncf %61 : vector<256x256xf32> to vector<256x256xbf16>
    %cst_36 = arith.constant dense<0.000000e+00> : vector<32x256xf32>
    %72 = tpu.matmul %51, %71, %cst_36 {dimension_numbers = #tpu.dot_dimension_numbers<[1], [0], [0], [1], [0, 0, 1, 1], [], []>} : vector<32x256xbf16>, vector<256x256xbf16>, vector<32x256xf32> -> vector<32x256xf32>
    %73 = arith.addf %70, %72 : vector<32x256xf32>
    %c32_37 = arith.constant 32 : index
    %c0_38 = arith.constant 0 : index
    %74 = vector.load %arg14[%c32_37, %c0_38] : memref<128x256xf32, #tpu.memory_space<vmem>>, vector<32x256xf32>
    tpu.vector_store %arg14[%c32_37, %c0_38], %73 {strides = array<i32>} : memref<128x256xf32, #tpu.memory_space<vmem>>, vector<32x256xf32>,
    %c1_39 = arith.constant 1 : index
    %c0_40 = arith.constant 0 : index
    %75 = vector.load %arg12[%c1_39, %c0_40] : memref<4x256xf32, #tpu.memory_space<vmem>>, vector<1x256xf32>
    tpu.vector_store %arg12[%c1_39, %c0_40], %56 {strides = array<i32>} : memref<4x256xf32, #tpu.memory_space<vmem>>, vector<1x256xf32>,
    %76 = vector.extract_strided_slice %21 {offsets = [64, 0], sizes = [32, 256], strides = [1, 1]} : vector<128x256xbf16> to vector<32x256xbf16>
    %77 = vector.extract_strided_slice %19 {offsets = [64, 0], sizes = [32, 256], strides = [1, 1]} : vector<256x256xbf16> to vector<32x256xbf16>
    %78 = vector.extract_strided_slice %19 {offsets = [192, 0], sizes = [32, 256], strides = [1, 1]} : vector<256x256xbf16> to vector<32x256xbf16>
    %cst_41 = arith.constant dense<0.000000e+00> : vector<256x256xf32>
    %79 = tpu.matmul %77, %76, %cst_41 {dimension_numbers = #tpu.dot_dimension_numbers<[0], [0], [1], [1], [0, 1, 1, 1], [], []>} : vector<32x256xbf16>, vector<32x256xbf16>, vector<256x256xf32> -> vector<256x256xf32>
    %c2 = arith.constant 2 : index
    %c0_42 = arith.constant 0 : index
    %80 = vector.load %arg12[%c2, %c0_42] : memref<4x256xf32, #tpu.memory_space<vmem>>, vector<1x256xf32>
    %cst_43 = arith.constant dense<0xFF800000> : vector<256xf32>
    %81 = vector.multi_reduction <maximumf>, %79, %cst_43 [0] : vector<256x256xf32> to vector<256xf32>
    %82 = vector.shape_cast %81 : vector<256xf32> to vector<1x256xf32>
    %83 = arith.maximumf %80, %82 : vector<1x256xf32>
    %84 = arith.subf %80, %83 : vector<1x256xf32>
    %85 = math.exp %84 : vector<1x256xf32>
    %86 = vector.broadcast %83 : vector<1x256xf32> to vector<256x256xf32>
    %87 = arith.subf %79, %86 : vector<256x256xf32>
    %88 = math.exp %87 : vector<256x256xf32>
    %c2_44 = arith.constant 2 : index
    %c0_45 = arith.constant 0 : index
    %89 = vector.load %arg13[%c2_44, %c0_45] : memref<4x256xf32, #tpu.memory_space<vmem>>, vector<1x256xf32>
    %90 = arith.mulf %85, %89 : vector<1x256xf32>
    %cst_46 = arith.constant dense<0.000000e+00> : vector<256xf32>
    %91 = vector.multi_reduction <add>, %88, %cst_46 [0] : vector<256x256xf32> to vector<256xf32>
    %92 = vector.shape_cast %91 : vector<256xf32> to vector<1x256xf32>
    %93 = arith.addf %90, %92 : vector<1x256xf32>
    %c2_47 = arith.constant 2 : index
    %c0_48 = arith.constant 0 : index
    %94 = vector.load %arg13[%c2_47, %c0_48] : memref<4x256xf32, #tpu.memory_space<vmem>>, vector<1x256xf32>
    tpu.vector_store %arg13[%c2_47, %c0_48], %93 {strides = array<i32>} : memref<4x256xf32, #tpu.memory_space<vmem>>, vector<1x256xf32>,
    %c64 = arith.constant 64 : index
    %c0_49 = arith.constant 0 : index
    %95 = vector.load %arg14[%c64, %c0_49] : memref<128x256xf32, #tpu.memory_space<vmem>>, vector<32x256xf32>
    %96 = vector.broadcast %85 : vector<1x256xf32> to vector<32x256xf32>
    %97 = arith.mulf %96, %95 : vector<32x256xf32>
    %98 = arith.truncf %88 : vector<256x256xf32> to vector<256x256xbf16>
    %cst_50 = arith.constant dense<0.000000e+00> : vector<32x256xf32>
    %99 = tpu.matmul %78, %98, %cst_50 {dimension_numbers = #tpu.dot_dimension_numbers<[1], [0], [0], [1], [0, 0, 1, 1], [], []>} : vector<32x256xbf16>, vector<256x256xbf16>, vector<32x256xf32> -> vector<32x256xf32>
    %100 = arith.addf %97, %99 : vector<32x256xf32>
    %c64_51 = arith.constant 64 : index
    %c0_52 = arith.constant 0 : index
    %101 = vector.load %arg14[%c64_51, %c0_52] : memref<128x256xf32, #tpu.memory_space<vmem>>, vector<32x256xf32>
    tpu.vector_store %arg14[%c64_51, %c0_52], %100 {strides = array<i32>} : memref<128x256xf32, #tpu.memory_space<vmem>>, vector<32x256xf32>,
    %c2_53 = arith.constant 2 : index
    %c0_54 = arith.constant 0 : index
    %102 = vector.load %arg12[%c2_53, %c0_54] : memref<4x256xf32, #tpu.memory_space<vmem>>, vector<1x256xf32>
    tpu.vector_store %arg12[%c2_53, %c0_54], %83 {strides = array<i32>} : memref<4x256xf32, #tpu.memory_space<vmem>>, vector<1x256xf32>,
    %103 = vector.extract_strided_slice %21 {offsets = [96, 0], sizes = [32, 256], strides = [1, 1]} : vector<128x256xbf16> to vector<32x256xbf16>
    %104 = vector.extract_strided_slice %19 {offsets = [96, 0], sizes = [32, 256], strides = [1, 1]} : vector<256x256xbf16> to vector<32x256xbf16>
    %105 = vector.extract_strided_slice %19 {offsets = [224, 0], sizes = [32, 256], strides = [1, 1]} : vector<256x256xbf16> to vector<32x256xbf16>
    %cst_55 = arith.constant dense<0.000000e+00> : vector<256x256xf32>
    %106 = tpu.matmul %104, %103, %cst_55 {dimension_numbers = #tpu.dot_dimension_numbers<[0], [0], [1], [1], [0, 1, 1, 1], [], []>} : vector<32x256xbf16>, vector<32x256xbf16>, vector<256x256xf32> -> vector<256x256xf32>
    %c3 = arith.constant 3 : index
    %c0_56 = arith.constant 0 : index
    %107 = vector.load %arg12[%c3, %c0_56] : memref<4x256xf32, #tpu.memory_space<vmem>>, vector<1x256xf32>
    %cst_57 = arith.constant dense<0xFF800000> : vector<256xf32>
    %108 = vector.multi_reduction <maximumf>, %106, %cst_57 [0] : vector<256x256xf32> to vector<256xf32>
    %109 = vector.shape_cast %108 : vector<256xf32> to vector<1x256xf32>
    %110 = arith.maximumf %107, %109 : vector<1x256xf32>
    %111 = arith.subf %107, %110 : vector<1x256xf32>
    %112 = math.exp %111 : vector<1x256xf32>
    %113 = vector.broadcast %110 : vector<1x256xf32> to vector<256x256xf32>
    %114 = arith.subf %106, %113 : vector<256x256xf32>
    %115 = math.exp %114 : vector<256x256xf32>
    %c3_58 = arith.constant 3 : index
    %c0_59 = arith.constant 0 : index
    %116 = vector.load %arg13[%c3_58, %c0_59] : memref<4x256xf32, #tpu.memory_space<vmem>>, vector<1x256xf32>
    %117 = arith.mulf %112, %116 : vector<1x256xf32>
    %cst_60 = arith.constant dense<0.000000e+00> : vector<256xf32>
    %118 = vector.multi_reduction <add>, %115, %cst_60 [0] : vector<256x256xf32> to vector<256xf32>
    %119 = vector.shape_cast %118 : vector<256xf32> to vector<1x256xf32>
    %120 = arith.addf %117, %119 : vector<1x256xf32>
    %c3_61 = arith.constant 3 : index
    %c0_62 = arith.constant 0 : index
    %121 = vector.load %arg13[%c3_61, %c0_62] : memref<4x256xf32, #tpu.memory_space<vmem>>, vector<1x256xf32>
    tpu.vector_store %arg13[%c3_61, %c0_62], %120 {strides = array<i32>} : memref<4x256xf32, #tpu.memory_space<vmem>>, vector<1x256xf32>,
    %c96 = arith.constant 96 : index
    %c0_63 = arith.constant 0 : index
    %122 = vector.load %arg14[%c96, %c0_63] : memref<128x256xf32, #tpu.memory_space<vmem>>, vector<32x256xf32>
    %123 = vector.broadcast %112 : vector<1x256xf32> to vector<32x256xf32>
    %124 = arith.mulf %123, %122 : vector<32x256xf32>
    %125 = arith.truncf %115 : vector<256x256xf32> to vector<256x256xbf16>
    %cst_64 = arith.constant dense<0.000000e+00> : vector<32x256xf32>
    %126 = tpu.matmul %105, %125, %cst_64 {dimension_numbers = #tpu.dot_dimension_numbers<[1], [0], [0], [1], [0, 0, 1, 1], [], []>} : vector<32x256xbf16>, vector<256x256xbf16>, vector<32x256xf32> -> vector<32x256xf32>
    %127 = arith.addf %124, %126 : vector<32x256xf32>
    %c96_65 = arith.constant 96 : index
    %c0_66 = arith.constant 0 : index
    %128 = vector.load %arg14[%c96_65, %c0_66] : memref<128x256xf32, #tpu.memory_space<vmem>>, vector<32x256xf32>
    tpu.vector_store %arg14[%c96_65, %c0_66], %127 {strides = array<i32>} : memref<128x256xf32, #tpu.memory_space<vmem>>, vector<32x256xf32>,
    %c3_67 = arith.constant 3 : index
    %c0_68 = arith.constant 0 : index
    %129 = vector.load %arg12[%c3_67, %c0_68] : memref<4x256xf32, #tpu.memory_space<vmem>>, vector<1x256xf32>
    tpu.vector_store %arg12[%c3_67, %c0_68], %110 {strides = array<i32>} : memref<4x256xf32, #tpu.memory_space<vmem>>, vector<1x256xf32>,
    %c0_i32_69 = arith.constant 0 : i32
    %130 = arith.cmpi eq, %arg2, %c0_i32_69 : i32
    %131 = arith.extui %130 : i1 to i32
    %c0_i32_70 = arith.constant 0 : i32
    %132 = arith.cmpi ne, %131, %c0_i32_70 : i32
    scf.if %132 {
      %c0_71 = arith.constant 0 : index
      %c0_72 = arith.constant 0 : index
      %133 = vector.load %arg14[%c0_71, %c0_72] : memref<128x256xf32, #tpu.memory_space<vmem>>, vector<32x256xf32>
      %c0_73 = arith.constant 0 : index
      %c0_74 = arith.constant 0 : index
      %134 = vector.load %arg13[%c0_73, %c0_74] : memref<4x256xf32, #tpu.memory_space<vmem>>, vector<1x256xf32>
      %cst_75 = arith.constant 1.000000e+00 : f32
      %135 = vector.broadcast %cst_75 : f32 to vector<1x256xf32>
      %136 = arith.divf %135, %134 : vector<1x256xf32>
      %137 = vector.broadcast %136 : vector<1x256xf32> to vector<32x256xf32>
      %138 = arith.mulf %133, %137 : vector<32x256xf32>
      %c0_76 = arith.constant 0 : index
      %c0_77 = arith.constant 0 : index
      %139 = vector.load %arg14[%c0_76, %c0_77] : memref<128x256xf32, #tpu.memory_space<vmem>>, vector<32x256xf32>
      tpu.vector_store %arg14[%c0_76, %c0_77], %138 {strides = array<i32>} : memref<128x256xf32, #tpu.memory_space<vmem>>, vector<32x256xf32>,
      %c32_78 = arith.constant 32 : index
      %c0_79 = arith.constant 0 : index
      %140 = vector.load %arg14[%c32_78, %c0_79] : memref<128x256xf32, #tpu.memory_space<vmem>>, vector<32x256xf32>
      %c1_80 = arith.constant 1 : index
      %c0_81 = arith.constant 0 : index
      %141 = vector.load %arg13[%c1_80, %c0_81] : memref<4x256xf32, #tpu.memory_space<vmem>>, vector<1x256xf32>
      %cst_82 = arith.constant 1.000000e+00 : f32
      %142 = vector.broadcast %cst_82 : f32 to vector<1x256xf32>
      %143 = arith.divf %142, %141 : vector<1x256xf32>
      %144 = vector.broadcast %143 : vector<1x256xf32> to vector<32x256xf32>
      %145 = arith.mulf %140, %144 : vector<32x256xf32>
      %c32_83 = arith.constant 32 : index
      %c0_84 = arith.constant 0 : index
      %146 = vector.load %arg14[%c32_83, %c0_84] : memref<128x256xf32, #tpu.memory_space<vmem>>, vector<32x256xf32>
      tpu.vector_store %arg14[%c32_83, %c0_84], %145 {strides = array<i32>} : memref<128x256xf32, #tpu.memory_space<vmem>>, vector<32x256xf32>,
      %c64_85 = arith.constant 64 : index
      %c0_86 = arith.constant 0 : index
      %147 = vector.load %arg14[%c64_85, %c0_86] : memref<128x256xf32, #tpu.memory_space<vmem>>, vector<32x256xf32>
      %c2_87 = arith.constant 2 : index
      %c0_88 = arith.constant 0 : index
      %148 = vector.load %arg13[%c2_87, %c0_88] : memref<4x256xf32, #tpu.memory_space<vmem>>, vector<1x256xf32>
      %cst_89 = arith.constant 1.000000e+00 : f32
      %149 = vector.broadcast %cst_89 : f32 to vector<1x256xf32>
      %150 = arith.divf %149, %148 : vector<1x256xf32>
      %151 = vector.broadcast %150 : vector<1x256xf32> to vector<32x256xf32>
      %152 = arith.mulf %147, %151 : vector<32x256xf32>
      %c64_90 = arith.constant 64 : index
      %c0_91 = arith.constant 0 : index
      %153 = vector.load %arg14[%c64_90, %c0_91] : memref<128x256xf32, #tpu.memory_space<vmem>>, vector<32x256xf32>
      tpu.vector_store %arg14[%c64_90, %c0_91], %152 {strides = array<i32>} : memref<128x256xf32, #tpu.memory_space<vmem>>, vector<32x256xf32>,
      %c96_92 = arith.constant 96 : index
      %c0_93 = arith.constant 0 : index
      %154 = vector.load %arg14[%c96_92, %c0_93] : memref<128x256xf32, #tpu.memory_space<vmem>>, vector<32x256xf32>
      %c3_94 = arith.constant 3 : index
      %c0_95 = arith.constant 0 : index
      %155 = vector.load %arg13[%c3_94, %c0_95] : memref<4x256xf32, #tpu.memory_space<vmem>>, vector<1x256xf32>
      %cst_96 = arith.constant 1.000000e+00 : f32
      %156 = vector.broadcast %cst_96 : f32 to vector<1x256xf32>
      %157 = arith.divf %156, %155 : vector<1x256xf32>
      %158 = vector.broadcast %157 : vector<1x256xf32> to vector<32x256xf32>
      %159 = arith.mulf %154, %158 : vector<32x256xf32>
      %c96_97 = arith.constant 96 : index
      %c0_98 = arith.constant 0 : index
      %160 = vector.load %arg14[%c96_97, %c0_98] : memref<128x256xf32, #tpu.memory_space<vmem>>, vector<32x256xf32>
      tpu.vector_store %arg14[%c96_97, %c0_98], %159 {strides = array<i32>} : memref<128x256xf32, #tpu.memory_space<vmem>>, vector<32x256xf32>,
      %c0_99 = arith.constant 0 : index
      %c0_100 = arith.constant 0 : index
      %161 = vector.load %arg7[%c0_99, %c0_100] : memref<8x128xbf16, #tpu.memory_space<vmem>>, vector<8x128xbf16>
      %c0_101 = arith.constant 0 : index
      %c0_102 = arith.constant 0 : index
      %162 = vector.load %arg14[%c0_101, %c0_102] : memref<128x256xf32, #tpu.memory_space<vmem>>, vector<128x256xf32>
      %163 = arith.truncf %162 : vector<128x256xf32> to vector<128x256xbf16>
      %cst_103 = arith.constant dense<0.000000e+00> : vector<8x256xf32>
      %164 = tpu.matmul %161, %163, %cst_103 {dimension_numbers = #tpu.dot_dimension_numbers<[1], [0], [0], [1], [0, 0, 1, 1], [], []>} : vector<8x128xbf16>, vector<128x256xbf16>, vector<8x256xf32> -> vector<8x256xf32>
      %c0_104 = arith.constant 0 : index
      %c0_105 = arith.constant 0 : index
      %c0_106 = arith.constant 0 : index
      %165 = vector.load %arg3[%c0_104, %c0_105, %c0_106] : memref<1x8x256xf32, #tpu.memory_space<vmem>>, vector<1x8x256xf32>
      %166 = vector.shape_cast %165 : vector<1x8x256xf32> to vector<8x256xf32>
      %167 = arith.addf %164, %166 : vector<8x256xf32>
      %c0_107 = arith.constant 0 : index
      %c0_108 = arith.constant 0 : index
      %168 = vector.load %arg9[%c0_107, %c0_108] : memref<8x1xf32, #tpu.memory_space<vmem>>, vector<8x1xf32>
      %169 = vector.broadcast %168 : vector<8x1xf32> to vector<8x256xf32>
      %170 = arith.addf %167, %169 : vector<8x256xf32>
      %c0_109 = arith.constant 0 : index
      %c0_110 = arith.constant 0 : index
      %c0_111 = arith.constant 0 : index
      %171 = vector.load %arg10[%c0_109, %c0_110, %c0_111] : memref<1x8x256xf32, #tpu.memory_space<vmem>>, vector<1x8x256xf32>
      %172 = vector.shape_cast %171 : vector<1x8x256xf32> to vector<8x256xf32>
      %173 = vector.shape_cast %170 : vector<8x256xf32> to vector<1x8x256xf32>
      tpu.vector_store %arg10[%c0_109, %c0_110, %c0_111], %173 {strides = array<i32>} : memref<1x8x256xf32, #tpu.memory_space<vmem>>, vector<1x8x256xf32>,
    } else {
    }
    return
  }
  func.func @transform_0(%arg0: i32, %arg1: i32, %arg2: i32) -> (i32, i32, i32) {
    %c0_i32 = arith.constant 0 : i32
    %c0_i32_0 = arith.constant 0 : i32
    return %arg0, %c0_i32, %arg1 : i32, i32, i32
  }
  func.func @transform_1(%arg0: i32, %arg1: i32, %arg2: i32) -> (i32, i32, i32) {
    %c0_i32 = arith.constant 0 : i32
    %c0_i32_0 = arith.constant 0 : i32
    return %arg0, %c0_i32, %arg2 : i32, i32, i32
  }
  func.func @transform_2(%arg0: i32, %arg1: i32, %arg2: i32) -> (i32, i32) {
    %c0_i32 = arith.constant 0 : i32
    %c0_i32_0 = arith.constant 0 : i32
    %c0_i32_1 = arith.constant 0 : i32
    return %c0_i32, %c0_i32_0 : i32, i32
  }
  func.func @transform_3(%arg0: i32, %arg1: i32, %arg2: i32) -> (i32, i32) {
    %c0_i32 = arith.constant 0 : i32
    %c0_i32_0 = arith.constant 0 : i32
    %c0_i32_1 = arith.constant 0 : i32
    return %c0_i32, %c0_i32_0 : i32, i32
  }
  func.func @transform_4(%arg0: i32, %arg1: i32, %arg2: i32) -> (i32, i32) {
    %c0_i32 = arith.constant 0 : i32
    %c0_i32_0 = arith.constant 0 : i32
    %c0_i32_1 = arith.constant 0 : i32
    return %c0_i32, %c0_i32_0 : i32, i32
  }
  func.func @transform_5(%arg0: i32, %arg1: i32, %arg2: i32) -> (i32, i32) {
    %c0_i32 = arith.constant 0 : i32
    %c0_i32_0 = arith.constant 0 : i32
    %c0_i32_1 = arith.constant 0 : i32
    return %c0_i32, %c0_i32_0 : i32, i32
  }
  func.func @transform_6(%arg0: i32, %arg1: i32, %arg2: i32) -> (i32, i32) {
    %c0_i32 = arith.constant 0 : i32
    %c0_i32_0 = arith.constant 0 : i32
    %c0_i32_1 = arith.constant 0 : i32
    return %c0_i32, %c0_i32_0 : i32, i32
  }
  func.func @transform_7(%arg0: i32, %arg1: i32, %arg2: i32) -> (i32, i32, i32) {
    %c0_i32 = arith.constant 0 : i32
    %c0_i32_0 = arith.constant 0 : i32
    return %arg0, %c0_i32, %arg1 : i32, i32, i32
  }
}

</mosaic_0001>

<bundles_post_ra>
// kernel: tpu_custom_call.1
= control target key start
LH: loop header
LB: loop body
LE: loop exit
PB: predicated region body
PF: predicated region fallthrough
CT: control target
= control target key end

     0   :  { %12 = vsyncpa [#allocation7], 0  ;;  %s8833_s0 = inlined_call_operand.vmem [shape: f32[2,8,256], index: 0, kind: input, shape index: {}]   ;;  %s8834_s1 = inlined_call_operand.vmem [shape: f32[2,8,256], index: 1, kind: input, shape index: {}]   ;;  %s8835_s2 = inlined_call_operand.vmem [shape: bf16[128,8], index: 2, kind: input, shape index: {}]   ;;  %s8836_s3 = inlined_call_operand.vmem [shape: bf16[256,8], index: 3, kind: input, shape index: {}]   ;;  %s8837_s4 = inlined_call_operand.vmem [shape: bf16[8,128], index: 4, kind: input, shape index: {}]   ;;  %s8838_s5 = inlined_call_operand.vmem [shape: f32[8,1], index: 5, kind: input, shape index: {}]   ;;  %s8839_s6 = inlined_call_operand.vmem [shape: f32[8,1], index: 6, kind: input, shape index: {}]   ;;  %s8840_s7 = inlined_call_operand.hbm [shape: f32[2,8,256], index: 7, kind: output, shape index: {}]  }
   0x1   :  { %14 = vsyncpa [#allocation7 + $0x1], 0  ;;  %s5579_s24 = smov 0   ;;  %s5581_s25 = smov 0  }
   0x2   :  { %s5583_s26 = smov 0   ;;  %s5585_s27 = smov 0  }
   0x3   :  { %s5587_s28 = smov 0   ;;  %s5589_s29 = smov 0  }
   0x4 LB: > { %s4702_s30 = sadd.s32 4294967295, %s5532_s29   ;;  %s4703_s8 = sadd.s32 4294967294, %s5532_s29   ;;  %s5532_s29 = sphi %s5589_s29, %s20_s29   ;;  %s5528_s28 = sphi %s5587_s28, %s9623_s28   ;;  %s5524_s27 = sphi %s5585_s27, %s9622_s27   ;;  %s5520_s26 = sphi %s5583_s26, %s9621_s26   ;;  %s5516_s25 = sphi %s5581_s25, %s9620_s25   ;;  %s5512_s24 = sphi %s5579_s24, %s9619_s24  }
   0x5   : > { %s39_s9 = sadd.s32 1, %s5528_s28  ;;  %s209_s10 = sadd.s32 1, %s5520_s26 }
   0x6   : > { %p41_p0 = scmp.ge.s32.totalorder %s39_s9, 2  ;;  %p219_p1 = scmp.ne.s32.totalorder %s5520_s26, %s5516_s25 }
   0x7   : > { %p220_p2 = scmp.eq.s32.totalorder %s4702_s30, 1  ;;  %p225_p3 = scmp.ne.s32.totalorder %s5516_s25, %s5512_s24 }
   0x8   : > { %s9625_s9 = smov (%p41_p0, %s39_s9), 0  ;;  %p226_p5 = scmp.eq.s32.totalorder %s4703_s8, 1 }
   0x9   : > { %p5619_p4 = por %p220_p2, %p219_p1  ;;  %s204_s12 = ssub.s32 %s5528_s28, %s9625_s9 }
   0xa   : > { %p4706_p6 = scmp.ge.s32.totalorder %s5532_s29, 1  ;;  %p207_p7 = scmp.eq.s32.totalorder %s204_s12, 0 }
   0xb   : > { %p5626_p8 = por %p226_p5, %p225_p3  ;;  %p285_p9 = scmp.lt.s32.totalorder %s5532_s29, 3 }
   0xc   : > { %s5632_s14 = scalar_select %p207_p7, %s5520_s26, %s209_s10  }
   0xd   : > { %p286_p10 = pnand %p4706_p6, %p285_p9 }
   0xf   : > { %289 = sbr.rel (%p286_p10) target bundleno = 2877 (0xb3d), region = 48 }
  0x14   : > { %v378_v0 = vld [vmem:[%s8838_s5] sm:$0xff]  ;;  %v8841_v1 = vmov 0   ;;  %p331_p11 = scmp.lt.s32.totalorder %s5524_s27, 1  ;;  %vm469_vm0 = vcmask 1043456   ;;  %vm444_vm1 = vcmask 64512   ;;  %v4906_v59 = vld [vmem:[%s8836_s3 + $0x10] sm:$0xff]  }
  0x15   : > { %4895 = vset.pattern.permute.xlu0 %v8841_v1  ;;  %508 = vmatprep.mubr.bf16.mxu0 %v8841_v1  ;;  %v4896_v55 = vld [vmem:[%s8835_s2] sm:$0xff]   ;;  %v4897_v60 = vld [vmem:[%s8835_s2 + $0x8] sm:$0xff]   ;;  %v4907_v61 = vld [vmem:[%s8836_s3 + $0x18] sm:$0xff]   ;;  %vm1160_vm2 = vcmask 261120   ;;  %s327_s16 = sand.u32 1, %s5516_s25  }
  0x16   : > { %381 = vperm.xlu0 %4895, %v378_v0   ;;  %907 = vmatprep.mubr.bf16.mxu1 %v8841_v1  ;;  %s332_s17 = scalar_select %p331_p11, %s5524_s27, 1  ;;  %v4898_v62 = vld [vmem:[%s8835_s2 + $0x10] sm:$0xff]   ;;  %v4908_v63 = vld [vmem:[%s8836_s3 + $0x20] sm:$0xff]  }
  0x18   : > { %s4831_s18 = sshll.u32 %s332_s17, 4  ;;  %s4707_s17 = sshll.u32 %s327_s16, 4 }
  0x19   : > { %s5645_s21 = scalar_lea.vmem %s8833_s0, %s4831_s18  ;;  %s348_s30 = scalar_lea.vmem %s8834_s1, %s4831_s18 }
  0x1a   : > { %680 = vperm.xlu0 %4895, %v378_v0   ;;  %v356_v2 = vld [vmem:[%s5645_s21] sm:$0xff]  ;;  %v357_v3 = vld [vmem:[%s5645_s21 + $0x8] sm:$0xff]  ;;  %v4899_v0 = vld [vmem:[%s8835_s2 + $0x18] sm:$0xff]   ;;  %s4833_s18 = sshll.u32 %s5524_s27, 8  ;;  %s329_s19 = scalar_lea.vmem [#allocation6], %s4707_s17 }
  0x1b   : > { %v358_v4 = vmul.f32 %v356_v2, %v356_v2  ;;  %v359_v5 = vmul.f32 %v357_v3, %v357_v3  ;;  %v655_v6 = vld [vmem:[%s348_s30] sm:$0xff]  ;;  %v656_v7 = vld [vmem:[%s348_s30 + $0x8] sm:$0xff]  ;;  %s4605_s20 = sshll.u32 %s329_s19, 4  ;;  %s8793_s30 = scalar_lea.hbm %s8840_s7, %s4833_s18  ;;  %s4606_s20 = int_to_ptr.vmem [resolvable:$true] %s4605_s20 }
  0x1c   : > { %v657_v9 = vmul.f32 %v655_v6, %v655_v6  ;;  %v658_v11 = vmul.f32 %v656_v7, %v656_v7  ;;  %s5456_s8 = scalar_lea.vmem %s4606_s20, 256  ;;  %s5538_s27 = smov [#allocation6]  }
  0x1d   : > { %v360_v8 = vrot.slane %v358_v4, 4  ;;  %v366_v10 = vrot.slane %v359_v5, 4  ;;  %p5457_p12 = scmp.ne.s32.totalorder %s4606_s20, %s5456_s8  ;;  %s5460_s10 = sshll.u32 %s5538_s27, 4  ;;  %s5461_s10 = int_to_ptr.vmem [resolvable:$false] %s5460_s10 }
  0x1e   : > { %v659_v13 = vrot.slane %v657_v9, 4  ;;  %v665_v15 = vrot.slane %v658_v11, 4  ;;  %s5462_s12 = scalar_lea.vmem %s5461_s10, 512  ;;  %p5463_p1 = scmp.lt.s32.totalorder %s4606_s20, %s5461_s10 }
  0x1f   : > { %v361_v12 = vadd.f32 %v360_v8, %v358_v4  ;;  %v367_v14 = vadd.f32 %v366_v10, %v359_v5  ;;  %v4910_v4 = vld [vmem:[%s8836_s3 + $0x30] sm:$0xff]   ;;  %v4901_v5 = vld [vmem:[%s8835_s2 + $0x28] sm:$0xff]   ;;  %v4903_v8 = vld [vmem:[%s8835_s2 + $0x38] sm:$0xff]   ;;  %p5458_p13 = pnand %p5457_p12, %p5619_p4  ;;  %p5464_p2 = scmp.lt.s32.totalorder %s5462_s12, %s5456_s8 }
  0x20   : > { %v660_v17 = vadd.f32 %v659_v13, %v657_v9  ;;  %v666_v19 = vadd.f32 %v665_v15, %v658_v11  ;;  %v4904_v9 = vld [vmem:[%s8836_s3] sm:$0xff]   ;;  %v4905_v10 = vld [vmem:[%s8836_s3 + $0x8] sm:$0xff]  }
  0x21   : > { %v362_v16 = vrot.slane %v361_v12, 2  ;;  %v368_v18 = vrot.slane %v367_v14, 2  ;;  %p5459_p0 = pneg %p5458_p13  ;;  %p5465_p3 = por %p5464_p2, %p5463_p1 }
  0x22   : > { %v661_v21 = vrot.slane %v660_v17, 2  ;;  %v667_v23 = vrot.slane %v666_v19, 2 }
  0x23   : > { %v363_v20 = vadd.f32 %v362_v16, %v361_v12  ;;  %v369_v22 = vadd.f32 %v368_v18, %v367_v14  ;;  %p5466_p5 = pnand %p5465_p3, %p5459_p0 }
  0x24   : > { %v662_v25 = vadd.f32 %v661_v21, %v660_v17  ;;  %v668_v27 = vadd.f32 %v667_v23, %v666_v19 }
  0x25   : > { %v364_v24 = vrot.slane %v363_v20, 1  ;;  %v370_v26 = vrot.slane %v369_v22, 1 }
  0x26   : > { %v663_v29 = vrot.slane %v662_v25, 1  ;;  %v669_v31 = vrot.slane %v668_v27, 1 }
  0x27   : > { %v365_v28 = vadd.f32 %v364_v24, %v363_v20  ;;  %v371_v30 = vadd.f32 %v370_v26, %v369_v22 }
  0x28   : > { %v664_v33 = vadd.f32 %v663_v29, %v662_v25  ;;  %v670_v35 = vadd.f32 %v669_v31, %v668_v27 }
  0x29   : > { %v372_v32 = vmax.f32 %v365_v28, 1e-24  ;;  %v373_v34 = vmax.f32 %v371_v30, 1e-24 }
  0x2a   : > { %v671_v36 = vmax.f32 %v664_v33, 1e-24  ;;  %v672_v37 = vmax.f32 %v670_v35, 1e-24 }
  0x2b   : > { %4920 = vrsqrt.f32 %v372_v32 }
  0x2c   : > { %4922 = vrsqrt.f32 %v373_v34 }
  0x2d   : > { %4924 = vrsqrt.f32 %v671_v36 }
  0x2e   : > { %4926 = vrsqrt.f32 %v672_v37 }
  0x38   : > { %v4921_v38 = vpop.eup %4920 }
  0x39   : > { %v4923_v39 = vpop.eup %4922  ;;  %v376_v41 = vmul.f32 %v4921_v38, %v356_v2  ;;  %v4909_v2 = vld [vmem:[%s8836_s3 + $0x28] sm:$0xff]  }
  0x3a   : > { %v4925_v40 = vpop.eup %4924  ;;  %v377_v42 = vmul.f32 %v4923_v39, %v357_v3  ;;  %v4900_v3 = vld [vmem:[%s8835_s2 + $0x20] sm:$0xff]  }
  0x3b   : > { %v4927_v43 = vpop.eup %4926  ;;  %v675_v47 = vmul.f32 %v4925_v40, %v655_v6  ;;  %v4911_v6 = vld [vmem:[%s8836_s3 + $0x38] sm:$0xff]  }
  0x3c   : > { %v676_v48 = vmul.f32 %v4927_v43, %v656_v7  ;;  %v4902_v7 = vld [vmem:[%s8835_s2 + $0x30] sm:$0xff]  }
  0x91   : > { %v382_v44 = vpop.permute.xlu0 %381 }
  0x92   : > { %v384_v45 = vmul.f32 %v382_v44, %v376_v41  ;;  %v385_v46 = vmul.f32 %v382_v44, %v377_v42 }
  0x94   : > { %v386_v49 = vpack.c.bf16 %v384_v45, %v384_v45  ;;  %v387_v50 = vpack.c.bf16 %v385_v46, %v385_v46 }
  0x95   : > { %v681_v51 = vpop.permute.xlu0 %680 }
  0x96   : > { %v683_v52 = vmul.f32 %v681_v51, %v675_v47  ;;  %v684_v53 = vmul.f32 %v681_v51, %v676_v48  ;;  %4720 = vmatprep.subr.msk.bf16.mxu0 %vm469_vm0, %v387_v50  ;;  %v471_v54 = vsel %vm469_vm0, %v386_v49, 0 }
  0x97   : > { %491 = vmatpush1.bf16.msra.mxu0 %v471_v54 }
  0x98   : > { %v685_v56 = vpack.c.bf16 %v683_v52, %v683_v52  ;;  %v686_v57 = vpack.c.bf16 %v684_v53, %v684_v53 }
  0x9a   : > { %4721 = vmatmul.mubr.msk.bf16.vlgmr.msra.gmra.mxu0 %vm444_vm1, %v4896_v55  ;;  %4745 = vmatprep.subr.msk.bf16.mxu0 %vm469_vm0, %v686_v57  ;;  %v850_v58 = vsel %vm469_vm0, %v685_v56, 0 }
  0x9b   : > { %4834 = vmatprep.subr.msk.bf16.mxu1 %vm469_vm0, %v686_v57  ;;  %870 = vmatpush1.bf16.msra.mxu0 %v850_v58 }
  0x9c   : > { %4835 = vmatpush1.bf16.msra.mxu1 %v850_v58  ;;  %518 = vmatprep.mubr.bf16.mxu0 %v8841_v1 }
  0x9f   : > { %4748 = vmatmul.mubr.msk.bf16.vlgmr.msra.gmra.mxu1 %vm444_vm1, %v4906_v59 }
  0xa0   : > { %917 = vmatprep.mubr.bf16.mxu1 %v8841_v1 }
  0xa2   : > { %4722 = vmatmul.mubr.msk.bf16.gmra.mxu0 %vm444_vm1, %v4897_v60 }
  0xa3   : > { %528 = vmatprep.mubr.bf16.mxu0 %v8841_v1 }
  0xa7   : > { %4749 = vmatmul.mubr.msk.bf16.gmra.mxu1 %vm444_vm1, %v4907_v61 }
  0xa8   : > { %927 = vmatprep.mubr.bf16.mxu1 %v8841_v1 }
  0xaa   : > { %4723 = vmatmul.mubr.msk.bf16.gmra.mxu0 %vm444_vm1, %v4898_v62 }
  0xab   : > { %538 = vmatprep.mubr.bf16.mxu0 %v8841_v1 }
  0xaf   : > { %4750 = vmatmul.mubr.msk.bf16.gmra.mxu1 %vm444_vm1, %v4908_v63 }
  0xb0   : > { %937 = vmatprep.mubr.bf16.mxu1 %v8841_v1 }
  0xb2   : > { %4724 = vmatmul.mubr.msk.bf16.gmra.mxu0 %vm444_vm1, %v4899_v0 }
  0xb3   : > { %548 = vmatprep.mubr.bf16.mxu0 %v8841_v1 }
  0xb7   : > { %4751 = vmatmul.mubr.msk.bf16.gmra.mxu1 %vm444_vm1, %v4909_v2 }
  0xb8   : > { %947 = vmatprep.mubr.bf16.mxu1 %v8841_v1 }
  0xba   : > { %4725 = vmatmul.mubr.msk.bf16.gmra.mxu0 %vm444_vm1, %v4900_v3 }
  0xbb   : > { %558 = vmatprep.mubr.bf16.mxu0 %v8841_v1 }
  0xbf   : > { %4752 = vmatmul.mubr.msk.bf16.gmra.mxu1 %vm444_vm1, %v4910_v4 }
  0xc0   : > { %957 = vmatprep.mubr.bf16.mxu1 %v8841_v1 }
  0xc2   : > { %4726 = vmatmul.mubr.msk.bf16.gmra.mxu0 %vm444_vm1, %v4901_v5 }
  0xc3   : > { %568 = vmatprep.mubr.bf16.mxu0 %v8841_v1 }
  0xc7   : > { %4753 = vmatmul.mubr.msk.bf16.gmra.mxu1 %vm444_vm1, %v4911_v6 }
  0xc8   : > { %967 = vmatprep.mubr.bf16.mxu1 %v8841_v1 }
  0xca   : > { %4727 = vmatmul.mubr.msk.bf16.gmra.mxu0 %vm444_vm1, %v4902_v7 }
  0xcb   : > { %578 = vmatprep.mubr.bf16.mxu0 %v8841_v1 }
  0xd2   : > { %4728 = vmatmul.mubr.msk.bf16.gmra.mxu0 %vm444_vm1, %v4903_v8 }
  0xd3   : > { %887 = vmatprep.mubr.bf16.mxu0 %v8841_v1 }
  0xda   : > { %4746 = vmatmul.mubr.msk.bf16.vlgmr.msra.gmra.mxu0 %vm444_vm1, %v4904_v9 }
  0xdb   : > { %897 = vmatprep.mubr.bf16.mxu0 %v8841_v1 }
  0xe2   : > { %4747 = vmatmul.mubr.msk.bf16.gmra.mxu0 %vm444_vm1, %v4905_v10 }
  0xe3   : > { %1241 = vmatprep.mubr.bf16.mxu0 %v8841_v1 }
 0x15a   : > { %v510_v11 = vpop.f32.mrf.mxu0 }
 0x15c   : > { %v512_v12 = vpop.f32.mrf.mxu0 }
 0x15e   : > { %v514_v13 = vpop.f32.mrf.mxu0 }
 0x15f   : > { %v1112_v24 = vpack.c.bf16 %v514_v13, %v510_v11  ;;  %v909_v43 = vpop.f32.mrf.mxu1 }
 0x160   : > { %v516_v14 = vpop.f32.mrf.mxu0 }
 0x161   : > { %v1113_v22 = vpack.c.bf16 %v516_v14, %v512_v12  ;;  %v5781_v46 = vpop.f32.mrf.mxu1 }
 0x162   : > { %v520_v15 = vpop.f32.mrf.mxu0 }
 0x163   : > { %v913_v50 = vpop.f32.mrf.mxu1 }
 0x164   : > { %v522_v16 = vpop.f32.mrf.mxu0 }
 0x165   : > { %v5793_v53 = vpop.f32.mrf.mxu1 }
 0x166   : > { %v524_v17 = vpop.f32.mrf.mxu0 }
 0x167   : > { %v1114_v20 = vpack.c.bf16 %v524_v17, %v520_v15  ;;  %v919_v57 = vpop.f32.mrf.mxu1 }
 0x168   : > { %v526_v18 = vpop.f32.mrf.mxu0 }
 0x169   : > { %v1115_v19 = vpack.c.bf16 %v526_v18, %v522_v16  ;;  %v5801_v60 = vpop.f32.mrf.mxu1  ;;  %v1052_v16 = vpack.c.bf16 %v913_v50, %v909_v43 }
 0x16a   : > { %v5737_v21 = vpop.f32.mrf.mxu0 }
 0x16b   : > { %9088 = vst [vmem:[#allocation9_spill] sm:$0xff] %v5737_v21  ;;  %1221 = vmatprep.subr.bf16.mxu0 %v1115_v19  ;;  %v923_v0 = vpop.f32.mrf.mxu1 }
 0x16c   : > { %v5739_v23 = vpop.f32.mrf.mxu0  ;;  %1222 = vmatpush1.bf16.msra.mxu0 %v1114_v20  ;;  %v1054_v19 = vpack.c.bf16 %v923_v0, %v919_v57  ;;  %v4578_v0 = vld [vmem:[%s8839_s6] sm:$0xff] }
 0x16d   : > { %9089 = vst [vmem:[#allocation10_spill] sm:$0xff] %v5739_v23  ;;  %1223 = vmatprep.subr.bf16.mxu0 %v1113_v22  ;;  %v5803_v5 = vpop.f32.mrf.mxu1 }
 0x16e   : > { %v5741_v25 = vpop.f32.mrf.mxu0 }
 0x16f   : > { %9090 = vst [vmem:[#allocation11_spill] sm:$0xff] %v5741_v25  ;;  %v929_v9 = vpop.f32.mrf.mxu1 }
 0x170   : > { %v5745_v27 = vpop.f32.mrf.mxu0  ;;  %1224 = vmatpush1.bf16.msra.mxu0 %v1112_v24 }
 0x171   : > { %9091 = vst [vmem:[#allocation12_spill] sm:$0xff] %v5745_v27  ;;  %v5805_v11 = vpop.f32.mrf.mxu1  ;;  %v1055_v27 = vpack.c.bf16 %v5803_v5, %v5801_v60 }
 0x172   : > { %v5747_v28 = vpop.f32.mrf.mxu0 }
 0x173   : > { %9092 = vst [vmem:[#allocation13_spill] sm:$0xff] %v5747_v28  ;;  %v933_v12 = vpop.f32.mrf.mxu1  ;;  %v1053_v28 = vpack.c.bf16 %v5793_v53, %v5781_v46 }
 0x174   : > { %v5749_v29 = vpop.f32.mrf.mxu0  ;;  %v1056_v17 = vpack.c.bf16 %v933_v12, %v929_v9 }
 0x175   : > { %9093 = vst [vmem:[#allocation14_spill] sm:$0xff] %v5749_v29  ;;  %v5807_v13 = vpop.f32.mrf.mxu1 }
 0x176   : > { %v5751_v30 = vpop.f32.mrf.mxu0 }
 0x177   : > { %9094 = vst [vmem:[#allocation15_spill] sm:$0xff] %v5751_v30  ;;  %v939_v14 = vpop.f32.mrf.mxu1 }
 0x178   : > { %v5755_v32 = vpop.f32.mrf.mxu0 }
 0x179   : > { %9095 = vst [vmem:[#allocation16_spill] sm:$0xff] %v5755_v32  ;;  %v5809_v15 = vpop.f32.mrf.mxu1 }
 0x17a   : > { %v5757_v33 = vpop.f32.mrf.mxu0 }
 0x17b   : > { %9096 = vst [vmem:[#allocation17_spill] sm:$0xff] %v5757_v33  ;;  %v943_v18 = vpop.f32.mrf.mxu1 }
 0x17c   : > { %v5759_v34 = vpop.f32.mrf.mxu0  ;;  %v1058_v22 = vpack.c.bf16 %v943_v18, %v939_v14  ;;  %v4912_v18 = vld [vmem:[%s8836_s3 + $0x40] sm:$0xff]  }
 0x17d   : > { %9097 = vst [vmem:[#allocation18_spill] sm:$0xff] %v5759_v34  ;;  %v5811_v20 = vpop.f32.mrf.mxu1  ;;  %4754 = vmatmul.mubr.msk.bf16.gmra.mxu1 %vm444_vm1, %v4912_v18 }
 0x17e   : > { %v5761_v35 = vpop.f32.mrf.mxu0  ;;  %977 = vmatprep.mubr.bf16.mxu1 %v8841_v1 }
 0x17f   : > { %9098 = vst [vmem:[#allocation19_spill] sm:$0xff] %v5761_v35  ;;  %v949_v24 = vpop.f32.mrf.mxu1 }
 0x180   : > { %v5765_v37 = vpop.f32.mrf.mxu0 }
 0x181   : > { %9099 = vst [vmem:[#allocation20_spill] sm:$0xff] %v5765_v37 }
 0x182   : > { %v5767_v38 = vpop.f32.mrf.mxu0 }
 0x183   : > { %9100 = vst [vmem:[#allocation21_spill] sm:$0xff] %v5767_v38 }
 0x184   : > { %v5769_v39 = vpop.f32.mrf.mxu0 }
 0x185   : > { %9101 = vst [vmem:[#allocation22_spill] sm:$0xff] %v5769_v39 }
 0x186   : > { %v5771_v40 = vpop.f32.mrf.mxu0 }
 0x187   : > { %9102 = vst [vmem:[#allocation23_spill] sm:$0xff] %v5771_v40 }
 0x188   : > { %v5775_v42 = vpop.f32.mrf.mxu0 }
 0x189   : > { %9103 = vst [vmem:[#allocation24_spill] sm:$0xff] %v5775_v42 }
 0x18a   : > { %v5777_v44 = vpop.f32.mrf.mxu0 }
 0x18b   : > { %9104 = vst [vmem:[#allocation25_spill] sm:$0xff] %v5777_v44 }
 0x18c   : > { %v5779_v45 = vpop.f32.mrf.mxu0 }
 0x18d   : > { %9105 = vst [vmem:[#allocation26_spill] sm:$0xff] %v5779_v45 }
 0x18e   : > { %v5783_v47 = vpop.f32.mrf.mxu0 }
 0x18f   : > { %9106 = vst [vmem:[#allocation27_spill] sm:$0xff] %v5783_v47 }
 0x190   : > { %v5787_v49 = vpop.f32.mrf.mxu0 }
 0x191   : > { %9107 = vst [vmem:[#allocation28_spill] sm:$0xff] %v5787_v49 }
 0x192   : > { %v5789_v51 = vpop.f32.mrf.mxu0 }
 0x193   : > { %9108 = vst [vmem:[#allocation29_spill] sm:$0xff] %v5789_v51 }
 0x194   : > { %v5791_v52 = vpop.f32.mrf.mxu0 }
 0x195   : > { %9109 = vst [vmem:[#allocation30_spill] sm:$0xff] %v5791_v52 }
 0x196   : > { %v5795_v54 = vpop.f32.mrf.mxu0 }
 0x197   : > { %9110 = vst [vmem:[#allocation31_spill] sm:$0xff] %v5795_v54 }
 0x198   : > { %v5799_v56 = vpop.f32.mrf.mxu0 }
 0x199   : > { %9111 = vst [vmem:[#allocation32_spill] sm:$0xff] %v5799_v56 }
 0x19a   : > { %v889_v58 = vpop.f32.mrf.mxu0 }
 0x19c   : > { %v891_v59 = vpop.f32.mrf.mxu0 }
 0x19e   : > { %v893_v61 = vpop.f32.mrf.mxu0 }
 0x19f   : > { %v1048_v62 = vpack.c.bf16 %v893_v61, %v889_v58  ;;  %v5813_v58 = vpop.f32.mrf.mxu1 }
 0x1a0   : > { %v895_v63 = vpop.f32.mrf.mxu0 }
 0x1a1   : > { %v1049_v2 = vpack.c.bf16 %v895_v63, %v891_v59  ;;  %1128 = vxpose.xlu1.c.b16.start [1/2] (short) %v1048_v62, 128  ;;  %v953_v59 = vpop.f32.mrf.mxu1 }
 0x1a2   : > { %v899_v3 = vpop.f32.mrf.mxu0  ;;  %v1060_v43 = vpack.c.bf16 %v953_v59, %v949_v24 }
 0x1a3   : > { %1144 = vxpose.xlu0.c.b16.start [1/2] (short) %v1049_v2, 128  ;;  %v5815_v61 = vpop.f32.mrf.mxu1 }
 0x1a4   : > { %v901_v4 = vpop.f32.mrf.mxu0  ;;  %9112 = vst [vmem:[#allocation33_spill] sm:$0xff] %v5815_v61 }
 0x1a5   : > { %v959_v62 = vpop.f32.mrf.mxu1 }
 0x1a6   : > { %v903_v6 = vpop.f32.mrf.mxu0 }
 0x1a7   : > { %v1050_v7 = vpack.c.bf16 %v903_v6, %v899_v3  ;;  %v5817_v63 = vpop.f32.mrf.mxu1 }
 0x1a8   : > { %v905_v8 = vpop.f32.mrf.mxu0  ;;  %9113 = vst [vmem:[#allocation34_spill] sm:$0xff] %v5817_v63 }
 0x1a9   : > { %v1051_v10 = vpack.c.bf16 %v905_v8, %v901_v4  ;;  %1129 = vxpose.xlu1.c.b16.end [2/2] (short) %v1050_v7, 128  ;;  %v963_v50 = vpop.f32.mrf.mxu1 }
 0x1aa   : > { %v1062_v57 = vpack.c.bf16 %v963_v50, %v959_v62 }
 0x1ab   : > { %1145 = vxpose.xlu0.c.b16.end [2/2] (short) %v1051_v10, 128 }
 0x1c2   : > { %1931 = vxpose.xlu1.c.b16.start [1/2] (short) %v1052_v16, 128 }
 0x1c4   : > { %2731 = vxpose.xlu0.c.b16.start [1/2] (short) %v1056_v17, 128 }
 0x1c6   : > { %1932 = vxpose.xlu1.c.b16.end [2/2] (short) %v1054_v19, 128 }
 0x1c8   : > { %2732 = vxpose.xlu0.c.b16.end [2/2] (short) %v1058_v22, 128  ;;  %v4913_v22 = vld [vmem:[%s8836_s3 + $0x48] sm:$0xff]  }
 0x1c9   : > { %4755 = vmatmul.mubr.msk.bf16.gmra.mxu1 %vm444_vm1, %v4913_v22 }
 0x1ca   : > { %987 = vmatprep.mubr.bf16.mxu1 %v8841_v1 }
 0x1df   : > { %1947 = vxpose.xlu1.c.b16.start [1/2] (short) %v1053_v28, 128 }
 0x1e1   : > { %3531 = vxpose.xlu0.c.b16.start [1/2] (short) %v1060_v43, 128 }
 0x1e3   : > { %1948 = vxpose.xlu1.c.b16.end [2/2] (short) %v1055_v27, 128 }
 0x1e5   : > { %3532 = vxpose.xlu0.c.b16.end [2/2] (short) %v1062_v57, 128 }
 0x206   : > { %4581 = vperm.xlu0 %4895, %v4578_v0  }
 0x207   : > { %v1136_v2 = vpop.trf.xlu1 }
 0x208   : > { %4762 = vmatmul.mubr.msk.bf16.vlgmr.msra.gmra.mxu0 %vm1160_vm2, %v1136_v2 }
 0x209   : > { %1251 = vmatprep.mubr.bf16.mxu0 %v8841_v1  ;;  %v1152_v12 = vpop.trf.xlu0 }
 0x20b   : > { %v1137_v3 = vpop.trf.xlu1 }
 0x20d   : > { %v1153_v14 = vpop.trf.xlu0 }
 0x20f   : > { %v1138_v4 = vpop.trf.xlu1 }
 0x210   : > { %4763 = vmatmul.mubr.msk.bf16.gmra.mxu0 %vm1160_vm2, %v1137_v3 }
 0x211   : > { %1261 = vmatprep.mubr.bf16.mxu0 %v8841_v1  ;;  %v1154_v16 = vpop.trf.xlu0 }
 0x213   : > { %v1139_v6 = vpop.trf.xlu1 }
 0x215   : > { %v1155_v17 = vpop.trf.xlu0 }
 0x217   : > { %v1140_v7 = vpop.trf.xlu1 }
 0x218   : > { %4764 = vmatmul.mubr.msk.bf16.gmra.mxu0 %vm1160_vm2, %v1138_v4 }
 0x219   : > { %1271 = vmatprep.mubr.bf16.mxu0 %v8841_v1  ;;  %v1156_v19 = vpop.trf.xlu0 }
 0x21b   : > { %v1141_v8 = vpop.trf.xlu1 }
 0x21d   : > { %v1157_v24 = vpop.trf.xlu0 }
 0x21f   : > { %v1142_v9 = vpop.trf.xlu1 }
 0x220   : > { %4765 = vmatmul.mubr.msk.bf16.gmra.mxu0 %vm1160_vm2, %v1139_v6  ;;  %v5535_v6 = vmov -inf  }
 0x221   : > { %1281 = vmatprep.mubr.bf16.mxu0 %v8841_v1  ;;  %v1158_v59 = vpop.trf.xlu0  ;;  %621 = vst [vmem:[#allocation3] sm:$0xff] %v5535_v6 }
 0x223   : > { %v1143_v10 = vpop.trf.xlu1 }
 0x225   : > { %v1159_v62 = vpop.trf.xlu0 }
 0x228   : > { %4766 = vmatmul.mubr.msk.bf16.gmra.mxu0 %vm1160_vm2, %v1140_v7  ;;  %v5536_v7 = vmov 0.0  }
 0x229   : > { %1291 = vmatprep.mubr.bf16.mxu0 %v8841_v1  ;;  %622 = vst [vmem:[#allocation4] sm:$0xff] %v5536_v7 }
 0x230   : > { %4767 = vmatmul.mubr.msk.bf16.gmra.mxu0 %vm1160_vm2, %v1141_v8 }
 0x231   : > { %1301 = vmatprep.mubr.bf16.mxu0 %v8841_v1 }
 0x238   : > { %4768 = vmatmul.mubr.msk.bf16.gmra.mxu0 %vm1160_vm2, %v1142_v9 }
 0x239   : > { %1311 = vmatprep.mubr.bf16.mxu0 %v8841_v1 }
 0x240   : > { %4769 = vmatmul.mubr.msk.bf16.gmra.mxu0 %vm1160_vm2, %v1143_v10 }
 0x241   : > { %1321 = vmatprep.mubr.bf16.mxu0 %v8841_v1 }
 0x248   : > { %4770 = vmatmul.mubr.msk.bf16.gmra.mxu0 %vm1160_vm2, %v1152_v12 }
 0x249   : > { %1331 = vmatprep.mubr.bf16.mxu0 %v8841_v1 }
 0x250   : > { %4771 = vmatmul.mubr.msk.bf16.gmra.mxu0 %vm1160_vm2, %v1153_v14 }
 0x251   : > { %1341 = vmatprep.mubr.bf16.mxu0 %v8841_v1 }
 0x258   : > { %4772 = vmatmul.mubr.msk.bf16.gmra.mxu0 %vm1160_vm2, %v1154_v16 }
 0x259   : > { %1351 = vmatprep.mubr.bf16.mxu0 %v8841_v1 }
 0x260   : > { %4773 = vmatmul.mubr.msk.bf16.gmra.mxu0 %vm1160_vm2, %v1155_v17 }
 0x261   : > { %1361 = vmatprep.mubr.bf16.mxu0 %v8841_v1 }
 0x268   : > { %4774 = vmatmul.mubr.msk.bf16.gmra.mxu0 %vm1160_vm2, %v1156_v19 }
 0x269   : > { %1371 = vmatprep.mubr.bf16.mxu0 %v8841_v1 }
 0x270   : > { %4775 = vmatmul.mubr.msk.bf16.gmra.mxu0 %vm1160_vm2, %v1157_v24 }
 0x271   : > { %1381 = vmatprep.mubr.bf16.mxu0 %v8841_v1 }
 0x278   : > { %4776 = vmatmul.mubr.msk.bf16.gmra.mxu0 %vm1160_vm2, %v1158_v59 }
 0x279   : > { %1391 = vmatprep.mubr.bf16.mxu0 %v8841_v1 }
 0x280   : > { %4777 = vmatmul.mubr.msk.bf16.gmra.mxu0 %vm1160_vm2, %v1159_v62 }
 0x2c8   : > { %v5863_v43 = vpop.f32.mrf.mxu0 }
 0x2c9   : > { %9114 = vst [vmem:[#allocation35_spill] sm:$0xff] %v5863_v43 }
 0x2ca   : > { %v5865_v50 = vpop.f32.mrf.mxu0 }
 0x2cc   : > { %v5867_v57 = vpop.f32.mrf.mxu0 }
 0x2cd   : > { %9115 = vst [vmem:[#allocation36_spill] sm:$0xff] %v5867_v57 }
 0x2ce   : > { %v5869_v0 = vpop.f32.mrf.mxu0 }
 0x2d0   : > { %v5871_v2 = vpop.f32.mrf.mxu0 }
 0x2d1   : > { %9116 = vst [vmem:[#allocation37_spill] sm:$0xff] %v5871_v2  ;;  %v1403_v32 = vmax.f32 %v5863_v43, %v5871_v2 }
 0x2d2   : > { %v5873_v3 = vpop.f32.mrf.mxu0 }
 0x2d3   : > { %9117 = vst [vmem:[#allocation38_spill] sm:$0xff] %v5873_v3  ;;  %v1440_v61 = vmax.f32 %v5865_v50, %v5873_v3 }
 0x2d4   : > { %v5875_v4 = vpop.f32.mrf.mxu0 }
 0x2d5   : > { %9118 = vst [vmem:[#allocation39_spill] sm:$0xff] %v5875_v4  ;;  %v1404_v29 = vmax.f32 %v5867_v57, %v5875_v4 }
 0x2d6   : > { %v5877_v8 = vpop.f32.mrf.mxu0 }
 0x2d7   : > { %9119 = vst [vmem:[#allocation40_spill] sm:$0xff] %v5877_v8  ;;  %v1441_v46 = vmax.f32 %v5869_v0, %v5877_v8 }
 0x2d8   : > { %v5879_v9 = vpop.f32.mrf.mxu0 }
 0x2d9   : > { %v1405_v53 = vmax.f32 %v1403_v32, %v5879_v9 }
 0x2da   : > { %v5881_v10 = vpop.f32.mrf.mxu0 }
 0x2db   : > { %v1442_v5 = vmax.f32 %v1440_v61, %v5881_v10 }
 0x2dc   : > { %v5883_v12 = vpop.f32.mrf.mxu0 }
 0x2dd   : > { %v1406_v28 = vmax.f32 %v1404_v29, %v5883_v12 }
 0x2de   : > { %v5885_v14 = vpop.f32.mrf.mxu0 }
 0x2df   : > { %v1443_v2 = vmax.f32 %v1441_v46, %v5885_v14 }
 0x2e0   : > { %v5887_v16 = vpop.f32.mrf.mxu0 }
 0x2e1   : > { %v1407_v4 = vmax.f32 %v1405_v53, %v5887_v16 }
 0x2e2   : > { %v5889_v17 = vpop.f32.mrf.mxu0 }
 0x2e3   : > { %v1444_v3 = vmax.f32 %v1442_v5, %v5889_v17 }
 0x2e4   : > { %v5891_v18 = vpop.f32.mrf.mxu0 }
 0x2e5   : > { %9120 = vst [vmem:[#allocation41_spill] sm:$0xff] %v5891_v18  ;;  %v1408_v57 = vmax.f32 %v1406_v28, %v5891_v18 }
 0x2e6   : > { %v5893_v19 = vpop.f32.mrf.mxu0 }
 0x2e7   : > { %v1445_v8 = vmax.f32 %v1443_v2, %v5893_v19 }
 0x2e8   : > { %v5895_v22 = vpop.f32.mrf.mxu0 }
 0x2e9   : > { %v1409_v32 = vmax.f32 %v1407_v4, %v5895_v22 }
 0x2ea   : > { %v5897_v24 = vpop.f32.mrf.mxu0 }
 0x2eb   : > { %v1446_v61 = vmax.f32 %v1444_v3, %v5897_v24 }
 0x2ec   : > { %v5899_v59 = vpop.f32.mrf.mxu0 }
 0x2ed   : > { %9121 = vst [vmem:[#allocation42_spill] sm:$0xff] %v5899_v59  ;;  %v1410_v27 = vmax.f32 %v1408_v57, %v5899_v59 }
 0x2ee   : > { %v5901_v62 = vpop.f32.mrf.mxu0 }
 0x2ef   : > { %v1447_v46 = vmax.f32 %v1445_v8, %v5901_v62 }
 0x2f0   : > { %v5903_v6 = vpop.f32.mrf.mxu0 }
 0x2f1   : > { %v1411_v53 = vmax.f32 %v1409_v32, %v5903_v6 }
 0x2f2   : > { %v5905_v7 = vpop.f32.mrf.mxu0 }
 0x2f3   : > { %v1448_v5 = vmax.f32 %v1446_v61, %v5905_v7 }
 0x2f4   : > { %v5907_v48 = vpop.f32.mrf.mxu0 }
 0x2f5   : > { %9122 = vst [vmem:[#allocation43_spill] sm:$0xff] %v5907_v48  ;;  %v1412_v28 = vmax.f32 %v1410_v27, %v5907_v48 }
 0x2f6   : > { %v5909_v55 = vpop.f32.mrf.mxu0 }
 0x2f7   : > { %v1449_v2 = vmax.f32 %v1447_v46, %v5909_v55 }
 0x2f8   : > { %v5911_v36 = vpop.f32.mrf.mxu0 }
 0x2f9   : > { %v1413_v4 = vmax.f32 %v1411_v53, %v5911_v36 }
 0x2fa   : > { %v5913_v41 = vpop.f32.mrf.mxu0 }
 0x2fb   : > { %v1450_v3 = vmax.f32 %v1448_v5, %v5913_v41 }
 0x2fc   : > { %v5915_v26 = vpop.f32.mrf.mxu0 }
 0x2fd   : > { %9123 = vst [vmem:[#allocation44_spill] sm:$0xff] %v5915_v26  ;;  %v1414_v57 = vmax.f32 %v1412_v28, %v5915_v26 }
 0x2fe   : > { %v5917_v31 = vpop.f32.mrf.mxu0 }
 0x2ff   : > { %v1451_v8 = vmax.f32 %v1449_v2, %v5917_v31 }
 0x300   : > { %v5919_v1 = vpop.f32.mrf.mxu0 }
 0x301   : > { %v1415_v32 = vmax.f32 %v1413_v4, %v5919_v1 }
 0x302   : > { %v5921_v44 = vpop.f32.mrf.mxu0 }
 0x303   : > { %v1452_v61 = vmax.f32 %v1450_v3, %v5921_v44 }
 0x304   : > { %v5923_v47 = vpop.f32.mrf.mxu0 }
 0x305   : > { %9124 = vst [vmem:[#allocation45_spill] sm:$0xff] %v5923_v47  ;;  %v1416_v27 = vmax.f32 %v1414_v57, %v5923_v47 }
 0x306   : > { %v5925_v51 = vpop.f32.mrf.mxu0 }
 0x307   : > { %v1453_v46 = vmax.f32 %v1451_v8, %v5925_v51 }
 0x308   : > { %v5927_v54 = vpop.f32.mrf.mxu0 }
 0x309   : > { %v1417_v53 = vmax.f32 %v1415_v32, %v5927_v54 }
 0x30a   : > { %v5929_v49 = vpop.f32.mrf.mxu0 }
 0x30b   : > { %v1454_v5 = vmax.f32 %v1452_v61, %v5929_v49 }
 0x30c   : > { %v5931_v45 = vpop.f32.mrf.mxu0 }
 0x30d   : > { %9125 = vst [vmem:[#allocation46_spill] sm:$0xff] %v5931_v45  ;;  %v1418_v28 = vmax.f32 %v1416_v27, %v5931_v45 }
 0x30e   : > { %v5933_v56 = vpop.f32.mrf.mxu0 }
 0x30f   : > { %v1455_v2 = vmax.f32 %v1453_v46, %v5933_v56 }
 0x310   : > { %v5935_v52 = vpop.f32.mrf.mxu0 }
 0x311   : > { %v1419_v4 = vmax.f32 %v1417_v53, %v5935_v52 }
 0x312   : > { %v5937_v33 = vpop.f32.mrf.mxu0 }
 0x313   : > { %v1456_v3 = vmax.f32 %v1454_v5, %v5937_v33 }
 0x314   : > { %v5939_v35 = vpop.f32.mrf.mxu0 }
 0x315   : > { %9126 = vst [vmem:[#allocation47_spill] sm:$0xff] %v5939_v35  ;;  %v1420_v57 = vmax.f32 %v1418_v28, %v5939_v35 }
 0x316   : > { %v5941_v38 = vpop.f32.mrf.mxu0 }
 0x317   : > { %v1457_v8 = vmax.f32 %v1455_v2, %v5941_v38 }
 0x318   : > { %v5943_v40 = vpop.f32.mrf.mxu0 }
 0x319   : > { %v1421_v32 = vmax.f32 %v1419_v4, %v5943_v40 }
 0x31a   : > { %v5945_v37 = vpop.f32.mrf.mxu0 }
 0x31b   : > { %v1458_v61 = vmax.f32 %v1456_v3, %v5945_v37 }
 0x31c   : > { %v5947_v34 = vpop.f32.mrf.mxu0 }
 0x31d   : > { %9127 = vst [vmem:[#allocation48_spill] sm:$0xff] %v5947_v34  ;;  %v1422_v27 = vmax.f32 %v1420_v57, %v5947_v34 }
 0x31e   : > { %v5949_v42 = vpop.f32.mrf.mxu0 }
 0x31f   : > { %v1459_v46 = vmax.f32 %v1457_v8, %v5949_v42 }
 0x320   : > { %v5951_v39 = vpop.f32.mrf.mxu0 }
 0x321   : > { %v1423_v53 = vmax.f32 %v1421_v32, %v5951_v39 }
 0x322   : > { %v5953_v21 = vpop.f32.mrf.mxu0 }
 0x323   : > { %v1460_v5 = vmax.f32 %v1458_v61, %v5953_v21 }
 0x324   : > { %v5955_v25 = vpop.f32.mrf.mxu0 }
 0x325   : > { %9128 = vst [vmem:[#allocation49_spill] sm:$0xff] %v5955_v25  ;;  %v1424_v28 = vmax.f32 %v1422_v27, %v5955_v25 }
 0x326   : > { %v5959_v30 = vpop.f32.mrf.mxu0 }
 0x327   : > { %v1461_v2 = vmax.f32 %v1459_v46, %v5959_v30 }
 0x328   : > { %v5963_v23 = vpop.f32.mrf.mxu0 }
 0x329   : > { %v1425_v4 = vmax.f32 %v1423_v53, %v5963_v23 }
 0x32a   : > { %v5969_v63 = vpop.f32.mrf.mxu0 }
 0x32b   : > { %v1462_v3 = vmax.f32 %v1460_v5, %v5969_v63 }
 0x32c   : > { %v5977_v60 = vpop.f32.mrf.mxu0 }
 0x32d   : > { %9129 = vst [vmem:[#allocation50_spill] sm:$0xff] %v5977_v60  ;;  %v1426_v57 = vmax.f32 %v1424_v28, %v5977_v60 }
 0x32e   : > { %v5983_v43 = vpop.f32.mrf.mxu0 }
 0x32f   : > { %v1463_v8 = vmax.f32 %v1461_v2, %v5983_v43 }
 0x330   : > { %v5989_v29 = vpop.f32.mrf.mxu0 }
 0x331   : > { %v1427_v32 = vmax.f32 %v1425_v4, %v5989_v29 }
 0x332   : > { %v5995_v18 = vpop.f32.mrf.mxu0 }
 0x333   : > { %9130 = vst [vmem:[#allocation51_spill] sm:$0xff] %v5995_v18  ;;  %v1464_v61 = vmax.f32 %v1462_v3, %v5995_v18 }
 0x334   : > { %v6001_v59 = vpop.f32.mrf.mxu0 }
 0x335   : > { %9131 = vst [vmem:[#allocation52_spill] sm:$0xff] %v6001_v59  ;;  %v1428_v27 = vmax.f32 %v1426_v57, %v6001_v59 }
 0x336   : > { %v6007_v48 = vpop.f32.mrf.mxu0 }
 0x337   : > { %v1465_v46 = vmax.f32 %v1463_v8, %v6007_v48 }
 0x338   : > { %v6013_v26 = vpop.f32.mrf.mxu0 }
 0x339   : > { %9132 = vst [vmem:[#allocation53_spill] sm:$0xff] %v6013_v26  ;;  %v1429_v53 = vmax.f32 %v1427_v32, %v6013_v26 }
 0x33a   : > { %v6019_v47 = vpop.f32.mrf.mxu0 }
 0x33b   : > { %v1466_v5 = vmax.f32 %v1464_v61, %v6019_v47 }
 0x33c   : > { %v6025_v45 = vpop.f32.mrf.mxu0 }
 0x33d   : > { %9133 = vst [vmem:[#allocation54_spill] sm:$0xff] %v6025_v45  ;;  %v1430_v28 = vmax.f32 %v1428_v27, %v6025_v45  ;;  %v4914_v27 = vld [vmem:[%s8836_s3 + $0x50] sm:$0xff]  }
 0x33e   : > { %v6031_v35 = vpop.f32.mrf.mxu0  ;;  %4756 = vmatmul.mubr.msk.bf16.gmra.mxu1 %vm444_vm1, %v4914_v27 }
 0x33f   : > { %v1467_v2 = vmax.f32 %v1465_v46, %v6031_v35  ;;  %v1057_v46 = vpack.c.bf16 %v5807_v13, %v5805_v11 }
 0x340   : > { %v6037_v34 = vpop.f32.mrf.mxu0 }
 0x341   : > { %v1431_v4 = vmax.f32 %v1429_v53, %v6037_v34  ;;  %2747 = vxpose.xlu1.c.b16.start [1/2] (short) %v1057_v46, 128  ;;  %v965_v46 = vpop.f32.mrf.mxu1 }
 0x342   : > { %v6043_v25 = vpop.f32.mrf.mxu0 }
 0x343   : > { %v1468_v3 = vmax.f32 %v1466_v5, %v6043_v25 }
 0x344   : > { %v6049_v60 = vpop.f32.mrf.mxu0 }
 0x345   : > { %9134 = vst [vmem:[#allocation55_spill] sm:$0xff] %v6049_v60  ;;  %v1432_v57 = vmax.f32 %v1430_v28, %v6049_v60  ;;  %v5537_v60 = vmov 1966171168  }
 0x346   : > { %v6055_v59 = vpop.f32.mrf.mxu0  ;;  %v1481_v5 = vunpack.c.l.s4 %v5537_v60 }
 0x347   : > { %9135 = vst [vmem:[#allocation56_spill] sm:$0xff] %v6055_v59  ;;  %v1433_v18 = vmax.f32 %v1431_v4, %v1432_v57  ;;  %v1469_v8 = vmax.f32 %v1467_v2, %v6055_v59  ;;  %v1483_v4 = vlaneseq  ;;  %v9136_v57 = vmov 0  }
 0x348   : > { %997 = vmatprep.mubr.bf16.mxu1 %v9136_v57  ;;  %v1059_v2 = vpack.c.bf16 %v5811_v20, %v5809_v15  ;;  %v1482_v59 = vunpack.c.0.s8 %v1481_v5  ;;  %v6082_v5 = vpop.f32.mrf.mxu1 }
 0x349   : > { %v1434_v32 = vrot.slane %v1433_v18, 4  ;;  %v1470_v26 = vmax.f32 %v1468_v3, %v1469_v8  ;;  %v1484_v27 = vshrl.u32 %v1483_v4, 7  ;;  %9139 = vst [vmem:[#allocation59_spill] sm:$0xff] %v6082_v5  ;;  %vm6084_vm3 = vcmp.lt.s32.totalorder %v1483_v4, 256 }
 0x34a   : > { %2748 = vxpose.xlu1.c.b16.end [2/2] (short) %v1059_v2, 128  ;;  %v9140_v2 = vmov 0 }
 0x34b   : > { %v1435_v61 = vmax.f32 %v1433_v18, %v1434_v32  ;;  %v1471_v45 = vrot.slane %v1470_v26, 4  ;;  %v6072_v60 = vsub.s32 %v1482_v59, %v1484_v27  ;;  %v9141_v2 = vsel %vm6084_vm3, 4294967295, %v9140_v2 }
 0x34c   : > { %9142 = vst [vmem:[#allocation60_spill] sm:$0xff] %v9141_v2 }
 0x34d   : > { %v1436_v53 = vrot.slane %v1435_v61, 2  ;;  %v1472_v28 = vmax.f32 %v1470_v26, %v1471_v45  ;;  %v4915_v26 = vld [vmem:[%s8836_s3 + $0x58] sm:$0xff]   ;;  %9137 = vst [vmem:[#allocation57_spill] sm:$0xff] %v6072_v60 }
 0x34e   : > { %4757 = vmatmul.mubr.msk.bf16.gmra.mxu1 %vm444_vm1, %v4915_v26  ;;  %v6108_v26 = vsub.s32 0, %v1484_v27 }
 0x34f   : > { %v1437_v3 = vmax.f32 %v1435_v61, %v1436_v53  ;;  %v1473_v8 = vrot.slane %v1472_v28, 2  ;;  %1007 = vmatprep.mubr.bf16.mxu1 %v9136_v57  ;;  %v4916_v61 = vld [vmem:[%s8836_s3 + $0x60] sm:$0xff]  }
 0x350   : > { %v6079_v53 = vld [vmem:[#allocation3] ss:$4 sm:$0x3]  ;;  %9145 = vst [vmem:[#allocation63_spill] sm:$0xff] %v6108_v26 }
 0x351   : > { %v1438_v18 = vrot.slane %v1437_v3, 1  ;;  %v1474_v32 = vmax.f32 %v1472_v28, %v1473_v8  ;;  %9138 = vst [vmem:[#allocation58_spill] sm:$0xff] %v6079_v53 }
 0x353   : > { %v1475_v45 = vrot.slane %v1474_v32, 1  ;;  %v1439_v11 = vmax.f32 %v1437_v3, %v1438_v18  ;;  %v6093_v3 = vpop.f32.mrf.mxu1  ;;  %v4917_v18 = vld [vmem:[%s8836_s3 + $0x68] sm:$0xff]  }
 0x355   : > { %v1476_v13 = vmax.f32 %v1474_v32, %v1475_v45  ;;  %v6100_v4 = vpop.f32.mrf.mxu1  ;;  %v6110_v45 = vsub.s32 1, %v1484_v27  ;;  %v9148_v27 = vld [vmem:[#allocation34_spill] sm:$0xff]  ;;  %v9150_v32 = vld [vmem:[#allocation36_spill] sm:$0xff] }
 0x356   : > { %4758 = vmatmul.mubr.msk.bf16.gmra.mxu1 %vm444_vm1, %v4916_v61  ;;  %9144 = vst [vmem:[#allocation62_spill] sm:$0xff] %v6100_v4 }
 0x357   : > { %v1479_v15 = vcombine.low %v1439_v11, %v1476_v13  ;;  %1017 = vmatprep.mubr.bf16.mxu1 %v9136_v57  ;;  %9146 = vst [vmem:[#allocation64_spill] sm:$0xff] %v6110_v45  ;;  %v9147_v11 = vld [vmem:[#allocation33_spill] sm:$0xff] }
 0x358   : > { %v1061_v13 = vpack.c.bf16 %v9147_v11, %v5813_v58 }
 0x359   : > { %v1486_v20 = vrot.slane %v1479_v15, %v6072_v60  ;;  %v4918_v15 = vld [vmem:[%s8836_s3 + $0x70] sm:$0xff]  }
 0x35b   : > { %v1493_v28 = vrot.slane %v1486_v20, %v6072_v60 }
 0x35d   : > { %v6090_v59 = vmax.f32 %v6079_v53, %v1493_v28  ;;  %v1063_v28 = vpack.c.bf16 %v965_v46, %v9148_v27  ;;  %v9152_v46 = vld [vmem:[#allocation38_spill] sm:$0xff] }
 0x35e   : > { %4759 = vmatmul.mubr.msk.bf16.gmra.mxu1 %vm444_vm1, %v4917_v18  ;;  %v9149_v18 = vld [vmem:[#allocation35_spill] sm:$0xff]  ;;  %v4919_v27 = vld [vmem:[%s8836_s3 + $0x78] sm:$0xff]  }
 0x35f   : > { %9143 = vst [vmem:[#allocation61_spill] sm:$0xff] %v6090_v59  ;;  %1930 = vst.msk [vmem:[#allocation3] ss:$4 sm:$0x3] %vm6084_vm3, %v6090_v59  ;;  %1027 = vmatprep.mubr.bf16.mxu1 %v9136_v57  ;;  %v6120_v20 = vrot.slane %v6090_v59, %v6108_v26  ;;  %v6124_v61 = vrot.slane %v6090_v59, %v6110_v45 }
 0x361   : > { %v1510_v58 = vsub.f32 %v9149_v18, %v6120_v20  ;;  %v1511_v11 = vsub.f32 %v5865_v50, %v6124_v61  ;;  %v1512_v8 = vsub.f32 %v9150_v32, %v6120_v20  ;;  %v1513_v45 = vsub.f32 %v5869_v0, %v6124_v61  ;;  %v9153_v50 = vld [vmem:[#allocation39_spill] sm:$0xff]  ;;  %v9154_v32 = vld [vmem:[#allocation40_spill] sm:$0xff] }
 0x362   : > { %v1516_v18 = vsub.f32 %v9153_v50, %v6120_v20  ;;  %v1517_v4 = vsub.f32 %v9154_v32, %v6124_v61  ;;  %v1529_v50 = vsub.f32 %v5901_v62, %v6124_v61  ;;  %v9157_v32 = vld [vmem:[#allocation43_spill] sm:$0xff] }
 0x363   : > { %3547 = vxpose.xlu1.c.b16.start [1/2] (short) %v1061_v13, 128  ;;  %v9151_v13 = vld [vmem:[#allocation37_spill] sm:$0xff]  ;;  %v1576_v5 = vmul.f32 1.442695, %v1511_v11  ;;  %v1578_v0 = vmul.f32 1.442695, %v1512_v8  ;;  %v1521_v8 = vsub.f32 %v5885_v14, %v6124_v61  ;;  %v1525_v14 = vsub.f32 %v5893_v19, %v6124_v61 }
 0x364   : > { %v1514_v26 = vsub.f32 %v9151_v13, %v6120_v20  ;;  %v1580_v2 = vmul.f32 1.442695, %v1513_v45  ;;  %v1586_v11 = vmul.f32 1.442695, %v1516_v18  ;;  %v1588_v45 = vmul.f32 1.442695, %v1517_v4 }
 0x365   : > { %v1527_v4 = vsub.f32 %v5897_v24, %v6124_v61  ;;  %v1530_v18 = vsub.f32 %v5903_v6, %v6120_v20  ;;  %v1604_v62 = vmul.f32 1.442695, %v1525_v14  ;;  %v1535_v6 = vsub.f32 %v5913_v41, %v6124_v61 }
 0x366   : > { %4760 = vmatmul.mubr.msk.bf16.gmra.mxu1 %vm444_vm1, %v4918_v15  ;;  %v1515_v15 = vsub.f32 %v9152_v46, %v6124_v61  ;;  %v1582_v13 = vmul.f32 1.442695, %v1514_v26  ;;  %v1519_v46 = vsub.f32 %v5881_v10, %v6124_v61  ;;  %v1523_v10 = vsub.f32 %v5889_v17, %v6124_v61  ;;  %v9155_v26 = vld [vmem:[#allocation41_spill] sm:$0xff]  ;;  %v9156_v17 = vld [vmem:[#allocation42_spill] sm:$0xff] }
 0x367   : > { %1037 = vmatprep.mubr.bf16.mxu1 %v9136_v57  ;;  %3548 = vxpose.xlu1.c.b16.end [2/2] (short) %v1063_v28, 128  ;;  %v1574_v57 = vmul.f32 1.442695, %v1510_v58  ;;  %v1518_v28 = vsub.f32 %v5879_v9, %v6120_v20  ;;  %v1520_v58 = vsub.f32 %v5883_v12, %v6120_v20  ;;  %v1522_v9 = vsub.f32 %v5887_v16, %v6120_v20 }
 0x368   : > { %v1584_v60 = vmul.f32 1.442695, %v1515_v15  ;;  %v1524_v12 = vsub.f32 %v9155_v26, %v6120_v20  ;;  %v1596_v16 = vmul.f32 1.442695, %v1521_v8  ;;  %v1600_v19 = vmul.f32 1.442695, %v1523_v10 }
 0x369   : > { %4928 = vpow2.f32 %v1574_v57  ;;  %v1590_v57 = vmul.f32 1.442695, %v1518_v28  ;;  %v1594_v15 = vmul.f32 1.442695, %v1520_v58  ;;  %v1533_v28 = vsub.f32 %v5909_v55, %v6124_v61 }
 0x36a   : > { %4930 = vpow2.f32 %v1576_v5  ;;  %v1592_v5 = vmul.f32 1.442695, %v1519_v46  ;;  %v1602_v24 = vmul.f32 1.442695, %v1524_v12  ;;  %v9158_v46 = vld [vmem:[#allocation44_spill] sm:$0xff]  ;;  %v1537_v8 = vsub.f32 %v5917_v31, %v6124_v61 }
 0x36b   : > { %4932 = vpow2.f32 %v1578_v0  ;;  %v1532_v0 = vsub.f32 %v9157_v32, %v6120_v20  ;;  %v1536_v58 = vsub.f32 %v9158_v46, %v6120_v20  ;;  %v1538_v55 = vsub.f32 %v5919_v1, %v6120_v20 }
 0x36c   : > { %4934 = vpow2.f32 %v1580_v2  ;;  %v1526_v2 = vsub.f32 %v5895_v22, %v6120_v20  ;;  %v1531_v22 = vsub.f32 %v5905_v7, %v6124_v61  ;;  %v1539_v41 = vsub.f32 %v5921_v44, %v6124_v61 }
 0x36d   : > { %4936 = vpow2.f32 %v1582_v13  ;;  %v1534_v13 = vsub.f32 %v5911_v36, %v6120_v20  ;;  %v1608_v36 = vmul.f32 1.442695, %v1527_v4  ;;  %v1541_v31 = vsub.f32 %v5925_v51, %v6124_v61 }
 0x36e   : > { %4761 = vmatmul.mubr.msk.bf16.gmra.mxu1 %vm444_vm1, %v4919_v27  ;;  %4938 = vpow2.f32 %v1584_v60  ;;  %v1528_v60 = vsub.f32 %v9156_v17, %v6120_v20  ;;  %v1598_v27 = vmul.f32 1.442695, %v1522_v9  ;;  %v1606_v7 = vmul.f32 1.442695, %v1526_v2  ;;  %v9160_v9 = vld [vmem:[#allocation45_spill] sm:$0xff] }
 0x36f   : > { %4940 = vpow2.f32 %v1586_v11  ;;  %v1542_v1 = vsub.f32 %v5927_v54, %v6120_v20  ;;  %v1612_v26 = vmul.f32 1.442695, %v1529_v50  ;;  %v1543_v44 = vsub.f32 %v5929_v49, %v6124_v61 }
 0x370   : > { %4942 = vpow2.f32 %v1588_v45  ;;  %v1610_v10 = vmul.f32 1.442695, %v1528_v60  ;;  %v1614_v2 = vmul.f32 1.442695, %v1530_v18  ;;  %v1616_v60 = vmul.f32 1.442695, %v1531_v22 }
 0x371   : > { %4944 = vpow2.f32 %v1590_v57  ;;  %v1540_v57 = vsub.f32 %v9160_v9, %v6120_v20  ;;  %v1618_v18 = vmul.f32 1.442695, %v1532_v0  ;;  %v1620_v46 = vmul.f32 1.442695, %v1533_v28 }
 0x372   : > { %4946 = vpow2.f32 %v1592_v5  ;;  %v1622_v9 = vmul.f32 1.442695, %v1534_v13 }
 0x373   : > { %4948 = vpow2.f32 %v1594_v15  ;;  %v9161_v15 = vld [vmem:[#allocation46_spill] sm:$0xff] }
 0x374   : > { %4950 = vpow2.f32 %v1596_v16  ;;  %v1544_v14 = vsub.f32 %v9161_v15, %v6120_v20 }
 0x375   : > { %4952 = vpow2.f32 %v1598_v27 }
 0x376   : > { %v6187_v11 = vpop.eup %4928  ;;  %4954 = vpow2.f32 %v1600_v19  ;;  %v9162_v19 = vld [vmem:[#allocation47_spill] sm:$0xff] }
 0x377   : > { %9159 = vst [vmem:[#allocation33_spill] sm:$0xff] %v6187_v11  ;;  %v6193_v45 = vpop.eup %4930  ;;  %4956 = vpow2.f32 %v1602_v24 }
 0x378   : > { %v6199_v5 = vpop.eup %4932  ;;  %4958 = vpow2.f32 %v1604_v62  ;;  %v1624_v62 = vmul.f32 1.442695, %v1535_v6  ;;  %v1628_v6 = vmul.f32 1.442695, %v1537_v8 }
 0x379   : > { %v6205_v12 = vpop.eup %4934  ;;  %4960 = vpow2.f32 %v1606_v7  ;;  %v1704_v22 = vadd.f32 %v6199_v5, %v6187_v11  ;;  %v975_v7 = vpop.f32.mrf.mxu1 }
 0x37a   : > { %v6211_v16 = vpop.eup %4936  ;;  %4962 = vpow2.f32 %v1608_v36  ;;  %v1741_v32 = vadd.f32 %v6205_v12, %v6193_v45  ;;  %v1065_v17 = vpack.c.bf16 %v975_v7, %v6093_v3 }
 0x37b   : > { %v6217_v27 = vpop.eup %4938  ;;  %4964 = vpow2.f32 %v1610_v10  ;;  %v1705_v28 = vadd.f32 %v6211_v16, %v1704_v22 }
 0x37c   : > { %v6223_v24 = vpop.eup %4940  ;;  %4966 = vpow2.f32 %v1612_v26  ;;  %v1742_v13 = vadd.f32 %v6217_v27, %v1741_v32  ;;  %v1551_v26 = vsub.f32 %v5945_v37, %v6124_v61  ;;  %1893 = vmatprep.mubr.bf16.mxu1 %v1065_v17  ;;  %v9175_v37 = vsub.f32 %v5949_v42, %v6124_v61 }
 0x37d   : > { %v6229_v36 = vpop.eup %4942  ;;  %4968 = vpow2.f32 %v1614_v2  ;;  %v1626_v2 = vmul.f32 1.442695, %v1536_v58  ;;  %v1630_v58 = vmul.f32 1.442695, %v1538_v55  ;;  %v9178_v42 = vsub.f32 %v5953_v21, %v6124_v61 }
 0x37e   : > { %v6235_v10 = vpop.eup %4944  ;;  %4970 = vpow2.f32 %v1616_v60  ;;  %v1706_v60 = vadd.f32 %v6223_v24, %v1705_v28  ;;  %v1743_v32 = vadd.f32 %v6229_v36, %v1742_v13  ;;  %v9180_v21 = vsub.f32 %v5959_v30, %v6124_v61 }
 0x37f   : > { %v6240_v50 = vpop.eup %4946  ;;  %4972 = vpow2.f32 %v1618_v18  ;;  %v9163_v18 = vld [vmem:[#allocation48_spill] sm:$0xff] }
 0x380   : > { %v6244_v4 = vpop.eup %4948  ;;  %4974 = vpow2.f32 %v1620_v46  ;;  %v1552_v7 = vsub.f32 %v9163_v18, %v6120_v20  ;;  %v1632_v46 = vmul.f32 1.442695, %v1539_v41  ;;  %v1707_v8 = vadd.f32 %v6235_v10, %v1706_v60 }
 0x381   : > { %v6249_v22 = vpop.eup %4950  ;;  %4976 = vpow2.f32 %v1622_v9  ;;  %v1634_v9 = vmul.f32 1.442695, %v1540_v57  ;;  %v1744_v55 = vadd.f32 %v6240_v50, %v1743_v32  ;;  %v1636_v41 = vmul.f32 1.442695, %v1541_v31 }
 0x382   : > { %v6254_v3 = vpop.eup %4952  ;;  %4978 = vpow2.f32 %v1624_v62  ;;  %v1708_v62 = vadd.f32 %v6244_v4, %v1707_v8  ;;  %v1638_v57 = vmul.f32 1.442695, %v1542_v1  ;;  %v1640_v31 = vmul.f32 1.442695, %v1543_v44 }
 0x383   : > { %v6259_v28 = vpop.eup %4954  ;;  %4980 = vpow2.f32 %v1626_v2  ;;  %v1745_v32 = vadd.f32 %v6249_v22, %v1744_v55  ;;  %v1642_v1 = vmul.f32 1.442695, %v1544_v14  ;;  %v9165_v44 = vsub.f32 %v5933_v56, %v6124_v61 }
 0x384   : > { %v6264_v13 = vpop.eup %4956  ;;  %4982 = vpow2.f32 %v1628_v6  ;;  %v9164_v6 = vld [vmem:[#allocation49_spill] sm:$0xff]  ;;  %v1709_v8 = vadd.f32 %v6254_v3, %v1708_v62  ;;  %v9166_v14 = vsub.f32 %v5935_v52, %v6120_v20 }
 0x385   : > { %v6272_v60 = vpop.eup %4958  ;;  %4984 = vpow2.f32 %v1630_v58  ;;  %v1746_v58 = vadd.f32 %v6259_v28, %v1745_v32 }
 0x386   : > { %v6280_v17 = vpop.eup %4960  ;;  %4986 = vpow2.f32 %v1632_v46  ;;  %v1644_v46 = vmul.f32 1.442695, %v9165_v44  ;;  %v1710_v62 = vadd.f32 %v6264_v13, %v1709_v8  ;;  %v9168_v8 = vsub.f32 %v5937_v33, %v6124_v61 }
 0x387   : > { %v6288_v2 = vpop.eup %4962  ;;  %4988 = vpow2.f32 %v1634_v9  ;;  %v1646_v9 = vmul.f32 1.442695, %v9166_v14  ;;  %v1747_v32 = vadd.f32 %v6272_v60, %v1746_v58 }
 0x388   : > { %v6296_v55 = vpop.eup %4964  ;;  %4990 = vpow2.f32 %v1636_v41  ;;  %v9167_v41 = vld [vmem:[#allocation50_spill] sm:$0xff]  ;;  %v1648_v44 = vmul.f32 1.442695, %v9168_v8  ;;  %v1711_v51 = vadd.f32 %v6280_v17, %v1710_v62 }
 0x389   : > { %v6304_v54 = vpop.eup %4966  ;;  %4992 = vpow2.f32 %v1638_v57  ;;  %v9169_v57 = vsub.f32 %v9162_v19, %v6120_v20  ;;  %v1748_v14 = vadd.f32 %v6288_v2, %v1747_v32  ;;  %v9172_v32 = vsub.f32 %v5943_v40, %v6120_v20 }
 0x38a   : > { %v6312_v49 = vpop.eup %4968  ;;  %4994 = vpow2.f32 %v1640_v31  ;;  %v9170_v31 = vsub.f32 %v5941_v38, %v6124_v61  ;;  %v1712_v8 = vadd.f32 %v6296_v55, %v1711_v51  ;;  %v1656_v51 = vmul.f32 1.442695, %v1551_v26 }
 0x38b   : > { %v6320_v15 = vpop.eup %4970  ;;  %4996 = vpow2.f32 %v1642_v1  ;;  %v1650_v58 = vmul.f32 1.442695, %v9169_v57  ;;  %v9171_v1 = vld [vmem:[#allocation51_spill] sm:$0xff]  ;;  %v1654_v57 = vmul.f32 1.442695, %v9172_v32  ;;  %v1749_v0 = vadd.f32 %v6304_v54, %v1748_v14 }
 0x38c   : > { %v6328_v56 = vpop.eup %4972  ;;  %4998 = vpow2.f32 %v1644_v46  ;;  %v1652_v62 = vmul.f32 1.442695, %v9170_v31  ;;  %v9173_v46 = vld [vmem:[#allocation52_spill] sm:$0xff]  ;;  %v1713_v31 = vadd.f32 %v6312_v49, %v1712_v8  ;;  %v1658_v40 = vmul.f32 1.442695, %v1552_v7 }
 0x38d   : > { %v6336_v52 = vpop.eup %4974  ;;  %5000 = vpow2.f32 %v1646_v9  ;;  %v1750_v14 = vadd.f32 %v6320_v15, %v1749_v0  ;;  %v1660_v26 = vmul.f32 1.442695, %v9175_v37  ;;  %v9176_v0 = vsub.f32 %v5951_v39, %v6120_v20 }
 0x38e   : > { %v6344_v33 = vpop.eup %4976  ;;  %5002 = vpow2.f32 %v1648_v44  ;;  %v9174_v44 = vld [vmem:[#allocation53_spill] sm:$0xff]  ;;  %v1714_v8 = vadd.f32 %v6328_v56, %v1713_v31  ;;  %v1664_v31 = vmul.f32 1.442695, %v9178_v42  ;;  %v9179_v39 = vsub.f32 %v9164_v6, %v6120_v20 }
 0x38f   : > { %v4979_v19 = vpop.eup %4978  ;;  %5004 = vpow2.f32 %v1650_v58  ;;  %v1662_v18 = vmul.f32 1.442695, %v9176_v0  ;;  %v1751_v7 = vadd.f32 %v6336_v52, %v1750_v14  ;;  %v1668_v42 = vmul.f32 1.442695, %v9180_v21 }
 0x390   : > { %v6358_v32 = vpop.eup %4980  ;;  %5006 = vpow2.f32 %v1652_v62  ;;  %v9177_v62 = vld [vmem:[#allocation54_spill] sm:$0xff]  ;;  %v1715_v37 = vadd.f32 %v6344_v33, %v1714_v8  ;;  %v1666_v14 = vmul.f32 1.442695, %v9179_v39 }
 0x391   : > { %v4983_v9 = vpop.eup %4982  ;;  %5008 = vpow2.f32 %v1654_v57  ;;  %v1752_v0 = vadd.f32 %v4979_v19, %v1751_v7 }
 0x392   : > { %v4985_v59 = vpop.eup %4984  ;;  %5010 = vpow2.f32 %v1656_v51  ;;  %v1716_v8 = vadd.f32 %v6358_v32, %v1715_v37 }
 0x393   : > { %v4987_v53 = vpop.eup %4986  ;;  %5012 = vpow2.f32 %v1658_v40  ;;  %v9181_v40 = vsub.f32 %v5963_v23, %v6120_v20  ;;  %v1753_v6 = vadd.f32 %v4983_v9, %v1752_v0  ;;  %v9183_v23 = vsub.f32 %v9167_v41, %v6120_v20 }
 0x394   : > { %v4989_v58 = vpop.eup %4988  ;;  %5014 = vpow2.f32 %v1660_v26  ;;  %v9182_v26 = vsub.f32 %v5969_v63, %v6124_v61  ;;  %v1717_v11 = vadd.f32 %v4985_v59, %v1716_v8  ;;  %v9184_v63 = vsub.f32 %v5983_v43, %v6124_v61 }
 0x395   : > { %v4991_v38 = vpop.eup %4990  ;;  %5016 = vpow2.f32 %v1662_v18  ;;  %v1670_v57 = vmul.f32 1.442695, %v9181_v40  ;;  %v1843_v39 = vpack.c.bf16 %v4989_v58, %v4985_v59  ;;  %v1571_v18 = vsub.f32 %v6043_v25, %v6124_v61 }
 0x396   : > { %v6392_v7 = vpop.eup %4992  ;;  %5018 = vpow2.f32 %v1664_v31  ;;  %v1672_v51 = vmul.f32 1.442695, %v9182_v26  ;;  %v1844_v30 = vpack.c.bf16 %v4991_v38, %v4987_v53  ;;  %v1674_v37 = vmul.f32 1.442695, %v9183_v23 }
 0x397   : > { %v6397_v21 = vpop.eup %4994  ;;  %5020 = vpow2.f32 %v1666_v14  ;;  %v1754_v0 = vadd.f32 %v4987_v53, %v1753_v6  ;;  %v1676_v31 = vmul.f32 1.442695, %v9184_v63  ;;  %v1718_v59 = vadd.f32 %v4989_v58, %v1717_v11 }
 0x398   : > { %v6404_v40 = vpop.eup %4996  ;;  %5022 = vpow2.f32 %v1668_v42  ;;  %1861 = vmatprep.subr.bf16.mxu1 %v1844_v30  ;;  %v1842_v8 = vpack.c.bf16 %v4983_v9, %v4979_v19  ;;  %v9185_v25 = vsub.f32 %v5989_v29, %v6120_v20  ;;  %v9186_v43 = vsub.f32 %v9171_v1, %v6124_v61 }
 0x399   : > { %v6409_v26 = vpop.eup %4998  ;;  %5024 = vpow2.f32 %v1670_v57  ;;  %v1755_v41 = vadd.f32 %v4991_v38, %v1754_v0  ;;  %1862 = vmatpush1.bf16.msra.mxu1 %v1843_v39  ;;  %v1845_v53 = vpack.c.bf16 %v6404_v40, %v6392_v7  ;;  %v1719_v19 = vadd.f32 %v6392_v7, %v1718_v59 }
 0x39a   : > { %v1678_v14 = vmul.f32 1.442695, %v9185_v25  ;;  %v6416_v42 = vpop.eup %5000  ;;  %5026 = vpow2.f32 %v1672_v51  ;;  %v1680_v11 = vmul.f32 1.442695, %v9186_v43  ;;  %1863 = vmatprep.subr.bf16.mxu1 %v1842_v8  ;;  %v1846_v9 = vpack.c.bf16 %v6409_v26, %v6397_v21 }
 0x39b   : > { %v6424_v29 = vpop.eup %5002  ;;  %5028 = vpow2.f32 %v1674_v37  ;;  %v9187_v38 = vsub.f32 %v9173_v46, %v6120_v20  ;;  %v1756_v57 = vadd.f32 %v6397_v21, %v1755_v41  ;;  %v1841_v51 = vpack.c.bf16 %v6358_v32, %v6344_v33  ;;  %v9189_v46 = vld [vmem:[#allocation55_spill] sm:$0xff] }
 0x39c   : > { %v6432_v1 = vpop.eup %5004  ;;  %5030 = vpow2.f32 %v1676_v31  ;;  %v9188_v6 = vsub.f32 %v6007_v48, %v6124_v61  ;;  %v1720_v30 = vadd.f32 %v6404_v40, %v1719_v19  ;;  %v1840_v23 = vpack.c.bf16 %v6336_v52, %v6320_v15  ;;  %v9191_v31 = vld [vmem:[#allocation56_spill] sm:$0xff]  ;;  %v9211_v21 = vld [vmem:[#allocation15_spill] sm:$0xff] }
 0x39d   : > { %v1682_v58 = vmul.f32 1.442695, %v9187_v38  ;;  %v6440_v37 = vpop.eup %5006  ;;  %v1572_v0 = vsub.f32 %v9189_v46, %v6120_v20  ;;  %5032 = vpow2.f32 %v1678_v14  ;;  %v9190_v33 = vsub.f32 %v9174_v44, %v6120_v20  ;;  %1864 = vmatpush1.bf16.msra.mxu1 %v1841_v51 }
 0x39e   : > { %v1684_v39 = vmul.f32 1.442695, %v9188_v6  ;;  %v1757_v63 = vadd.f32 %v6409_v26, %v1756_v57  ;;  %v6448_v48 = vpop.eup %5008  ;;  %v1573_v59 = vsub.f32 %v9191_v31, %v6124_v61  ;;  %5034 = vpow2.f32 %v1680_v11  ;;  %1865 = vmatprep.subr.bf16.mxu1 %v1840_v23  ;;  %v9212_v26 = vld [vmem:[#allocation13_spill] sm:$0xff] }
 0x39f   : > { %v1686_v32 = vmul.f32 1.442695, %v9190_v33  ;;  %v9192_v15 = vsub.f32 %v6019_v47, %v6124_v61  ;;  %v1721_v8 = vadd.f32 %v6416_v42, %v1720_v30  ;;  %v6456_v25 = vpop.eup %5010  ;;  %5036 = vpow2.f32 %v1682_v58 }
 0x3a0   : > { %v9193_v44 = vsub.f32 %v9177_v62, %v6120_v20  ;;  %v1758_v41 = vadd.f32 %v6424_v29, %v1757_v63  ;;  %v1839_v43 = vpack.c.bf16 %v6328_v56, %v6312_v49  ;;  %v6464_v11 = vpop.eup %5012  ;;  %5038 = vpow2.f32 %v1684_v39 }
 0x3a1   : > { %v1688_v52 = vmul.f32 1.442695, %v9192_v15  ;;  %v9194_v47 = vsub.f32 %v6031_v35, %v6124_v61  ;;  %v1722_v38 = vadd.f32 %v6432_v1, %v1721_v8  ;;  %v1838_v58 = vpack.c.bf16 %v6304_v54, %v6288_v2  ;;  %v6472_v57 = vpop.eup %5014 }
 0x3a2   : > { %v1690_v14 = vmul.f32 1.442695, %v9193_v44  ;;  %5040 = vpow2.f32 %v1686_v32  ;;  %v9195_v62 = vsub.f32 %v6037_v34, %v6120_v20  ;;  %v1759_v49 = vadd.f32 %v6440_v37, %v1758_v41  ;;  %1866 = vmatpush1.bf16.msra.mxu1 %v1839_v43  ;;  %v6478_v56 = vpop.eup %5016 }
 0x3a3   : > { %v1692_v19 = vmul.f32 1.442695, %v9194_v47  ;;  %5042 = vpow2.f32 %v1688_v52  ;;  %v1696_v35 = vmul.f32 1.442695, %v1571_v18  ;;  %v1723_v61 = vadd.f32 %v6448_v48, %v1722_v38  ;;  %1867 = vmatprep.subr.bf16.mxu1 %v1838_v58  ;;  %v6481_v6 = vpop.eup %5018 }
 0x3a4   : > { %v1694_v51 = vmul.f32 1.442695, %v9195_v62  ;;  %5044 = vpow2.f32 %v1690_v14  ;;  %v1698_v2 = vmul.f32 1.442695, %v1572_v0  ;;  %v1760_v54 = vadd.f32 %v6456_v25, %v1759_v49  ;;  %v6486_v20 = vpop.eup %5020 }
 0x3a5   : > { %v1837_v34 = vpack.c.bf16 %v6296_v55, %v6280_v17  ;;  %5046 = vpow2.f32 %v1692_v19  ;;  %v1700_v39 = vmul.f32 1.442695, %v1573_v59  ;;  %v1724_v30 = vadd.f32 %v6464_v11, %v1723_v61  ;;  %v6491_v23 = vpop.eup %5022 }
 0x3a6   : > { %v1836_v18 = vpack.c.bf16 %v6272_v60, %v6259_v28  ;;  %5048 = vpow2.f32 %v1694_v51  ;;  %v1761_v46 = vadd.f32 %v6472_v57, %v1760_v54  ;;  %v6494_v0 = vpop.eup %5024  ;;  %v1835_v28 = vpack.c.bf16 %v6264_v13, %v6254_v3 }
 0x3a7   : > { %1868 = vmatpush1.bf16.msra.mxu1 %v1837_v34  ;;  %5050 = vpow2.f32 %v1696_v35  ;;  %v1725_v17 = vadd.f32 %v6478_v56, %v1724_v30  ;;  %v6497_v55 = vpop.eup %5026  ;;  %v1834_v63 = vpack.c.bf16 %v6249_v22, %v6240_v50  ;;  %v1833_v13 = vpack.c.bf16 %v6244_v4, %v6235_v10 }
 0x3a8   : > { %1869 = vmatprep.subr.bf16.mxu1 %v1836_v18  ;;  %5052 = vpow2.f32 %v1698_v2  ;;  %v1762_v33 = vadd.f32 %v6481_v6, %v1761_v46  ;;  %v6502_v60 = vpop.eup %5028  ;;  %v1832_v50 = vpack.c.bf16 %v6229_v36, %v6217_v27  ;;  %v1831_v4 = vpack.c.bf16 %v6223_v24, %v6211_v16  ;;  %v9197_v16 = vld [vmem:[#allocation33_spill] sm:$0xff] }
 0x3a9   : > { %5054 = vpow2.f32 %v1700_v39  ;;  %v1726_v32 = vadd.f32 %v6486_v20, %v1725_v17  ;;  %v6507_v31 = vpop.eup %5030  ;;  %v9196_v2 = vpack.c.bf16 %v6205_v12, %v6193_v45  ;;  %v9198_v24 = vpack.c.bf16 %v6199_v5, %v9197_v16 }
 0x3aa   : > { %v1763_v59 = vadd.f32 %v6491_v23, %v1762_v33  ;;  %v5033_v15 = vpop.eup %5032  ;;  %v9217_v40 = vmov 0  }
 0x3ab   : > { %1870 = vmatpush1.bf16.msra.mxu1 %v1835_v28  ;;  %v1727_v52 = vadd.f32 %v6494_v0, %v1726_v32  ;;  %v5035_v8 = vpop.eup %5034 }
 0x3ac   : > { %1871 = vmatprep.subr.bf16.mxu1 %v1834_v63  ;;  %v1764_v3 = vadd.f32 %v6497_v55, %v1763_v59  ;;  %v5037_v44 = vpop.eup %5036  ;;  %v9199_v63 = vld [vmem:[#allocation58_spill] sm:$0xff]  ;;  %v9200_v59 = vld [vmem:[#allocation61_spill] sm:$0xff] }
 0x3ad   : > { %v1728_v14 = vadd.f32 %v6502_v60, %v1727_v52  ;;  %v5039_v22 = vpop.eup %5038  ;;  %v1855_v43 = vpack.c.bf16 %v5037_v44, %v5033_v15 }
 0x3ae   : > { %v1765_v41 = vadd.f32 %v6507_v31, %v1764_v3  ;;  %v1856_v38 = vpack.c.bf16 %v5039_v22, %v5035_v8 }
 0x3af   : > { %1872 = vmatpush1.bf16.msra.mxu1 %v1833_v13  ;;  %v5041_v47 = vpop.eup %5040  ;;  %v1729_v19 = vadd.f32 %v5033_v15, %v1728_v14  ;;  %v9201_v15 = vsub.f32 %v9199_v63, %v9200_v59 }
 0x3b0   : > { %1873 = vmatprep.subr.bf16.mxu1 %v1832_v50  ;;  %v5043_v58 = vpop.eup %5042  ;;  %v1766_v62 = vadd.f32 %v5035_v8, %v1765_v41  ;;  %v1854_v41 = vpack.c.bf16 %v6507_v31, %v6497_v55  ;;  %v1851_v55 = vpack.c.bf16 %v6486_v20, %v6478_v56  ;;  %v1848_v56 = vpack.c.bf16 %v6440_v37, %v6424_v29  ;;  %v9206_v37 = vld [vmem:[#allocation10_spill] sm:$0xff] }
 0x3b1   : > { %v5045_v10 = vpop.eup %5044  ;;  %v1730_v51 = vadd.f32 %v5037_v44, %v1729_v19  ;;  %v1497_v52 = vmul.f32 1.442695, %v9201_v15 }
 0x3b2   : > { %v5047_v49 = vpop.eup %5046  ;;  %v1767_v35 = vadd.f32 %v5039_v22, %v1766_v62  ;;  %v1857_v27 = vpack.c.bf16 %v5045_v10, %v5041_v47  ;;  %v1853_v62 = vpack.c.bf16 %v6502_v60, %v6494_v0 }
 0x3b3   : > { %1874 = vmatpush1.bf16.msra.mxu1 %v1831_v4  ;;  %v5049_v36 = vpop.eup %5048  ;;  %v1731_v61 = vadd.f32 %v5041_v47, %v1730_v51  ;;  %v1858_v54 = vpack.c.bf16 %v5047_v49, %v5043_v58  ;;  %5056 = vpow2.f32 %v1497_v52 }
 0x3b4   : > { %1875 = vmatprep.subr.bf16.mxu1 %v9196_v2  ;;  %v5051_v34 = vpop.eup %5050  ;;  %v1768_v39 = vadd.f32 %v5043_v58, %v1767_v35  ;;  %v1850_v35 = vpack.c.bf16 %v6472_v57, %v6456_v25  ;;  %v1847_v57 = vpack.c.bf16 %v6432_v1, %v6416_v42  ;;  %v9209_v42 = vld [vmem:[#allocation59_spill] sm:$0xff] }
 0x3b5   : > { %v5053_v30 = vpop.eup %5052  ;;  %v1732_v18 = vadd.f32 %v5045_v10, %v1731_v61  ;;  %v1852_v10 = vpack.c.bf16 %v6491_v23, %v6481_v6 }
 0x3b6   : > { %v5055_v46 = vpop.eup %5054  ;;  %v1769_v17 = vadd.f32 %v5047_v49, %v1768_v39  ;;  %v1859_v33 = vpack.c.bf16 %v5053_v30, %v5049_v36 }
 0x3b7   : > { %1876 = vmatpush1.bf16.msra.mxu1 %v9198_v24  ;;  %v1733_v28 = vadd.f32 %v5049_v36, %v1732_v18  ;;  %v1860_v32 = vpack.c.bf16 %v5055_v46, %v5051_v34  ;;  %v1849_v36 = vpack.c.bf16 %v6464_v11, %v6448_v48  ;;  %v9204_v48 = vld [vmem:[#allocation14_spill] sm:$0xff]  ;;  %v9205_v11 = vld [vmem:[#allocation16_spill] sm:$0xff]  ;;  %v9214_v18 = vld [vmem:[#allocation11_spill] sm:$0xff] }
 0x3b8   : > { %v1770_v45 = vadd.f32 %v5051_v34, %v1769_v17  ;;  %v9207_v34 = vld [vmem:[#allocation12_spill] sm:$0xff] }
 0x3b9   : > { %v1734_v12 = vadd.f32 %v5053_v30, %v1733_v28  ;;  %1877 = vmatprep.subr.bf16.mxu1 %v1860_v32  ;;  %v1117_v39 = vpack.c.bf16 %v9207_v34, %v9206_v37  ;;  %v9208_v30 = vld [vmem:[#allocation62_spill] sm:$0xff]  ;;  %v9237_v34 = vld [vmem:[#allocation63_spill] sm:$0xff] }
 0x3ba   : > { %v1771_v8 = vadd.f32 %v5055_v46, %v1770_v45  ;;  %v9210_v1 = vpack.c.bf16 %v9208_v30, %v9209_v42  ;;  %v9215_v46 = vld [vmem:[#allocation9_spill] sm:$0xff]  ;;  %v9238_v30 = vld [vmem:[#allocation64_spill] sm:$0xff] }
 0x3bb   : > { %1878 = vmatpush2.bf16.msra.mxu1 %v1859_v33  ;;  %v1735_v3 = vrot.slane %v1734_v12, 4  ;;  %v9216_v17 = vpack.c.bf16 %v9214_v18, %v9215_v46 }
 0x3bc   : > { %1879 = vmatprep.subr.bf16.mxu1 %v1858_v54  ;;  %v1772_v13 = vrot.slane %v1771_v8, 4  ;;  %v1119_v54 = vpack.c.bf16 %v9205_v11, %v9204_v48 }
 0x3bd   : > { %v1736_v44 = vadd.f32 %v1735_v3, %v1734_v12 }
 0x3be   : > { %v1773_v14 = vadd.f32 %v1772_v13, %v1771_v8 }
 0x3bf   : > { %1880 = vmatpush2.bf16.msra.mxu1 %v1857_v27  ;;  %v1737_v5 = vrot.slane %v1736_v44, 2  ;;  %v9202_v27 = vld [vmem:[#allocation57_spill] sm:$0xff] }
 0x3c0   : > { %1881 = vmatprep.subr.bf16.mxu1 %v1856_v38  ;;  %v1774_v50 = vrot.slane %v1773_v14, 2  ;;  %v979_v38 = vpop.f32.mrf.mxu1  ;;  %v6537_v31 = vpop.eup %5056 }
 0x3c1   : > { %v1738_v22 = vadd.f32 %v1737_v5, %v1736_v44  ;;  %v1818_v42 = vrot.slane %v6537_v31, %v9238_v30 }
 0x3c2   : > { %v1775_v47 = vadd.f32 %v1774_v50, %v1773_v14  ;;  %v981_v60 = vpop.f32.mrf.mxu1 }
 0x3c3   : > { %1882 = vmatpush2.bf16.msra.mxu1 %v1855_v43  ;;  %v1739_v19 = vrot.slane %v1738_v22, 1  ;;  %v1702_v43 = vld [vmem:[#allocation4] ss:$4 sm:$0x3]  ;;  %v1822_v18 = vmul.f32 0.0, %v1818_v42 }
 0x3c4   : > { %1883 = vmatprep.subr.bf16.mxu1 %v1854_v41  ;;  %v1776_v58 = vrot.slane %v1775_v47, 1  ;;  %v1703_v6 = vmul.f32 %v6537_v31, %v1702_v43  ;;  %v983_v61 = vpop.f32.mrf.mxu1 }
 0x3c5   : > { %v1740_v4 = vadd.f32 %v1739_v19, %v1738_v22  ;;  %v1066_v7 = vpack.c.bf16 %v983_v61, %v979_v38 }
 0x3c6   : > { %v1777_v51 = vadd.f32 %v1776_v58, %v1775_v47  ;;  %v985_v2 = vpop.f32.mrf.mxu1 }
 0x3c7   : > { %1884 = vmatpush2.bf16.msra.mxu1 %v1853_v62  ;;  %v1067_v29 = vpack.c.bf16 %v985_v2, %v981_v60 }
 0x3c8   : > { %1885 = vmatprep.subr.bf16.mxu1 %v1852_v10  ;;  %v1780_v49 = vcombine.low %v1740_v4, %v1777_v51 }
 0x3ca   : > { %v1787_v0 = vrot.slane %v1780_v49, %v9202_v27 }
 0x3cb   : > { %1886 = vmatpush2.bf16.msra.mxu1 %v1851_v55 }
 0x3cc   : > { %1887 = vmatprep.subr.bf16.mxu1 %v1850_v35  ;;  %v1794_v23 = vrot.slane %v1787_v0, %v9202_v27 }
 0x3ce   : > { %v1796_v20 = vadd.f32 %v1794_v23, %v1703_v6 }
 0x3cf   : > { %1888 = vmatpush2.bf16.msra.mxu1 %v1849_v36 }
 0x3d0   : > { %1889 = vmatprep.subr.bf16.mxu1 %v1848_v56  ;;  %1801 = vst.msk [vmem:[#allocation4] ss:$4 sm:$0x3] %vm6084_vm3, %v1796_v20 }
 0x3d3   : > { %1890 = vmatpush2.bf16.msra.mxu1 %v1847_v57 }
 0x3d4   : > { %1891 = vmatprep.subr.bf16.mxu1 %v1846_v9  ;;  %v9213_v9 = vpack.c.bf16 %v9211_v21, %v9212_v26 }
 0x3d7   : > { %1892 = vmatpush2.bf16.msra.mxu1 %v1845_v53  ;;  %v1939_v53 = vpop.trf.xlu1  ;;  %v4342_v37 = vld [vmem:[#allocation4] ss:$4 sm:$0x3] }
 0x3d8   : > { %2023 = vmatprep.subr.bf16.mxu1 %v1119_v54  ;;  %5058 = vrcp.f32 %v4342_v37 }
 0x3da   : > { %1894 = vmatmul.mubr.bf16.vlgmr.msra.gmra.mxu1 %v9210_v1 }
 0x3db   : > { %1903 = vmatprep.mubr.bf16.mxu1 %v1067_v29  ;;  %2024 = vmatpush1.bf16.msra.mxu1 %v9213_v9  ;;  %v1940_v16 = vpop.trf.xlu1 }
 0x3dc   : > { %2025 = vmatprep.subr.bf16.mxu1 %v1117_v39  ;;  %v1814_v39 = vrot.slane %v6537_v31, %v9237_v34 }
 0x3de   : > { %v1821_v21 = vmul.f32 0.0, %v1814_v39 }
 0x3df   : > { %2026 = vmatpush1.bf16.msra.mxu1 %v9216_v17  ;;  %v1941_v24 = vpop.trf.xlu1 }
 0x3e2   : > { %1904 = vmatmul.mubr.bf16.gmra.mxu1 %v1066_v7 }
 0x3e3   : > { %2043 = vmatprep.mubr.bf16.mxu1 %v9217_v40  ;;  %v1942_v33 = vpop.trf.xlu1 }
 0x3e5   : > { %v5059_v46 = vpop.eup %5058 }
 0x3e7   : > { %v1943_v63 = vpop.trf.xlu1 }
 0x3ea   : > { %4778 = vmatmul.mubr.msk.bf16.vlgmr.msra.gmra.mxu1 %vm1160_vm2, %v1939_v53 }
 0x3eb   : > { %2053 = vmatprep.mubr.bf16.mxu1 %v9217_v40  ;;  %v1944_v3 = vpop.trf.xlu1 }
 0x3ef   : > { %v1945_v22 = vpop.trf.xlu1 }
 0x3f2   : > { %4779 = vmatmul.mubr.msk.bf16.gmra.mxu1 %vm1160_vm2, %v1940_v16  ;;  %v4349_v16 = vrot.slane %v5059_v46, %v9237_v34 }
 0x3f3   : > { %2063 = vmatprep.mubr.bf16.mxu1 %v9217_v40  ;;  %v1946_v4 = vpop.trf.xlu1 }
 0x3f7   : > { %v1955_v43 = vpop.trf.xlu1 }
 0x3fa   : > { %4780 = vmatmul.mubr.msk.bf16.gmra.mxu1 %vm1160_vm2, %v1941_v24 }
 0x3fb   : > { %2073 = vmatprep.mubr.bf16.mxu1 %v9217_v40  ;;  %v1956_v36 = vpop.trf.xlu1 }
 0x3fe   : > { %v6580_v28 = vpop.f32.mrf.mxu1 }
 0x3ff   : > { %9218 = vst [vmem:[#allocation34_spill] sm:$0xff] %v6580_v28  ;;  %v1957_v61 = vpop.trf.xlu1 }
 0x400   : > { %v991_v32 = vpop.f32.mrf.mxu1 }
 0x402   : > { %4781 = vmatmul.mubr.msk.bf16.gmra.mxu1 %vm1160_vm2, %v1942_v33  ;;  %v6582_v59 = vpop.f32.mrf.mxu1 }
 0x403   : > { %2083 = vmatprep.mubr.bf16.mxu1 %v9217_v40  ;;  %9219 = vst [vmem:[#allocation35_spill] sm:$0xff] %v6582_v59  ;;  %v1958_v57 = vpop.trf.xlu1 }
 0x404   : > { %v995_v52 = vpop.f32.mrf.mxu1 }
 0x405   : > { %v1069_v45 = vpack.c.bf16 %v995_v52, %v991_v32 }
 0x407   : > { %2693 = vmatprep.mubr.bf16.mxu0 %v1069_v45  ;;  %v1959_v2 = vpop.trf.xlu1 }
 0x40a   : > { %4782 = vmatmul.mubr.msk.bf16.gmra.mxu1 %vm1160_vm2, %v1943_v63 }
 0x40b   : > { %2093 = vmatprep.mubr.bf16.mxu1 %v9217_v40  ;;  %v1960_v48 = vpop.trf.xlu1 }
 0x40e   : > { %v6588_v12 = vpop.f32.mrf.mxu1 }
 0x40f   : > { %9220 = vst [vmem:[#allocation36_spill] sm:$0xff] %v6588_v12  ;;  %v1961_v11 = vpop.trf.xlu1 }
 0x410   : > { %v6590_v8 = vpop.f32.mrf.mxu1 }
 0x411   : > { %9221 = vst [vmem:[#allocation37_spill] sm:$0xff] %v6590_v8 }
 0x412   : > { %v6592_v13 = vpop.f32.mrf.mxu1  ;;  %4783 = vmatmul.mubr.msk.bf16.gmra.mxu1 %vm1160_vm2, %v1944_v3 }
 0x413   : > { %9222 = vst [vmem:[#allocation38_spill] sm:$0xff] %v6592_v13  ;;  %2103 = vmatprep.mubr.bf16.mxu1 %v9217_v40  ;;  %v1962_v54 = vpop.trf.xlu1 }
 0x414   : > { %v6597_v14 = vpop.f32.mrf.mxu1 }
 0x415   : > { %9223 = vst [vmem:[#allocation39_spill] sm:$0xff] %v6597_v14 }
 0x416   : > { %v6600_v5 = vpop.f32.mrf.mxu1 }
 0x417   : > { %9224 = vst [vmem:[#allocation40_spill] sm:$0xff] %v6600_v5 }
 0x418   : > { %v1011_v50 = vpop.f32.mrf.mxu1 }
 0x41a   : > { %v6602_v41 = vpop.f32.mrf.mxu1  ;;  %4784 = vmatmul.mubr.msk.bf16.gmra.mxu1 %vm1160_vm2, %v1945_v22 }
 0x41b   : > { %9225 = vst [vmem:[#allocation41_spill] sm:$0xff] %v6602_v41  ;;  %2113 = vmatprep.mubr.bf16.mxu1 %v9217_v40 }
 0x41c   : > { %v1015_v19 = vpop.f32.mrf.mxu1 }
 0x41d   : > { %v1073_v29 = vpack.c.bf16 %v1015_v19, %v1011_v50 }
 0x41e   : > { %v6608_v58 = vpop.f32.mrf.mxu1 }
 0x41f   : > { %9226 = vst [vmem:[#allocation42_spill] sm:$0xff] %v6608_v58 }
 0x420   : > { %v6610_v62 = vpop.f32.mrf.mxu1 }
 0x421   : > { %9227 = vst [vmem:[#allocation43_spill] sm:$0xff] %v6610_v62 }
 0x422   : > { %v6612_v10 = vpop.f32.mrf.mxu1  ;;  %4785 = vmatmul.mubr.msk.bf16.gmra.mxu1 %vm1160_vm2, %v1946_v4 }
 0x423   : > { %9228 = vst [vmem:[#allocation44_spill] sm:$0xff] %v6612_v10  ;;  %2123 = vmatprep.mubr.bf16.mxu1 %v9217_v40 }
 0x424   : > { %v6617_v38 = vpop.f32.mrf.mxu1 }
 0x425   : > { %9229 = vst [vmem:[#allocation45_spill] sm:$0xff] %v6617_v38 }
 0x426   : > { %v6620_v49 = vpop.f32.mrf.mxu1 }
 0x427   : > { %9230 = vst [vmem:[#allocation46_spill] sm:$0xff] %v6620_v49 }
 0x428   : > { %v6622_v55 = vpop.f32.mrf.mxu1 }
 0x429   : > { %9231 = vst [vmem:[#allocation47_spill] sm:$0xff] %v6622_v55 }
 0x42a   : > { %v6624_v35 = vpop.f32.mrf.mxu1  ;;  %4786 = vmatmul.mubr.msk.bf16.gmra.mxu1 %vm1160_vm2, %v1955_v43 }
 0x42b   : > { %9232 = vst [vmem:[#allocation48_spill] sm:$0xff] %v6624_v35  ;;  %2133 = vmatprep.mubr.bf16.mxu1 %v9217_v40 }
 0x42c   : > { %v6629_v60 = vpop.f32.mrf.mxu1 }
 0x42d   : > { %9233 = vst [vmem:[#allocation49_spill] sm:$0xff] %v6629_v60 }
 0x42e   : > { %v6632_v6 = vpop.f32.mrf.mxu1 }
 0x42f   : > { %9234 = vst [vmem:[#allocation50_spill] sm:$0xff] %v6632_v6 }
 0x430   : > { %v6634_v23 = vpop.f32.mrf.mxu1 }
 0x431   : > { %9235 = vst [vmem:[#allocation51_spill] sm:$0xff] %v6634_v23 }
 0x432   : > { %v6636_v56 = vpop.f32.mrf.mxu1  ;;  %4787 = vmatmul.mubr.msk.bf16.gmra.mxu1 %vm1160_vm2, %v1956_v36 }
 0x433   : > { %9236 = vst [vmem:[#allocation52_spill] sm:$0xff] %v6636_v56  ;;  %2143 = vmatprep.mubr.bf16.mxu1 %v9217_v40 }
 0x434   : > { %v6657_v1 = vpop.f32.mrf.mxu1 }
 0x435   : > { %9239 = vst [vmem:[#allocation53_spill] sm:$0xff] %v6657_v1 }
 0x43a   : > { %4788 = vmatmul.mubr.msk.bf16.gmra.mxu1 %vm1160_vm2, %v1957_v61 }
 0x43b   : > { %2153 = vmatprep.mubr.bf16.mxu1 %v9217_v40 }
 0x442   : > { %4789 = vmatmul.mubr.msk.bf16.gmra.mxu1 %vm1160_vm2, %v1958_v57 }
 0x443   : > { %2163 = vmatprep.mubr.bf16.mxu1 %v9217_v40 }
 0x44a   : > { %4790 = vmatmul.mubr.msk.bf16.gmra.mxu1 %vm1160_vm2, %v1959_v2 }
 0x44b   : > { %2173 = vmatprep.mubr.bf16.mxu1 %v9217_v40 }
 0x452   : > { %4791 = vmatmul.mubr.msk.bf16.gmra.mxu1 %vm1160_vm2, %v1960_v48 }
 0x453   : > { %2183 = vmatprep.mubr.bf16.mxu1 %v9217_v40 }
 0x45a   : > { %4792 = vmatmul.mubr.msk.bf16.gmra.mxu1 %vm1160_vm2, %v1961_v11 }
 0x45b   : > { %2193 = vmatprep.mubr.bf16.mxu1 %v9217_v40 }
 0x462   : > { %4793 = vmatmul.mubr.msk.bf16.gmra.mxu1 %vm1160_vm2, %v1962_v54 }
 0x463   : > { %3493 = vmatprep.mubr.bf16.mxu1 %v1073_v29 }
 0x49a   : > { %v1895_v26 = vpop.f32.mrf.mxu1 }
 0x49b   : > { %v1914_v9 = vadd.f32 %v1895_v26, %v1821_v21 }
 0x49c   : > { %v1897_v17 = vpop.f32.mrf.mxu1 }
 0x49d   : > { %v1915_v7 = vadd.f32 %v1897_v17, %v1822_v18  ;;  %v6660_v32 = vmul.f32 %v4349_v16, %v1914_v9 }
 0x49e   : > { %v1899_v53 = vpop.f32.mrf.mxu1 }
 0x49f   : > { %v1916_v24 = vadd.f32 %v1899_v53, %v1821_v21  ;;  %9240 = vst [vmem:[#allocation54_spill] sm:$0xff] %v6660_v32 }
 0x4a0   : > { %v1901_v33 = vpop.f32.mrf.mxu1 }
 0x4a1   : > { %v6662_v63 = vmul.f32 %v4349_v16, %v1916_v24  ;;  %v1917_v53 = vadd.f32 %v1901_v33, %v1822_v18  ;;  %v4353_v24 = vrot.slane %v5059_v46, %v9238_v30 }
 0x4a2   : > { %v1905_v52 = vpop.f32.mrf.mxu1 }
 0x4a3   : > { %9241 = vst [vmem:[#allocation55_spill] sm:$0xff] %v6662_v63  ;;  %v1918_v45 = vadd.f32 %v1905_v52, %v1821_v21 }
 0x4a4   : > { %v1907_v3 = vpop.f32.mrf.mxu1 }
 0x4a5   : > { %v1919_v50 = vadd.f32 %v1907_v3, %v1822_v18  ;;  %v6666_v43 = vmul.f32 %v4349_v16, %v1918_v45  ;;  %v6703_v45 = vmul.f32 %v4353_v24, %v1917_v53 }
 0x4a6   : > { %v1909_v22 = vpop.f32.mrf.mxu1 }
 0x4a7   : > { %v1920_v19 = vadd.f32 %v1909_v22, %v1821_v21  ;;  %9242 = vst [vmem:[#allocation56_spill] sm:$0xff] %v6666_v43  ;;  %9250 = vst [vmem:[#allocation62_spill] sm:$0xff] %v6703_v45  ;;  %v6707_v22 = vmul.f32 %v4353_v24, %v1915_v7  ;;  %v6721_v53 = vmul.f32 %v4353_v24, %v1919_v50 }
 0x4a8   : > { %v1911_v4 = vpop.f32.mrf.mxu1 }
 0x4a9   : > { %v6668_v36 = vmul.f32 %v4349_v16, %v1920_v19  ;;  %9251 = vst [vmem:[#allocation59_spill] sm:$0xff] %v6707_v22  ;;  %v1921_v31 = vadd.f32 %v1911_v4, %v1822_v18  ;;  %9254 = vst [vmem:[#allocation11_spill] sm:$0xff] %v6721_v53 }
 0x4aa   : > { %v6670_v61 = vpop.f32.mrf.mxu1 }
 0x4ab   : > { %9243 = vst [vmem:[#allocation33_spill] sm:$0xff] %v6668_v36  ;;  %v6717_v0 = vmul.f32 %v4353_v24, %v1921_v31 }
 0x4ac   : > { %v6674_v2 = vpop.f32.mrf.mxu1 }
 0x4ad   : > { %9253 = vst [vmem:[#allocation13_spill] sm:$0xff] %v6717_v0 }
 0x4ae   : > { %v6676_v48 = vpop.f32.mrf.mxu1 }
 0x4b0   : > { %v6678_v11 = vpop.f32.mrf.mxu1 }
 0x4b2   : > { %v6680_v54 = vpop.f32.mrf.mxu1 }
 0x4b3   : > { %9244 = vst [vmem:[#allocation58_spill] sm:$0xff] %v6680_v54  ;;  %v2206_v38 = vmax.f32 %v6670_v61, %v6680_v54 }
 0x4b4   : > { %v6682_v29 = vpop.f32.mrf.mxu1 }
 0x4b5   : > { %9245 = vst [vmem:[#allocation61_spill] sm:$0xff] %v6682_v29  ;;  %v2243_v55 = vmax.f32 %v6674_v2, %v6682_v29 }
 0x4b6   : > { %v6684_v37 = vpop.f32.mrf.mxu1 }
 0x4b7   : > { %9246 = vst [vmem:[#allocation14_spill] sm:$0xff] %v6684_v37  ;;  %v2207_v62 = vmax.f32 %v6676_v48, %v6684_v37 }
 0x4b8   : > { %v6686_v39 = vpop.f32.mrf.mxu1 }
 0x4b9   : > { %9247 = vst [vmem:[#allocation16_spill] sm:$0xff] %v6686_v39  ;;  %v2244_v40 = vmax.f32 %v6678_v11, %v6686_v39 }
 0x4ba   : > { %v6688_v42 = vpop.f32.mrf.mxu1 }
 0x4bb   : > { %v2208_v12 = vmax.f32 %v2206_v38, %v6688_v42 }
 0x4bc   : > { %v6690_v21 = vpop.f32.mrf.mxu1 }
 0x4bd   : > { %v2245_v59 = vmax.f32 %v2243_v55, %v6690_v21 }
 0x4be   : > { %v6692_v26 = vpop.f32.mrf.mxu1 }
 0x4bf   : > { %9248 = vst [vmem:[#allocation10_spill] sm:$0xff] %v6692_v26  ;;  %v2209_v13 = vmax.f32 %v2207_v62, %v6692_v26 }
 0x4c0   : > { %v6694_v9 = vpop.f32.mrf.mxu1 }
 0x4c1   : > { %v2246_v14 = vmax.f32 %v2244_v40, %v6694_v9 }
 0x4c2   : > { %v6696_v17 = vpop.f32.mrf.mxu1 }
 0x4c3   : > { %v2210_v8 = vmax.f32 %v2208_v12, %v6696_v17 }
 0x4c4   : > { %v6698_v16 = vpop.f32.mrf.mxu1 }
 0x4c5   : > { %v2247_v29 = vmax.f32 %v2245_v59, %v6698_v16 }
 0x4c6   : > { %v6701_v52 = vpop.f32.mrf.mxu1 }
 0x4c7   : > { %9249 = vst [vmem:[#allocation12_spill] sm:$0xff] %v6701_v52  ;;  %v2211_v37 = vmax.f32 %v2209_v13, %v6701_v52 }
 0x4c8   : > { %v6705_v3 = vpop.f32.mrf.mxu1 }
 0x4c9   : > { %v2248_v39 = vmax.f32 %v2246_v14, %v6705_v3 }
 0x4ca   : > { %v6709_v19 = vpop.f32.mrf.mxu1 }
 0x4cb   : > { %v2212_v38 = vmax.f32 %v2210_v8, %v6709_v19 }
 0x4cc   : > { %v6711_v57 = vpop.f32.mrf.mxu1 }
 0x4cd   : > { %v2249_v55 = vmax.f32 %v2247_v29, %v6711_v57 }
 0x4ce   : > { %v6715_v20 = vpop.f32.mrf.mxu1 }
 0x4cf   : > { %9252 = vst [vmem:[#allocation15_spill] sm:$0xff] %v6715_v20  ;;  %v2213_v62 = vmax.f32 %v2211_v37, %v6715_v20 }
 0x4d0   : > { %v6719_v46 = vpop.f32.mrf.mxu1 }
 0x4d1   : > { %v2250_v40 = vmax.f32 %v2248_v39, %v6719_v46 }
 0x4d2   : > { %v6723_v51 = vpop.f32.mrf.mxu1 }
 0x4d3   : > { %v2214_v12 = vmax.f32 %v2212_v38, %v6723_v51 }
 0x4d4   : > { %v6725_v7 = vpop.f32.mrf.mxu1 }
 0x4d5   : > { %v2251_v59 = vmax.f32 %v2249_v55, %v6725_v7 }
 0x4d6   : > { %v6729_v4 = vpop.f32.mrf.mxu1 }
 0x4d7   : > { %9255 = vst [vmem:[#allocation9_spill] sm:$0xff] %v6729_v4  ;;  %v2215_v13 = vmax.f32 %v2213_v62, %v6729_v4 }
 0x4d8   : > { %v6731_v47 = vpop.f32.mrf.mxu1 }
 0x4d9   : > { %v2252_v14 = vmax.f32 %v2250_v40, %v6731_v47 }
 0x4da   : > { %v6733_v33 = vpop.f32.mrf.mxu1 }
 0x4db   : > { %v2216_v8 = vmax.f32 %v2214_v12, %v6733_v33 }
 0x4dc   : > { %v6735_v44 = vpop.f32.mrf.mxu1 }
 0x4dd   : > { %v2253_v29 = vmax.f32 %v2251_v59, %v6735_v44 }
 0x4de   : > { %v6737_v31 = vpop.f32.mrf.mxu1 }
 0x4df   : > { %9256 = vst [vmem:[#allocation65_spill] sm:$0xff] %v6737_v31  ;;  %v2217_v37 = vmax.f32 %v2215_v13, %v6737_v31 }
 0x4e0   : > { %v6739_v15 = vpop.f32.mrf.mxu1 }
 0x4e1   : > { %v2254_v39 = vmax.f32 %v2252_v14, %v6739_v15 }
 0x4e2   : > { %v6741_v50 = vpop.f32.mrf.mxu1 }
 0x4e3   : > { %v2218_v38 = vmax.f32 %v2216_v8, %v6741_v50 }
 0x4e4   : > { %v6743_v24 = vpop.f32.mrf.mxu1 }
 0x4e5   : > { %v2255_v55 = vmax.f32 %v2253_v29, %v6743_v24 }
 0x4e6   : > { %v6745_v32 = vpop.f32.mrf.mxu1 }
 0x4e7   : > { %9257 = vst [vmem:[#allocation66_spill] sm:$0xff] %v6745_v32  ;;  %v2219_v62 = vmax.f32 %v2217_v37, %v6745_v32 }
 0x4e8   : > { %v6747_v63 = vpop.f32.mrf.mxu1 }
 0x4e9   : > { %v2256_v40 = vmax.f32 %v2254_v39, %v6747_v63 }
 0x4ea   : > { %v6749_v18 = vpop.f32.mrf.mxu1 }
 0x4eb   : > { %v2220_v12 = vmax.f32 %v2218_v38, %v6749_v18 }
 0x4ec   : > { %v6751_v22 = vpop.f32.mrf.mxu1 }
 0x4ed   : > { %v2257_v59 = vmax.f32 %v2255_v55, %v6751_v22 }
 0x4ee   : > { %v6753_v45 = vpop.f32.mrf.mxu1 }
 0x4ef   : > { %9258 = vst [vmem:[#allocation67_spill] sm:$0xff] %v6753_v45  ;;  %v2221_v13 = vmax.f32 %v2219_v62, %v6753_v45 }
 0x4f0   : > { %v6755_v43 = vpop.f32.mrf.mxu1 }
 0x4f1   : > { %v2258_v14 = vmax.f32 %v2256_v40, %v6755_v43 }
 0x4f2   : > { %v6757_v36 = vpop.f32.mrf.mxu1 }
 0x4f3   : > { %v2222_v8 = vmax.f32 %v2220_v12, %v6757_v36 }
 0x4f4   : > { %v6759_v53 = vpop.f32.mrf.mxu1 }
 0x4f5   : > { %v2259_v29 = vmax.f32 %v2257_v59, %v6759_v53 }
 0x4f6   : > { %v6761_v0 = vpop.f32.mrf.mxu1 }
 0x4f7   : > { %9259 = vst [vmem:[#allocation68_spill] sm:$0xff] %v6761_v0  ;;  %v2223_v37 = vmax.f32 %v2221_v13, %v6761_v0 }
 0x4f8   : > { %v6763_v6 = vpop.f32.mrf.mxu1 }
 0x4f9   : > { %v2260_v39 = vmax.f32 %v2258_v14, %v6763_v6 }
 0x4fa   : > { %v6765_v56 = vpop.f32.mrf.mxu1 }
 0x4fb   : > { %v2224_v38 = vmax.f32 %v2222_v8, %v6765_v56 }
 0x4fc   : > { %v6767_v49 = vpop.f32.mrf.mxu1 }
 0x4fd   : > { %v2261_v55 = vmax.f32 %v2259_v29, %v6767_v49 }
 0x4fe   : > { %v6769_v35 = vpop.f32.mrf.mxu1 }
 0x4ff   : > { %9260 = vst [vmem:[#allocation69_spill] sm:$0xff] %v6769_v35  ;;  %v2225_v62 = vmax.f32 %v2223_v37, %v6769_v35 }
 0x500   : > { %v6771_v1 = vpop.f32.mrf.mxu1 }
 0x501   : > { %v2262_v40 = vmax.f32 %v2260_v39, %v6771_v1 }
 0x502   : > { %v6773_v23 = vpop.f32.mrf.mxu1 }
 0x503   : > { %v2226_v12 = vmax.f32 %v2224_v38, %v6773_v23 }
 0x504   : > { %v6775_v58 = vpop.f32.mrf.mxu1 }
 0x505   : > { %v2263_v59 = vmax.f32 %v2261_v55, %v6775_v58 }
 0x506   : > { %v6777_v10 = vpop.f32.mrf.mxu1 }
 0x507   : > { %9261 = vst [vmem:[#allocation70_spill] sm:$0xff] %v6777_v10  ;;  %v2227_v13 = vmax.f32 %v2225_v62, %v6777_v10 }
 0x508   : > { %v6779_v5 = vpop.f32.mrf.mxu1 }
 0x509   : > { %v2264_v14 = vmax.f32 %v2262_v40, %v6779_v5 }
 0x50a   : > { %v6781_v41 = vpop.f32.mrf.mxu1 }
 0x50b   : > { %v2228_v8 = vmax.f32 %v2226_v12, %v6781_v41 }
 0x50c   : > { %v6787_v60 = vpop.f32.mrf.mxu1 }
 0x50d   : > { %v2265_v29 = vmax.f32 %v2263_v59, %v6787_v60 }
 0x50e   : > { %v6795_v28 = vpop.f32.mrf.mxu1 }
 0x50f   : > { %9262 = vst [vmem:[#allocation71_spill] sm:$0xff] %v6795_v28  ;;  %v2229_v37 = vmax.f32 %v2227_v13, %v6795_v28 }
 0x510   : > { %v6801_v54 = vpop.f32.mrf.mxu1 }
 0x511   : > { %9263 = vst [vmem:[#allocation72_spill] sm:$0xff] %v6801_v54  ;;  %v2266_v39 = vmax.f32 %v2264_v14, %v6801_v54 }
 0x512   : > { %v6807_v26 = vpop.f32.mrf.mxu1 }
 0x513   : > { %9264 = vst [vmem:[#allocation73_spill] sm:$0xff] %v6807_v26  ;;  %v2230_v38 = vmax.f32 %v2228_v8, %v6807_v26 }
 0x514   : > { %v6813_v52 = vpop.f32.mrf.mxu1 }
 0x515   : > { %9265 = vst [vmem:[#allocation74_spill] sm:$0xff] %v6813_v52  ;;  %v2267_v55 = vmax.f32 %v2265_v29, %v6813_v52 }
 0x516   : > { %v6819_v20 = vpop.f32.mrf.mxu1 }
 0x517   : > { %9266 = vst [vmem:[#allocation75_spill] sm:$0xff] %v6819_v20  ;;  %v2231_v62 = vmax.f32 %v2229_v37, %v6819_v20 }
 0x518   : > { %v6825_v4 = vpop.f32.mrf.mxu1 }
 0x519   : > { %9267 = vst [vmem:[#allocation76_spill] sm:$0xff] %v6825_v4  ;;  %v2268_v40 = vmax.f32 %v2266_v39, %v6825_v4 }
 0x51a   : > { %v6831_v31 = vpop.f32.mrf.mxu1 }
 0x51b   : > { %9268 = vst [vmem:[#allocation77_spill] sm:$0xff] %v6831_v31  ;;  %v2232_v12 = vmax.f32 %v2230_v38, %v6831_v31 }
 0x51c   : > { %v6837_v32 = vpop.f32.mrf.mxu1 }
 0x51d   : > { %9269 = vst [vmem:[#allocation78_spill] sm:$0xff] %v6837_v32  ;;  %v2269_v59 = vmax.f32 %v2267_v55, %v6837_v32 }
 0x51e   : > { %v6843_v45 = vpop.f32.mrf.mxu1 }
 0x51f   : > { %9270 = vst [vmem:[#allocation79_spill] sm:$0xff] %v6843_v45  ;;  %v2233_v13 = vmax.f32 %v2231_v62, %v6843_v45 }
 0x520   : > { %v6849_v0 = vpop.f32.mrf.mxu1 }
 0x521   : > { %9271 = vst [vmem:[#allocation80_spill] sm:$0xff] %v6849_v0  ;;  %v2270_v14 = vmax.f32 %v2268_v40, %v6849_v0 }
 0x522   : > { %v6855_v35 = vpop.f32.mrf.mxu1 }
 0x523   : > { %9272 = vst [vmem:[#allocation81_spill] sm:$0xff] %v6855_v35  ;;  %v2234_v8 = vmax.f32 %v2232_v12, %v6855_v35 }
 0x524   : > { %v6861_v10 = vpop.f32.mrf.mxu1 }
 0x525   : > { %v2271_v29 = vmax.f32 %v2269_v59, %v6861_v10  ;;  %v6878_v59 = vld [vmem:[#allocation3 + $0x1] ss:$4 sm:$0x3] }
 0x526   : > { %v6867_v28 = vpop.f32.mrf.mxu1  ;;  %9274 = vst [vmem:[#allocation83_spill] sm:$0xff] %v6878_v59 }
 0x527   : > { %9273 = vst [vmem:[#allocation82_spill] sm:$0xff] %v6867_v28  ;;  %v2235_v37 = vmax.f32 %v2233_v13, %v6867_v28 }
 0x528   : > { %v6873_v20 = vpop.f32.mrf.mxu1 }
 0x529   : > { %v2236_v52 = vmax.f32 %v2234_v8, %v2235_v37  ;;  %v2272_v39 = vmax.f32 %v2270_v14, %v6873_v20 }
 0x52b   : > { %v2237_v38 = vrot.slane %v2236_v52, 4  ;;  %v2273_v31 = vmax.f32 %v2271_v29, %v2272_v39  ;;  %v9278_v29 = vld [vmem:[#allocation14_spill] sm:$0xff] }
 0x52d   : > { %v2238_v62 = vmax.f32 %v2236_v52, %v2237_v38  ;;  %v2274_v45 = vrot.slane %v2273_v31, 4 }
 0x52f   : > { %v2239_v4 = vrot.slane %v2238_v62, 2  ;;  %v2275_v26 = vmax.f32 %v2273_v31, %v2274_v45  ;;  %v9276_v45 = vld [vmem:[#allocation58_spill] sm:$0xff]  ;;  %v9277_v31 = vld [vmem:[#allocation61_spill] sm:$0xff] }
 0x531   : > { %v2240_v55 = vmax.f32 %v2238_v62, %v2239_v4  ;;  %v2276_v32 = vrot.slane %v2275_v26, 2  ;;  %v9279_v62 = vld [vmem:[#allocation16_spill] sm:$0xff] }
 0x533   : > { %v2241_v40 = vrot.slane %v2240_v55, 1  ;;  %v2277_v0 = vmax.f32 %v2275_v26, %v2276_v32 }
 0x535   : > { %v2278_v12 = vrot.slane %v2277_v0, 1  ;;  %v2242_v35 = vmax.f32 %v2240_v55, %v2241_v40 }
 0x537   : > { %v2279_v13 = vmax.f32 %v2277_v0, %v2278_v12 }
 0x539   : > { %v2282_v28 = vcombine.low %v2242_v35, %v2279_v13 }
 0x53b   : > { %v2289_v54 = vrot.slane %v2282_v28, %v9202_v27 }
 0x53d   : > { %v2296_v14 = vrot.slane %v2289_v54, %v9202_v27 }
 0x53f   : > { %v6882_v8 = vmax.f32 %v6878_v59, %v2296_v14  ;;  %v9280_v14 = vld [vmem:[#allocation10_spill] sm:$0xff] }
 0x541   : > { %9275 = vst [vmem:[#allocation84_spill] sm:$0xff] %v6882_v8  ;;  %2730 = vst.msk [vmem:[#allocation3 + $0x1] ss:$4 sm:$0x3] %vm6084_vm3, %v6882_v8  ;;  %v6891_v0 = vrot.slane %v6882_v8, %v9237_v34  ;;  %v6895_v28 = vrot.slane %v6882_v8, %v9238_v30 }
 0x543   : > { %v2313_v35 = vsub.f32 %v6670_v61, %v6891_v0  ;;  %v2314_v32 = vsub.f32 %v6674_v2, %v6895_v28  ;;  %v2315_v54 = vsub.f32 %v6676_v48, %v6891_v0  ;;  %v2316_v26 = vsub.f32 %v6678_v11, %v6895_v28 }
 0x544   : > { %v2317_v4 = vsub.f32 %v9276_v45, %v6891_v0  ;;  %v2318_v37 = vsub.f32 %v9277_v31, %v6895_v28  ;;  %v2319_v39 = vsub.f32 %v9278_v29, %v6891_v0  ;;  %v2320_v2 = vsub.f32 %v9279_v62, %v6895_v28  ;;  %v9281_v31 = vld [vmem:[#allocation12_spill] sm:$0xff] }
 0x545   : > { %v2377_v38 = vmul.f32 1.442695, %v2313_v35  ;;  %v2379_v61 = vmul.f32 1.442695, %v2314_v32  ;;  %v2381_v55 = vmul.f32 1.442695, %v2315_v54  ;;  %v2321_v48 = vsub.f32 %v6688_v42, %v6891_v0 }
 0x546   : > { %v2383_v40 = vmul.f32 1.442695, %v2316_v26  ;;  %v2385_v11 = vmul.f32 1.442695, %v2317_v4  ;;  %v2322_v12 = vsub.f32 %v6690_v21, %v6895_v28  ;;  %v2387_v13 = vmul.f32 1.442695, %v2318_v37 }
 0x547   : > { %5060 = vpow2.f32 %v2377_v38  ;;  %v2323_v45 = vsub.f32 %v9280_v14, %v6891_v0  ;;  %v2389_v35 = vmul.f32 1.442695, %v2319_v39  ;;  %v2324_v32 = vsub.f32 %v6694_v9, %v6895_v28 }
 0x548   : > { %5062 = vpow2.f32 %v2379_v61  ;;  %v2391_v54 = vmul.f32 1.442695, %v2320_v2  ;;  %v2325_v42 = vsub.f32 %v6696_v17, %v6891_v0  ;;  %v2393_v26 = vmul.f32 1.442695, %v2321_v48  ;;  %v9282_v61 = vld [vmem:[#allocation15_spill] sm:$0xff] }
 0x549   : > { %5064 = vpow2.f32 %v2381_v55  ;;  %v2326_v21 = vsub.f32 %v6698_v16, %v6895_v28  ;;  %v2395_v4 = vmul.f32 1.442695, %v2322_v12  ;;  %v2327_v37 = vsub.f32 %v9281_v31, %v6891_v0 }
 0x54a   : > { %5066 = vpow2.f32 %v2383_v40  ;;  %v2397_v29 = vmul.f32 1.442695, %v2323_v45  ;;  %v2328_v9 = vsub.f32 %v6705_v3, %v6895_v28  ;;  %v2399_v39 = vmul.f32 1.442695, %v2324_v32 }
 0x54b   : > { %5068 = vpow2.f32 %v2385_v11  ;;  %v2329_v17 = vsub.f32 %v6709_v19, %v6891_v0  ;;  %v2330_v38 = vsub.f32 %v6711_v57, %v6895_v28  ;;  %v2401_v16 = vmul.f32 1.442695, %v2325_v42  ;;  %v9283_v57 = vld [vmem:[#allocation9_spill] sm:$0xff] }
 0x54c   : > { %5070 = vpow2.f32 %v2387_v13  ;;  %v2331_v62 = vsub.f32 %v9282_v61, %v6891_v0  ;;  %v2332_v2 = vsub.f32 %v6719_v46, %v6895_v28  ;;  %v2403_v55 = vmul.f32 1.442695, %v2326_v21 }
 0x54d   : > { %5072 = vpow2.f32 %v2389_v35  ;;  %v2333_v3 = vsub.f32 %v6723_v51, %v6891_v0  ;;  %v2334_v40 = vsub.f32 %v6725_v7, %v6895_v28  ;;  %v2405_v19 = vmul.f32 1.442695, %v2327_v37  ;;  %v9285_v7 = vld [vmem:[#allocation65_spill] sm:$0xff] }
 0x54e   : > { %5074 = vpow2.f32 %v2391_v54  ;;  %v2335_v48 = vsub.f32 %v9283_v57, %v6891_v0  ;;  %v2336_v11 = vsub.f32 %v6731_v47, %v6895_v28  ;;  %v2407_v12 = vmul.f32 1.442695, %v2328_v9  ;;  %v9288_v9 = vld [vmem:[#allocation67_spill] sm:$0xff] }
 0x54f   : > { %5076 = vpow2.f32 %v2393_v26  ;;  %v2337_v46 = vsub.f32 %v6733_v33, %v6891_v0  ;;  %v2338_v13 = vsub.f32 %v6735_v44, %v6895_v28  ;;  %v2409_v51 = vmul.f32 1.442695, %v2329_v17  ;;  %v9287_v26 = vld [vmem:[#allocation66_spill] sm:$0xff] }
 0x550   : > { %5078 = vpow2.f32 %v2395_v4  ;;  %v2339_v45 = vsub.f32 %v9285_v7, %v6891_v0  ;;  %v2340_v35 = vsub.f32 %v6739_v15, %v6895_v28  ;;  %v2411_v47 = vmul.f32 1.442695, %v2330_v38 }
 0x551   : > { %5080 = vpow2.f32 %v2397_v29  ;;  %v2341_v33 = vsub.f32 %v6741_v50, %v6891_v0  ;;  %v2342_v44 = vsub.f32 %v6743_v24, %v6895_v28  ;;  %v2413_v54 = vmul.f32 1.442695, %v2331_v62 }
 0x552   : > { %5082 = vpow2.f32 %v2399_v39  ;;  %v2343_v21 = vsub.f32 %v9287_v26, %v6891_v0  ;;  %v2344_v15 = vsub.f32 %v6747_v63, %v6895_v28  ;;  %v2415_v4 = vmul.f32 1.442695, %v2332_v2  ;;  %v9289_v2 = vld [vmem:[#allocation68_spill] sm:$0xff] }
 0x553   : > { %5084 = vpow2.f32 %v2401_v16  ;;  %v2345_v50 = vsub.f32 %v6749_v18, %v6891_v0  ;;  %v2346_v24 = vsub.f32 %v6751_v22, %v6895_v28  ;;  %v2417_v37 = vmul.f32 1.442695, %v2333_v3 }
 0x554   : > { %v6949_v14 = vpop.eup %5060  ;;  %5086 = vpow2.f32 %v2403_v55  ;;  %v2347_v39 = vsub.f32 %v9288_v9, %v6891_v0  ;;  %v2348_v63 = vsub.f32 %v6755_v43, %v6895_v28  ;;  %v2419_v17 = vmul.f32 1.442695, %v2334_v40 }
 0x555   : > { %9284 = vst [vmem:[#allocation58_spill] sm:$0xff] %v6949_v14  ;;  %v6955_v32 = vpop.eup %5062  ;;  %5088 = vpow2.f32 %v2405_v19  ;;  %v2349_v18 = vsub.f32 %v6757_v36, %v6891_v0  ;;  %v2350_v16 = vsub.f32 %v6759_v53, %v6895_v28  ;;  %v2421_v61 = vmul.f32 1.442695, %v2335_v48 }
 0x556   : > { %v6961_v42 = vpop.eup %5064  ;;  %5090 = vpow2.f32 %v2407_v12  ;;  %v2423_v3 = vmul.f32 1.442695, %v2336_v11  ;;  %v2425_v57 = vmul.f32 1.442695, %v2337_v46  ;;  %v2427_v7 = vmul.f32 1.442695, %v2338_v13 }
 0x557   : > { %9286 = vst [vmem:[#allocation61_spill] sm:$0xff] %v6961_v42  ;;  %v6967_v31 = vpop.eup %5066  ;;  %5092 = vpow2.f32 %v2409_v51  ;;  %v2508_v40 = vadd.f32 %v6961_v42, %v6949_v14  ;;  %v2429_v26 = vmul.f32 1.442695, %v2339_v45  ;;  %v2431_v13 = vmul.f32 1.442695, %v2340_v35 }
 0x558   : > { %v6973_v29 = vpop.eup %5068  ;;  %5094 = vpow2.f32 %v2411_v47  ;;  %v2545_v12 = vadd.f32 %v6967_v31, %v6955_v32  ;;  %v2433_v48 = vmul.f32 1.442695, %v2341_v33  ;;  %v2437_v11 = vmul.f32 1.442695, %v2343_v21 }
 0x559   : > { %v6979_v38 = vpop.eup %5070  ;;  %5096 = vpow2.f32 %v2413_v54  ;;  %v2509_v47 = vadd.f32 %v6973_v29, %v2508_v40  ;;  %v2439_v46 = vmul.f32 1.442695, %v2344_v15  ;;  %v2443_v15 = vmul.f32 1.442695, %v2346_v24 }
 0x55a   : > { %v6985_v62 = vpop.eup %5072  ;;  %5098 = vpow2.f32 %v2415_v4  ;;  %v2546_v4 = vadd.f32 %v6979_v38, %v2545_v12  ;;  %v9290_v12 = vld [vmem:[#allocation69_spill] sm:$0xff]  ;;  %v2447_v24 = vmul.f32 1.442695, %v2348_v63  ;;  %v2451_v63 = vmul.f32 1.442695, %v2350_v16 }
 0x55b   : > { %v6991_v19 = vpop.eup %5074  ;;  %5100 = vpow2.f32 %v2417_v37  ;;  %v2510_v40 = vadd.f32 %v6985_v62, %v2509_v47  ;;  %v2441_v47 = vmul.f32 1.442695, %v2345_v50  ;;  %v2445_v50 = vmul.f32 1.442695, %v2347_v39 }
 0x55c   : > { %v6997_v51 = vpop.eup %5076  ;;  %5102 = vpow2.f32 %v2419_v17  ;;  %v2547_v45 = vadd.f32 %v6991_v19, %v2546_v4  ;;  %v2435_v17 = vmul.f32 1.442695, %v2342_v44  ;;  %v2449_v39 = vmul.f32 1.442695, %v2349_v18 }
 0x55d   : > { %v7002_v54 = vpop.eup %5078  ;;  %5104 = vpow2.f32 %v2421_v61  ;;  %v2511_v35 = vadd.f32 %v6997_v51, %v2510_v40  ;;  %v9294_v18 = vsub.f32 %v9289_v2, %v6891_v0  ;;  %v9296_v16 = vsub.f32 %v6763_v6, %v6895_v28  ;;  %v9311_v6 = vld [vmem:[#allocation81_spill] sm:$0xff] }
 0x55e   : > { %v7007_v37 = vpop.eup %5080  ;;  %5106 = vpow2.f32 %v2423_v3  ;;  %v2548_v33 = vadd.f32 %v7002_v54, %v2547_v45  ;;  %v9291_v45 = vld [vmem:[#allocation70_spill] sm:$0xff] }
 0x55f   : > { %v7012_v52 = vpop.eup %5082  ;;  %5108 = vpow2.f32 %v2425_v57  ;;  %v2512_v44 = vadd.f32 %v7007_v37, %v2511_v35 }
 0x560   : > { %v7017_v61 = vpop.eup %5084  ;;  %5110 = vpow2.f32 %v2427_v7  ;;  %v2549_v21 = vadd.f32 %v7012_v52, %v2548_v33 }
 0x561   : > { %v7022_v3 = vpop.eup %5086  ;;  %5112 = vpow2.f32 %v2429_v26 }
 0x562   : > { %v7027_v57 = vpop.eup %5088  ;;  %5114 = vpow2.f32 %v2431_v13  ;;  %v2513_v13 = vadd.f32 %v7017_v61, %v2512_v44  ;;  %v2550_v33 = vadd.f32 %v7022_v3, %v2549_v21 }
 0x563   : > { %v7032_v7 = vpop.eup %5090  ;;  %5116 = vpow2.f32 %v2433_v48 }
 0x564   : > { %v7037_v26 = vpop.eup %5092  ;;  %5118 = vpow2.f32 %v2435_v17  ;;  %v2514_v17 = vadd.f32 %v7027_v57, %v2513_v13 }
 0x565   : > { %v7045_v35 = vpop.eup %5094  ;;  %5120 = vpow2.f32 %v2437_v11  ;;  %v2551_v11 = vadd.f32 %v7032_v7, %v2550_v33  ;;  %v2453_v33 = vmul.f32 1.442695, %v9294_v18 }
 0x566   : > { %v7053_v55 = vpop.eup %5096  ;;  %5122 = vpow2.f32 %v2439_v46  ;;  %v9292_v46 = vld [vmem:[#allocation71_spill] sm:$0xff]  ;;  %v2515_v13 = vadd.f32 %v7037_v26, %v2514_v17  ;;  %v2455_v17 = vmul.f32 1.442695, %v9296_v16 }
 0x567   : > { %v7061_v44 = vpop.eup %5098  ;;  %5124 = vpow2.f32 %v2441_v47  ;;  %v9293_v47 = vld [vmem:[#allocation72_spill] sm:$0xff]  ;;  %v2552_v22 = vadd.f32 %v7045_v35, %v2551_v11  ;;  %v9298_v11 = vsub.f32 %v6765_v56, %v6891_v0  ;;  %v9302_v56 = vsub.f32 %v9290_v12, %v6891_v0 }
 0x568   : > { %v7069_v21 = vpop.eup %5100  ;;  %5126 = vpow2.f32 %v2443_v15  ;;  %v9295_v15 = vld [vmem:[#allocation73_spill] sm:$0xff]  ;;  %v2516_v48 = vadd.f32 %v7053_v55, %v2515_v13  ;;  %v9300_v13 = vsub.f32 %v6767_v49, %v6895_v28  ;;  %v9304_v49 = vsub.f32 %v6771_v1, %v6895_v28 }
 0x569   : > { %v7077_v9 = vpop.eup %5102  ;;  %5128 = vpow2.f32 %v2445_v50  ;;  %v9297_v50 = vld [vmem:[#allocation74_spill] sm:$0xff]  ;;  %v2457_v18 = vmul.f32 1.442695, %v9298_v11  ;;  %v2553_v40 = vadd.f32 %v7061_v44, %v2552_v22  ;;  %v2461_v22 = vmul.f32 1.442695, %v9302_v56 }
 0x56a   : > { %v7085_v43 = vpop.eup %5104  ;;  %5130 = vpow2.f32 %v2447_v24  ;;  %v9299_v24 = vld [vmem:[#allocation75_spill] sm:$0xff]  ;;  %v2459_v16 = vmul.f32 1.442695, %v9300_v13  ;;  %v2517_v4 = vadd.f32 %v7069_v21, %v2516_v48  ;;  %v2463_v48 = vmul.f32 1.442695, %v9304_v49 }
 0x56b   : > { %v7093_v36 = vpop.eup %5106  ;;  %5132 = vpow2.f32 %v2449_v39  ;;  %v9301_v39 = vld [vmem:[#allocation76_spill] sm:$0xff]  ;;  %v2554_v11 = vadd.f32 %v7077_v9, %v2553_v40  ;;  %v9306_v12 = vsub.f32 %v6773_v23, %v6891_v0  ;;  %v9308_v1 = vsub.f32 %v6775_v58, %v6895_v28 }
 0x56c   : > { %v7101_v53 = vpop.eup %5108  ;;  %5134 = vpow2.f32 %v2451_v63  ;;  %v9303_v63 = vld [vmem:[#allocation77_spill] sm:$0xff]  ;;  %v2518_v13 = vadd.f32 %v7085_v43, %v2517_v4  ;;  %v9310_v23 = vsub.f32 %v9291_v45, %v6891_v0  ;;  %v9312_v58 = vsub.f32 %v6779_v5, %v6895_v28 }
 0x56d   : > { %v5111_v2 = vpop.eup %5110  ;;  %5136 = vpow2.f32 %v2453_v33  ;;  %v9305_v33 = vld [vmem:[#allocation78_spill] sm:$0xff]  ;;  %v2465_v40 = vmul.f32 1.442695, %v9306_v12  ;;  %v2555_v56 = vadd.f32 %v7093_v36, %v2554_v11  ;;  %v2467_v4 = vmul.f32 1.442695, %v9308_v1 }
 0x56e   : > { %v7115_v34 = vpop.eup %5112  ;;  %5138 = vpow2.f32 %v2455_v17  ;;  %v9307_v17 = vld [vmem:[#allocation79_spill] sm:$0xff]  ;;  %v2519_v49 = vadd.f32 %v7101_v53, %v2518_v13  ;;  %v2469_v11 = vmul.f32 1.442695, %v9310_v23  ;;  %v2471_v1 = vmul.f32 1.442695, %v9312_v58 }
 0x56f   : > { %v5115_v30 = vpop.eup %5114  ;;  %5140 = vpow2.f32 %v2457_v18  ;;  %v9309_v18 = vld [vmem:[#allocation80_spill] sm:$0xff]  ;;  %v2556_v12 = vadd.f32 %v5111_v2, %v2555_v56 }
 0x570   : > { %v5117_v27 = vpop.eup %5116  ;;  %5142 = vpow2.f32 %v2459_v16  ;;  %v2520_v13 = vadd.f32 %v7115_v34, %v2519_v49 }
 0x571   : > { %v5119_v8 = vpop.eup %5118  ;;  %5144 = vpow2.f32 %v2461_v22  ;;  %v9313_v22 = vsub.f32 %v6781_v41, %v6891_v0  ;;  %v2557_v45 = vadd.f32 %v5115_v30, %v2556_v12  ;;  %v9315_v41 = vsub.f32 %v9292_v46, %v6891_v0 }
 0x572   : > { %v5121_v59 = vpop.eup %5120  ;;  %5146 = vpow2.f32 %v2463_v48  ;;  %v9314_v48 = vsub.f32 %v6787_v60, %v6895_v28  ;;  %v2521_v42 = vadd.f32 %v5117_v27, %v2520_v13  ;;  %v9316_v60 = vsub.f32 %v9293_v47, %v6895_v28 }
 0x573   : > { %v5123_v14 = vpop.eup %5122  ;;  %5148 = vpow2.f32 %v2465_v40  ;;  %v2473_v25 = vmul.f32 1.442695, %v9313_v22  ;;  %v2643_v23 = vpack.c.bf16 %v5121_v59, %v5117_v27  ;;  %v2374_v40 = vsub.f32 %v6861_v10, %v6895_v28 }
 0x574   : > { %v7149_v56 = vpop.eup %5124  ;;  %5150 = vpow2.f32 %v2467_v4  ;;  %v2475_v16 = vmul.f32 1.442695, %v9314_v48  ;;  %v2644_v5 = vpack.c.bf16 %v5123_v14, %v5119_v8  ;;  %v2477_v49 = vmul.f32 1.442695, %v9315_v41 }
 0x575   : > { %v7154_v58 = vpop.eup %5126  ;;  %5152 = vpow2.f32 %v2469_v11  ;;  %v2558_v12 = vadd.f32 %v5119_v8, %v2557_v45  ;;  %v2479_v4 = vmul.f32 1.442695, %v9316_v60  ;;  %v2522_v27 = vadd.f32 %v5121_v59, %v2521_v42 }
 0x576   : > { %v7161_v22 = vpop.eup %5128  ;;  %5154 = vpow2.f32 %v2471_v1  ;;  %2661 = vmatprep.subr.bf16.mxu0 %v2644_v5  ;;  %v2642_v13 = vpack.c.bf16 %v5115_v30, %v5111_v2  ;;  %v9317_v10 = vsub.f32 %v9295_v15, %v6891_v0  ;;  %v9318_v59 = vsub.f32 %v9297_v50, %v6895_v28 }
 0x577   : > { %v7166_v48 = vpop.eup %5130  ;;  %5156 = vpow2.f32 %v2473_v25  ;;  %v2559_v46 = vadd.f32 %v5123_v14, %v2558_v12  ;;  %2662 = vmatpush1.bf16.msra.mxu0 %v2643_v23  ;;  %v2645_v8 = vpack.c.bf16 %v7161_v22, %v7149_v56  ;;  %v2523_v30 = vadd.f32 %v7149_v56, %v2522_v27  ;;  %v9349_v56 = vld [vmem:[#allocation17_spill] sm:$0xff] }
 0x578   : > { %v2481_v11 = vmul.f32 1.442695, %v9317_v10  ;;  %v7173_v1 = vpop.eup %5132  ;;  %5158 = vpow2.f32 %v2475_v16  ;;  %v2483_v42 = vmul.f32 1.442695, %v9318_v59  ;;  %2663 = vmatprep.subr.bf16.mxu0 %v2642_v13  ;;  %v2646_v25 = vpack.c.bf16 %v7166_v48, %v7154_v58 }
 0x579   : > { %v7181_v47 = vpop.eup %5134  ;;  %5160 = vpow2.f32 %v2477_v49  ;;  %v9319_v14 = vsub.f32 %v9299_v24, %v6891_v0  ;;  %v2560_v2 = vadd.f32 %v7154_v58, %v2559_v46  ;;  %v2641_v16 = vpack.c.bf16 %v7115_v34, %v7101_v53  ;;  %v9321_v24 = vld [vmem:[#allocation82_spill] sm:$0xff]  ;;  %v9345_v58 = vld [vmem:[#allocation23_spill] sm:$0xff] }
 0x57a   : > { %v7189_v50 = vpop.eup %5136  ;;  %5162 = vpow2.f32 %v2479_v4  ;;  %v9320_v45 = vsub.f32 %v9301_v39, %v6895_v28  ;;  %v2524_v5 = vadd.f32 %v7161_v22, %v2523_v30  ;;  %v2640_v41 = vpack.c.bf16 %v7093_v36, %v7077_v9 }
 0x57b   : > { %v2485_v15 = vmul.f32 1.442695, %v9319_v14  ;;  %v7197_v49 = vpop.eup %5138  ;;  %v2375_v12 = vsub.f32 %v9321_v24, %v6891_v0  ;;  %5164 = vpow2.f32 %v2481_v11  ;;  %v9322_v34 = vsub.f32 %v9303_v63, %v6891_v0  ;;  %2664 = vmatpush1.bf16.msra.mxu0 %v2641_v16 }
 0x57c   : > { %v2487_v23 = vmul.f32 1.442695, %v9320_v45  ;;  %v2561_v60 = vadd.f32 %v7166_v48, %v2560_v2  ;;  %v7205_v39 = vpop.eup %5140  ;;  %v2376_v4 = vsub.f32 %v6873_v20, %v6895_v28  ;;  %5166 = vpow2.f32 %v2483_v42  ;;  %2665 = vmatprep.subr.bf16.mxu0 %v2640_v41  ;;  %v9346_v48 = vld [vmem:[#allocation21_spill] sm:$0xff] }
 0x57d   : > { %v2489_v53 = vmul.f32 1.442695, %v9322_v34  ;;  %v9323_v9 = vsub.f32 %v9305_v33, %v6895_v28  ;;  %v2525_v27 = vadd.f32 %v7173_v1, %v2524_v5  ;;  %v7213_v13 = vpop.eup %5142  ;;  %5168 = vpow2.f32 %v2485_v15 }
 0x57e   : > { %v9324_v63 = vsub.f32 %v9307_v17, %v6891_v0  ;;  %v2562_v11 = vadd.f32 %v7181_v47, %v2561_v60  ;;  %v2639_v20 = vpack.c.bf16 %v7085_v43, %v7069_v21  ;;  %v7221_v46 = vpop.eup %5144  ;;  %5170 = vpow2.f32 %v2487_v23 }
 0x57f   : > { %v2491_v36 = vmul.f32 1.442695, %v9323_v9  ;;  %v9325_v33 = vsub.f32 %v9309_v18, %v6895_v28  ;;  %v2526_v42 = vadd.f32 %v7189_v50, %v2525_v27  ;;  %v2638_v30 = vpack.c.bf16 %v7061_v44, %v7045_v35  ;;  %v7229_v14 = vpop.eup %5146 }
 0x580   : > { %v2493_v10 = vmul.f32 1.442695, %v9324_v63  ;;  %5172 = vpow2.f32 %v2489_v53  ;;  %v9326_v17 = vsub.f32 %v9311_v6, %v6891_v0  ;;  %v2563_v21 = vadd.f32 %v7197_v49, %v2562_v11  ;;  %2666 = vmatpush1.bf16.msra.mxu0 %v2639_v20  ;;  %v7235_v43 = vpop.eup %5148 }
 0x581   : > { %v2495_v59 = vmul.f32 1.442695, %v9325_v33  ;;  %5174 = vpow2.f32 %v2491_v36  ;;  %v2499_v28 = vmul.f32 1.442695, %v2374_v40  ;;  %v2527_v18 = vadd.f32 %v7205_v39, %v2526_v42  ;;  %2667 = vmatprep.subr.bf16.mxu0 %v2638_v30  ;;  %v7238_v2 = vpop.eup %5150 }
 0x582   : > { %v2497_v15 = vmul.f32 1.442695, %v9326_v17  ;;  %5176 = vpow2.f32 %v2493_v10  ;;  %v2501_v35 = vmul.f32 1.442695, %v2375_v12  ;;  %v2564_v44 = vadd.f32 %v7213_v13, %v2563_v21  ;;  %v7243_v6 = vpop.eup %5152 }
 0x583   : > { %v2637_v0 = vpack.c.bf16 %v7053_v55, %v7037_v26  ;;  %5178 = vpow2.f32 %v2495_v59  ;;  %v2503_v16 = vmul.f32 1.442695, %v2376_v4  ;;  %v2528_v45 = vadd.f32 %v7221_v46, %v2527_v18  ;;  %v7248_v23 = vpop.eup %5154 }
 0x584   : > { %v2636_v40 = vpack.c.bf16 %v7032_v7, %v7022_v3  ;;  %5180 = vpow2.f32 %v2497_v15  ;;  %v2565_v5 = vadd.f32 %v7229_v14, %v2564_v44  ;;  %v7251_v41 = vpop.eup %5156  ;;  %v2635_v3 = vpack.c.bf16 %v7027_v57, %v7017_v61 }
 0x585   : > { %2668 = vmatpush1.bf16.msra.mxu0 %v2637_v0  ;;  %5182 = vpow2.f32 %v2499_v28  ;;  %v2529_v55 = vadd.f32 %v7235_v43, %v2528_v45  ;;  %v7254_v26 = vpop.eup %5158  ;;  %v2634_v34 = vpack.c.bf16 %v7012_v52, %v7002_v54  ;;  %v2633_v57 = vpack.c.bf16 %v7007_v37, %v6997_v51 }
 0x586   : > { %2669 = vmatprep.subr.bf16.mxu0 %v2636_v40  ;;  %5184 = vpow2.f32 %v2501_v35  ;;  %v2566_v24 = vadd.f32 %v7238_v2, %v2565_v5  ;;  %v7259_v7 = vpop.eup %5160  ;;  %v2632_v52 = vpack.c.bf16 %v6991_v19, %v6979_v38  ;;  %v2631_v51 = vpack.c.bf16 %v6985_v62, %v6973_v29  ;;  %v9328_v29 = vld [vmem:[#allocation61_spill] sm:$0xff]  ;;  %v9329_v62 = vld [vmem:[#allocation58_spill] sm:$0xff] }
 0x587   : > { %5186 = vpow2.f32 %v2503_v16  ;;  %v2530_v12 = vadd.f32 %v7243_v6, %v2529_v55  ;;  %v7264_v53 = vpop.eup %5162  ;;  %v9327_v18 = vpack.c.bf16 %v6967_v31, %v6955_v32  ;;  %v9330_v55 = vpack.c.bf16 %v9328_v29, %v9329_v62  ;;  %v2739_v29 = vpop.trf.xlu0 }
 0x588   : > { %v2567_v60 = vadd.f32 %v7248_v23, %v2566_v24  ;;  %v5165_v4 = vpop.eup %5164 }
 0x589   : > { %2670 = vmatpush1.bf16.msra.mxu0 %v2635_v3  ;;  %v2531_v9 = vadd.f32 %v7251_v41, %v2530_v12  ;;  %v5167_v36 = vpop.eup %5166 }
 0x58a   : > { %2671 = vmatprep.subr.bf16.mxu0 %v2634_v34  ;;  %v2568_v61 = vadd.f32 %v7254_v26, %v2567_v60  ;;  %v5169_v27 = vpop.eup %5168  ;;  %v9331_v34 = vld [vmem:[#allocation83_spill] sm:$0xff]  ;;  %v9332_v60 = vld [vmem:[#allocation84_spill] sm:$0xff] }
 0x58b   : > { %v2532_v63 = vadd.f32 %v7259_v7, %v2531_v9  ;;  %v5171_v54 = vpop.eup %5170  ;;  %v2655_v11 = vpack.c.bf16 %v5169_v27, %v5165_v4  ;;  %v2740_v62 = vpop.trf.xlu0 }
 0x58c   : > { %v2569_v10 = vadd.f32 %v7264_v53, %v2568_v61  ;;  %v2656_v59 = vpack.c.bf16 %v5171_v54, %v5167_v36 }
 0x58d   : > { %2672 = vmatpush1.bf16.msra.mxu0 %v2633_v57  ;;  %v5173_v20 = vpop.eup %5172  ;;  %v2533_v33 = vadd.f32 %v5165_v4, %v2532_v63  ;;  %v9333_v4 = vsub.f32 %v9331_v34, %v9332_v60 }
 0x58e   : > { %2673 = vmatprep.subr.bf16.mxu0 %v2632_v52  ;;  %v5175_v42 = vpop.eup %5174  ;;  %v2570_v30 = vadd.f32 %v5167_v36, %v2569_v10 }
 0x58f   : > { %v5177_v37 = vpop.eup %5176  ;;  %v2534_v17 = vadd.f32 %v5169_v27, %v2533_v33  ;;  %v2300_v9 = vmul.f32 1.442695, %v9333_v4  ;;  %v2755_v4 = vpop.trf.xlu1 }
 0x590   : > { %v5179_v15 = vpop.eup %5178  ;;  %v2571_v21 = vadd.f32 %v5171_v54, %v2570_v30  ;;  %v2657_v38 = vpack.c.bf16 %v5177_v37, %v5173_v20 }
 0x591   : > { %2674 = vmatpush1.bf16.msra.mxu0 %v2631_v51  ;;  %v5181_v19 = vpop.eup %5180  ;;  %v2535_v28 = vadd.f32 %v5173_v20, %v2534_v17  ;;  %v2658_v35 = vpack.c.bf16 %v5179_v15, %v5175_v42  ;;  %5188 = vpow2.f32 %v2300_v9  ;;  %v2654_v20 = vpack.c.bf16 %v7264_v53, %v7254_v26  ;;  %v2506_v53 = vld [vmem:[#allocation4 + $0x1] ss:$4 sm:$0x3] }
 0x592   : > { %2675 = vmatprep.subr.bf16.mxu0 %v9327_v18  ;;  %v5183_v44 = vpop.eup %5182  ;;  %v2572_v0 = vadd.f32 %v5175_v42, %v2571_v21  ;;  %v2653_v51 = vpack.c.bf16 %v7259_v7, %v7251_v41  ;;  %v2652_v17 = vpack.c.bf16 %v7248_v23, %v7238_v2  ;;  %v2651_v21 = vpack.c.bf16 %v7243_v6, %v7235_v43  ;;  %v9340_v18 = vld [vmem:[#allocation18_spill] sm:$0xff] }
 0x593   : > { %v5185_v16 = vpop.eup %5184  ;;  %v2536_v45 = vadd.f32 %v5177_v37, %v2535_v28  ;;  %v2649_v23 = vpack.c.bf16 %v7221_v46, %v7205_v39  ;;  %v2648_v43 = vpack.c.bf16 %v7197_v49, %v7181_v47  ;;  %v9337_v28 = vld [vmem:[#allocation24_spill] sm:$0xff]  ;;  %v9338_v47 = vld [vmem:[#allocation37_spill] sm:$0xff]  ;;  %v9339_v49 = vld [vmem:[#allocation39_spill] sm:$0xff]  ;;  %v2756_v9 = vpop.trf.xlu1 }
 0x594   : > { %v5187_v40 = vpop.eup %5186  ;;  %v2573_v5 = vadd.f32 %v5179_v15, %v2572_v0  ;;  %v2659_v24 = vpack.c.bf16 %v5185_v16, %v5181_v19  ;;  %v1071_v46 = vpack.c.bf16 %v9339_v49, %v9338_v47 }
 0x595   : > { %2676 = vmatpush1.bf16.msra.mxu0 %v9330_v55  ;;  %v2537_v3 = vadd.f32 %v5181_v19, %v2536_v45  ;;  %v2660_v12 = vpack.c.bf16 %v5187_v40, %v5183_v44  ;;  %v9352_v45 = vld [vmem:[#allocation36_spill] sm:$0xff]  ;;  %v2741_v55 = vpop.trf.xlu0 }
 0x596   : > { %v2574_v32 = vadd.f32 %v5183_v44, %v2573_v5  ;;  %v9354_v5 = vmov 0  }
 0x597   : > { %v2538_v31 = vadd.f32 %v5185_v16, %v2537_v3  ;;  %2677 = vmatprep.subr.bf16.mxu0 %v2660_v12  ;;  %v9348_v16 = vld [vmem:[#allocation19_spill] sm:$0xff] }
 0x598   : > { %v2575_v36 = vadd.f32 %v5187_v40, %v2574_v32  ;;  %v9350_v22 = vpack.c.bf16 %v9348_v16, %v9349_v56  ;;  %v2757_v32 = vpop.trf.xlu1 }
 0x599   : > { %2678 = vmatpush2.bf16.msra.mxu0 %v2659_v24  ;;  %v2539_v61 = vrot.slane %v2538_v31, 4  ;;  %v2742_v24 = vpop.trf.xlu0 }
 0x59a   : > { %2679 = vmatprep.subr.bf16.mxu0 %v2658_v35  ;;  %v2576_v57 = vrot.slane %v2575_v36, 4  ;;  %v9341_v35 = vld [vmem:[#allocation20_spill] sm:$0xff] }
 0x59b   : > { %v2540_v27 = vadd.f32 %v2539_v61, %v2538_v31  ;;  %v1121_v44 = vpack.c.bf16 %v9341_v35, %v9340_v18 }
 0x59c   : > { %v2577_v63 = vadd.f32 %v2576_v57, %v2575_v36  ;;  %v2758_v31 = vpop.trf.xlu1 }
 0x59d   : > { %2680 = vmatpush2.bf16.msra.mxu0 %v2657_v38  ;;  %v2541_v52 = vrot.slane %v2540_v27, 2  ;;  %v9334_v38 = vld [vmem:[#allocation57_spill] sm:$0xff]  ;;  %v2743_v3 = vpop.trf.xlu0 }
 0x59e   : > { %2681 = vmatprep.subr.bf16.mxu0 %v2656_v59  ;;  %v2578_v54 = vrot.slane %v2577_v63, 2  ;;  %v7294_v26 = vpop.eup %5188 }
 0x59f   : > { %v2542_v10 = vadd.f32 %v2541_v52, %v2540_v27  ;;  %v2507_v41 = vmul.f32 %v7294_v26, %v2506_v53  ;;  %v9356_v52 = vld [vmem:[#allocation49_spill] sm:$0xff] }
 0x5a0   : > { %v2579_v33 = vadd.f32 %v2578_v54, %v2577_v63  ;;  %v2759_v36 = vpop.trf.xlu1  ;;  %v9355_v63 = vld [vmem:[#allocation47_spill] sm:$0xff] }
 0x5a1   : > { %2682 = vmatpush2.bf16.msra.mxu0 %v2655_v11  ;;  %v2543_v42 = vrot.slane %v2542_v10, 1  ;;  %v2650_v11 = vpack.c.bf16 %v7229_v14, %v7213_v13  ;;  %v2647_v13 = vpack.c.bf16 %v7189_v50, %v7173_v1  ;;  %v9336_v14 = vld [vmem:[#allocation22_spill] sm:$0xff]  ;;  %v9342_v1 = vld [vmem:[#allocation35_spill] sm:$0xff]  ;;  %v2744_v12 = vpop.trf.xlu0  ;;  %v1077_v54 = vpack.c.bf16 %v9356_v52, %v9355_v63 }
 0x5a2   : > { %2683 = vmatprep.subr.bf16.mxu0 %v2654_v20  ;;  %v2580_v30 = vrot.slane %v2579_v33, 1  ;;  %v1123_v39 = vpack.c.bf16 %v9337_v28, %v9336_v14  ;;  %v9343_v50 = vld [vmem:[#allocation34_spill] sm:$0xff]  ;;  %v9357_v20 = vld [vmem:[#allocation63_spill] sm:$0xff] }
 0x5a3   : > { %v2544_v37 = vadd.f32 %v2543_v42, %v2542_v10  ;;  %v9344_v0 = vpack.c.bf16 %v9342_v1, %v9343_v50  ;;  %v9358_v42 = vld [vmem:[#allocation64_spill] sm:$0xff] }
 0x5a4   : > { %v2581_v15 = vadd.f32 %v2580_v30, %v2579_v33  ;;  %v2760_v61 = vpop.trf.xlu1  ;;  %v2614_v33 = vrot.slane %v7294_v26, %v9357_v20  ;;  %v2618_v30 = vrot.slane %v7294_v26, %v9358_v42 }
 0x5a5   : > { %2684 = vmatpush2.bf16.msra.mxu0 %v2653_v51  ;;  %v2745_v34 = vpop.trf.xlu0 }
 0x5a6   : > { %2685 = vmatprep.subr.bf16.mxu0 %v2652_v17  ;;  %v2584_v59 = vcombine.low %v2544_v37, %v2581_v15  ;;  %v2621_v51 = vmul.f32 0.0, %v2614_v33  ;;  %v2622_v15 = vmul.f32 0.0, %v2618_v30 }
 0x5a8   : > { %v2591_v19 = vrot.slane %v2584_v59, %v9334_v38  ;;  %v2761_v57 = vpop.trf.xlu1 }
 0x5a9   : > { %2686 = vmatpush2.bf16.msra.mxu0 %v2651_v21  ;;  %v2746_v60 = vpop.trf.xlu0 }
 0x5aa   : > { %2687 = vmatprep.subr.bf16.mxu0 %v2650_v11  ;;  %v2598_v2 = vrot.slane %v2591_v19, %v9334_v38 }
 0x5ac   : > { %v2600_v6 = vadd.f32 %v2598_v2, %v2507_v41  ;;  %v2762_v27 = vpop.trf.xlu1 }
 0x5ad   : > { %2688 = vmatpush2.bf16.msra.mxu0 %v2649_v23 }
 0x5ae   : > { %2689 = vmatprep.subr.bf16.mxu0 %v2648_v43  ;;  %2601 = vst.msk [vmem:[#allocation4 + $0x1] ss:$4 sm:$0x3] %vm6084_vm3, %v2600_v6 }
 0x5b1   : > { %2690 = vmatpush2.bf16.msra.mxu0 %v2647_v13 }
 0x5b2   : > { %2691 = vmatprep.subr.bf16.mxu0 %v2646_v25  ;;  %v9347_v25 = vpack.c.bf16 %v9345_v58, %v9346_v48 }
 0x5b5   : > { %2692 = vmatpush2.bf16.msra.mxu0 %v2645_v8  ;;  %v9351_v8 = vld [vmem:[#allocation38_spill] sm:$0xff]  ;;  %v4380_v10 = vld [vmem:[#allocation4 + $0x1] ss:$4 sm:$0x3] }
 0x5b6   : > { %2823 = vmatprep.subr.bf16.mxu0 %v1123_v39  ;;  %v9353_v40 = vpack.c.bf16 %v9351_v8, %v9352_v45  ;;  %5190 = vrcp.f32 %v4380_v10 }
 0x5b8   : > { %2694 = vmatmul.mubr.bf16.vlgmr.msra.gmra.mxu0 %v9344_v0 }
 0x5b9   : > { %2703 = vmatprep.mubr.bf16.mxu0 %v1071_v46  ;;  %2824 = vmatpush1.bf16.msra.mxu0 %v9347_v25 }
 0x5ba   : > { %2825 = vmatprep.subr.bf16.mxu0 %v1121_v44 }
 0x5bd   : > { %2826 = vmatpush1.bf16.msra.mxu0 %v9350_v22 }
 0x5c0   : > { %2704 = vmatmul.mubr.bf16.gmra.mxu0 %v9353_v40 }
 0x5c1   : > { %2843 = vmatprep.mubr.bf16.mxu0 %v9354_v5 }
 0x5c3   : > { %v5191_v59 = vpop.eup %5190 }
 0x5c4   : > { %v4387_v19 = vrot.slane %v5191_v59, %v9357_v20  ;;  %v4391_v43 = vrot.slane %v5191_v59, %v9358_v42 }
 0x5c8   : > { %4794 = vmatmul.mubr.msk.bf16.vlgmr.msra.gmra.mxu0 %vm1160_vm2, %v2739_v29 }
 0x5c9   : > { %2853 = vmatprep.mubr.bf16.mxu0 %v9354_v5 }
 0x5d0   : > { %4795 = vmatmul.mubr.msk.bf16.gmra.mxu0 %vm1160_vm2, %v2740_v62 }
 0x5d1   : > { %2863 = vmatprep.mubr.bf16.mxu0 %v9354_v5 }
 0x5d8   : > { %4796 = vmatmul.mubr.msk.bf16.gmra.mxu0 %vm1160_vm2, %v2741_v55 }
 0x5d9   : > { %2873 = vmatprep.mubr.bf16.mxu0 %v9354_v5 }
 0x5e0   : > { %4797 = vmatmul.mubr.msk.bf16.gmra.mxu0 %vm1160_vm2, %v2742_v24 }
 0x5e1   : > { %2883 = vmatprep.mubr.bf16.mxu0 %v9354_v5 }
 0x5e8   : > { %4798 = vmatmul.mubr.msk.bf16.gmra.mxu0 %vm1160_vm2, %v2743_v3 }
 0x5e9   : > { %2893 = vmatprep.mubr.bf16.mxu0 %v9354_v5 }
 0x5f0   : > { %4799 = vmatmul.mubr.msk.bf16.gmra.mxu0 %vm1160_vm2, %v2744_v12 }
 0x5f1   : > { %2903 = vmatprep.mubr.bf16.mxu0 %v9354_v5 }
 0x5f8   : > { %4800 = vmatmul.mubr.msk.bf16.gmra.mxu0 %vm1160_vm2, %v2745_v34 }
 0x5f9   : > { %2913 = vmatprep.mubr.bf16.mxu0 %v9354_v5 }
 0x600   : > { %4801 = vmatmul.mubr.msk.bf16.gmra.mxu0 %vm1160_vm2, %v2746_v60 }
 0x601   : > { %2923 = vmatprep.mubr.bf16.mxu0 %v9354_v5 }
 0x608   : > { %4802 = vmatmul.mubr.msk.bf16.gmra.mxu0 %vm1160_vm2, %v2755_v4 }
 0x609   : > { %2933 = vmatprep.mubr.bf16.mxu0 %v9354_v5 }
 0x610   : > { %4803 = vmatmul.mubr.msk.bf16.gmra.mxu0 %vm1160_vm2, %v2756_v9 }
 0x611   : > { %2943 = vmatprep.mubr.bf16.mxu0 %v9354_v5 }
 0x618   : > { %4804 = vmatmul.mubr.msk.bf16.gmra.mxu0 %vm1160_vm2, %v2757_v32 }
 0x619   : > { %2953 = vmatprep.mubr.bf16.mxu0 %v9354_v5 }
 0x620   : > { %4805 = vmatmul.mubr.msk.bf16.gmra.mxu0 %vm1160_vm2, %v2758_v31 }
 0x621   : > { %2963 = vmatprep.mubr.bf16.mxu0 %v9354_v5 }
 0x628   : > { %4806 = vmatmul.mubr.msk.bf16.gmra.mxu0 %vm1160_vm2, %v2759_v36 }
 0x629   : > { %2973 = vmatprep.mubr.bf16.mxu0 %v9354_v5 }
 0x630   : > { %4807 = vmatmul.mubr.msk.bf16.gmra.mxu0 %vm1160_vm2, %v2760_v61 }
 0x631   : > { %2983 = vmatprep.mubr.bf16.mxu0 %v9354_v5 }
 0x638   : > { %4808 = vmatmul.mubr.msk.bf16.gmra.mxu0 %vm1160_vm2, %v2761_v57 }
 0x639   : > { %2993 = vmatprep.mubr.bf16.mxu0 %v9354_v5 }
 0x640   : > { %4809 = vmatmul.mubr.msk.bf16.gmra.mxu0 %vm1160_vm2, %v2762_v27 }
 0x641   : > { %4293 = vmatprep.mubr.bf16.mxu0 %v1077_v54 }
 0x678   : > { %v2695_v37 = vpop.f32.mrf.mxu0 }
 0x679   : > { %v2714_v17 = vadd.f32 %v2695_v37, %v2621_v51 }
 0x67a   : > { %v2697_v21 = vpop.f32.mrf.mxu0 }
 0x67b   : > { %v2715_v53 = vadd.f32 %v2697_v21, %v2622_v15  ;;  %v7372_v23 = vmul.f32 %v4387_v19, %v2714_v17 }
 0x67c   : > { %v2699_v11 = vpop.f32.mrf.mxu0 }
 0x67d   : > { %v2716_v41 = vadd.f32 %v2699_v11, %v2621_v51  ;;  %9359 = vst [vmem:[#allocation14_spill] sm:$0xff] %v7372_v23  ;;  %v7377_v14 = vmul.f32 %v4391_v43, %v2715_v53 }
 0x67e   : > { %v2701_v2 = vpop.f32.mrf.mxu0 }
 0x67f   : > { %v7375_v6 = vmul.f32 %v4387_v19, %v2716_v41  ;;  %v2717_v13 = vadd.f32 %v2701_v2, %v2622_v15  ;;  %9361 = vst [vmem:[#allocation10_spill] sm:$0xff] %v7377_v14 }
 0x680   : > { %v2705_v26 = vpop.f32.mrf.mxu0 }
 0x681   : > { %9360 = vst [vmem:[#allocation16_spill] sm:$0xff] %v7375_v6  ;;  %v7381_v39 = vmul.f32 %v4391_v43, %v2717_v13  ;;  %v2718_v47 = vadd.f32 %v2705_v26, %v2621_v51 }
 0x682   : > { %v2707_v49 = vpop.f32.mrf.mxu0 }
 0x683   : > { %9362 = vst [vmem:[#allocation12_spill] sm:$0xff] %v7381_v39  ;;  %v2719_v46 = vadd.f32 %v2707_v49, %v2622_v15  ;;  %v7385_v50 = vmul.f32 %v4387_v19, %v2718_v47 }
 0x684   : > { %v2709_v35 = vpop.f32.mrf.mxu0 }
 0x685   : > { %v2720_v44 = vadd.f32 %v2709_v35, %v2621_v51  ;;  %9363 = vst [vmem:[#allocation15_spill] sm:$0xff] %v7385_v50  ;;  %v7391_v25 = vmul.f32 %v4391_v43, %v2719_v46 }
 0x686   : > { %v2711_v1 = vpop.f32.mrf.mxu0 }
 0x687   : > { %v7387_v0 = vmul.f32 %v4387_v19, %v2720_v44  ;;  %v2721_v58 = vadd.f32 %v2711_v1, %v2622_v15  ;;  %9365 = vst [vmem:[#allocation65_spill] sm:$0xff] %v7391_v25 }
 0x688   : > { %v7389_v48 = vpop.f32.mrf.mxu0 }
 0x689   : > { %9364 = vst [vmem:[#allocation9_spill] sm:$0xff] %v7387_v0  ;;  %v7395_v56 = vmul.f32 %v4391_v43, %v2721_v58 }
 0x68a   : > { %v7397_v22 = vpop.f32.mrf.mxu0 }
 0x68b   : > { %9366 = vst [vmem:[#allocation66_spill] sm:$0xff] %v7395_v56 }
 0x68c   : > { %v7401_v45 = vpop.f32.mrf.mxu0 }
 0x68e   : > { %v7403_v40 = vpop.f32.mrf.mxu0 }
 0x690   : > { %v7405_v29 = vpop.f32.mrf.mxu0 }
 0x691   : > { %9367 = vst [vmem:[#allocation67_spill] sm:$0xff] %v7405_v29  ;;  %v3006_v16 = vmax.f32 %v7389_v48, %v7405_v29 }
 0x692   : > { %v7407_v62 = vpop.f32.mrf.mxu0 }
 0x693   : > { %9368 = vst [vmem:[#allocation68_spill] sm:$0xff] %v7407_v62  ;;  %v3043_v6 = vmax.f32 %v7397_v22, %v7407_v62 }
 0x694   : > { %v7409_v55 = vpop.f32.mrf.mxu0 }
 0x695   : > { %9369 = vst [vmem:[#allocation69_spill] sm:$0xff] %v7409_v55  ;;  %v3007_v8 = vmax.f32 %v7401_v45, %v7409_v55 }
 0x696   : > { %v7411_v24 = vpop.f32.mrf.mxu0 }
 0x697   : > { %9370 = vst [vmem:[#allocation70_spill] sm:$0xff] %v7411_v24  ;;  %v3044_v14 = vmax.f32 %v7403_v40, %v7411_v24 }
 0x698   : > { %v7413_v3 = vpop.f32.mrf.mxu0 }
 0x699   : > { %v3008_v39 = vmax.f32 %v3006_v16, %v7413_v3 }
 0x69a   : > { %v7415_v12 = vpop.f32.mrf.mxu0 }
 0x69b   : > { %v3045_v25 = vmax.f32 %v3043_v6, %v7415_v12 }
 0x69c   : > { %v7417_v34 = vpop.f32.mrf.mxu0 }
 0x69d   : > { %9371 = vst [vmem:[#allocation71_spill] sm:$0xff] %v7417_v34  ;;  %v3009_v50 = vmax.f32 %v3007_v8, %v7417_v34 }
 0x69e   : > { %v7419_v60 = vpop.f32.mrf.mxu0 }
 0x69f   : > { %v3046_v56 = vmax.f32 %v3044_v14, %v7419_v60 }
 0x6a0   : > { %v7421_v4 = vpop.f32.mrf.mxu0 }
 0x6a1   : > { %v3010_v5 = vmax.f32 %v3008_v39, %v7421_v4 }
 0x6a2   : > { %v7423_v9 = vpop.f32.mrf.mxu0 }
 0x6a3   : > { %v3047_v62 = vmax.f32 %v3045_v25, %v7423_v9 }
 0x6a4   : > { %v7425_v32 = vpop.f32.mrf.mxu0 }
 0x6a5   : > { %9372 = vst [vmem:[#allocation72_spill] sm:$0xff] %v7425_v32  ;;  %v3011_v55 = vmax.f32 %v3009_v50, %v7425_v32 }
 0x6a6   : > { %v7427_v31 = vpop.f32.mrf.mxu0 }
 0x6a7   : > { %v3048_v24 = vmax.f32 %v3046_v56, %v7427_v31 }
 0x6a8   : > { %v7429_v36 = vpop.f32.mrf.mxu0 }
 0x6a9   : > { %v3012_v16 = vmax.f32 %v3010_v5, %v7429_v36 }
 0x6aa   : > { %v7431_v61 = vpop.f32.mrf.mxu0 }
 0x6ab   : > { %v3049_v6 = vmax.f32 %v3047_v62, %v7431_v61 }
 0x6ac   : > { %v7433_v57 = vpop.f32.mrf.mxu0 }
 0x6ad   : > { %9373 = vst [vmem:[#allocation73_spill] sm:$0xff] %v7433_v57  ;;  %v3013_v8 = vmax.f32 %v3011_v55, %v7433_v57 }
 0x6ae   : > { %v7435_v27 = vpop.f32.mrf.mxu0 }
 0x6af   : > { %v3050_v14 = vmax.f32 %v3048_v24, %v7435_v27 }
 0x6b0   : > { %v7437_v63 = vpop.f32.mrf.mxu0 }
 0x6b1   : > { %v3014_v39 = vmax.f32 %v3012_v16, %v7437_v63 }
 0x6b2   : > { %v7439_v52 = vpop.f32.mrf.mxu0 }
 0x6b3   : > { %v3051_v25 = vmax.f32 %v3049_v6, %v7439_v52 }
 0x6b4   : > { %v7441_v54 = vpop.f32.mrf.mxu0 }
 0x6b5   : > { %9374 = vst [vmem:[#allocation74_spill] sm:$0xff] %v7441_v54  ;;  %v3015_v50 = vmax.f32 %v3013_v8, %v7441_v54 }
 0x6b6   : > { %v7443_v10 = vpop.f32.mrf.mxu0 }
 0x6b7   : > { %v3052_v56 = vmax.f32 %v3050_v14, %v7443_v10 }
 0x6b8   : > { %v7445_v33 = vpop.f32.mrf.mxu0 }
 0x6b9   : > { %v3016_v5 = vmax.f32 %v3014_v39, %v7445_v33 }
 0x6ba   : > { %v7447_v30 = vpop.f32.mrf.mxu0 }
 0x6bb   : > { %v3053_v62 = vmax.f32 %v3051_v25, %v7447_v30 }
 0x6bc   : > { %v7449_v51 = vpop.f32.mrf.mxu0 }
 0x6bd   : > { %9375 = vst [vmem:[#allocation75_spill] sm:$0xff] %v7449_v51  ;;  %v3017_v55 = vmax.f32 %v3015_v50, %v7449_v51 }
 0x6be   : > { %v7451_v37 = vpop.f32.mrf.mxu0 }
 0x6bf   : > { %v3054_v24 = vmax.f32 %v3052_v56, %v7451_v37 }
 0x6c0   : > { %v7453_v17 = vpop.f32.mrf.mxu0 }
 0x6c1   : > { %v3018_v16 = vmax.f32 %v3016_v5, %v7453_v17 }
 0x6c2   : > { %v7455_v15 = vpop.f32.mrf.mxu0 }
 0x6c3   : > { %v3055_v6 = vmax.f32 %v3053_v62, %v7455_v15 }
 0x6c4   : > { %v7457_v59 = vpop.f32.mrf.mxu0 }
 0x6c5   : > { %9376 = vst [vmem:[#allocation76_spill] sm:$0xff] %v7457_v59  ;;  %v3019_v8 = vmax.f32 %v3017_v55, %v7457_v59 }
 0x6c6   : > { %v7459_v21 = vpop.f32.mrf.mxu0 }
 0x6c7   : > { %v3056_v14 = vmax.f32 %v3054_v24, %v7459_v21 }
 0x6c8   : > { %v7461_v53 = vpop.f32.mrf.mxu0 }
 0x6c9   : > { %v3020_v39 = vmax.f32 %v3018_v16, %v7461_v53 }
 0x6ca   : > { %v7463_v11 = vpop.f32.mrf.mxu0 }
 0x6cb   : > { %v3057_v25 = vmax.f32 %v3055_v6, %v7463_v11 }
 0x6cc   : > { %v7465_v19 = vpop.f32.mrf.mxu0 }
 0x6cd   : > { %9377 = vst [vmem:[#allocation77_spill] sm:$0xff] %v7465_v19  ;;  %v3021_v50 = vmax.f32 %v3019_v8, %v7465_v19 }
 0x6ce   : > { %v7467_v41 = vpop.f32.mrf.mxu0 }
 0x6cf   : > { %v3058_v56 = vmax.f32 %v3056_v14, %v7467_v41 }
 0x6d0   : > { %v7469_v2 = vpop.f32.mrf.mxu0 }
 0x6d1   : > { %v3022_v5 = vmax.f32 %v3020_v39, %v7469_v2 }
 0x6d2   : > { %v7471_v43 = vpop.f32.mrf.mxu0 }
 0x6d3   : > { %v3059_v62 = vmax.f32 %v3057_v25, %v7471_v43 }
 0x6d4   : > { %v7473_v13 = vpop.f32.mrf.mxu0 }
 0x6d5   : > { %9378 = vst [vmem:[#allocation78_spill] sm:$0xff] %v7473_v13  ;;  %v3023_v55 = vmax.f32 %v3021_v50, %v7473_v13 }
 0x6d6   : > { %v7475_v26 = vpop.f32.mrf.mxu0 }
 0x6d7   : > { %v3060_v24 = vmax.f32 %v3058_v56, %v7475_v26 }
 0x6d8   : > { %v7477_v47 = vpop.f32.mrf.mxu0 }
 0x6d9   : > { %v3024_v16 = vmax.f32 %v3022_v5, %v7477_v47 }
 0x6da   : > { %v7479_v49 = vpop.f32.mrf.mxu0 }
 0x6db   : > { %v3061_v6 = vmax.f32 %v3059_v62, %v7479_v49 }
 0x6dc   : > { %v7481_v46 = vpop.f32.mrf.mxu0 }
 0x6dd   : > { %9379 = vst [vmem:[#allocation79_spill] sm:$0xff] %v7481_v46  ;;  %v3025_v8 = vmax.f32 %v3023_v55, %v7481_v46 }
 0x6de   : > { %v7483_v35 = vpop.f32.mrf.mxu0 }
 0x6df   : > { %v3062_v14 = vmax.f32 %v3060_v24, %v7483_v35 }
 0x6e0   : > { %v7485_v44 = vpop.f32.mrf.mxu0 }
 0x6e1   : > { %v3026_v39 = vmax.f32 %v3024_v16, %v7485_v44 }
 0x6e2   : > { %v7487_v1 = vpop.f32.mrf.mxu0 }
 0x6e3   : > { %v3063_v25 = vmax.f32 %v3061_v6, %v7487_v1 }
 0x6e4   : > { %v7489_v58 = vpop.f32.mrf.mxu0 }
 0x6e5   : > { %9380 = vst [vmem:[#allocation80_spill] sm:$0xff] %v7489_v58  ;;  %v3027_v50 = vmax.f32 %v3025_v8, %v7489_v58 }
 0x6e6   : > { %v7491_v28 = vpop.f32.mrf.mxu0 }
 0x6e7   : > { %v3064_v56 = vmax.f32 %v3062_v14, %v7491_v28 }
 0x6e8   : > { %v7493_v18 = vpop.f32.mrf.mxu0 }
 0x6e9   : > { %v3028_v5 = vmax.f32 %v3026_v39, %v7493_v18 }
 0x6ea   : > { %v7499_v23 = vpop.f32.mrf.mxu0 }
 0x6eb   : > { %v3065_v62 = vmax.f32 %v3063_v25, %v7499_v23 }
 0x6ec   : > { %v7507_v0 = vpop.f32.mrf.mxu0 }
 0x6ed   : > { %9381 = vst [vmem:[#allocation81_spill] sm:$0xff] %v7507_v0  ;;  %v3029_v55 = vmax.f32 %v3027_v50, %v7507_v0 }
 0x6ee   : > { %v7513_v29 = vpop.f32.mrf.mxu0 }
 0x6ef   : > { %9382 = vst [vmem:[#allocation82_spill] sm:$0xff] %v7513_v29  ;;  %v3066_v24 = vmax.f32 %v3064_v56, %v7513_v29 }
 0x6f0   : > { %v7519_v34 = vpop.f32.mrf.mxu0 }
 0x6f1   : > { %9383 = vst [vmem:[#allocation61_spill] sm:$0xff] %v7519_v34  ;;  %v3030_v16 = vmax.f32 %v3028_v5, %v7519_v34 }
 0x6f2   : > { %v7525_v32 = vpop.f32.mrf.mxu0 }
 0x6f3   : > { %9384 = vst [vmem:[#allocation58_spill] sm:$0xff] %v7525_v32  ;;  %v3067_v6 = vmax.f32 %v3065_v62, %v7525_v32 }
 0x6f4   : > { %v7531_v57 = vpop.f32.mrf.mxu0 }
 0x6f5   : > { %9385 = vst [vmem:[#allocation83_spill] sm:$0xff] %v7531_v57  ;;  %v3031_v8 = vmax.f32 %v3029_v55, %v7531_v57 }
 0x6f6   : > { %v7537_v54 = vpop.f32.mrf.mxu0 }
 0x6f7   : > { %9386 = vst [vmem:[#allocation84_spill] sm:$0xff] %v7537_v54  ;;  %v3068_v14 = vmax.f32 %v3066_v24, %v7537_v54 }
 0x6f8   : > { %v7543_v51 = vpop.f32.mrf.mxu0 }
 0x6f9   : > { %9387 = vst [vmem:[#allocation22_spill] sm:$0xff] %v7543_v51  ;;  %v3032_v39 = vmax.f32 %v3030_v16, %v7543_v51 }
 0x6fa   : > { %v7549_v59 = vpop.f32.mrf.mxu0 }
 0x6fb   : > { %9388 = vst [vmem:[#allocation24_spill] sm:$0xff] %v7549_v59  ;;  %v3069_v25 = vmax.f32 %v3067_v6, %v7549_v59 }
 0x6fc   : > { %v7555_v19 = vpop.f32.mrf.mxu0 }
 0x6fd   : > { %9389 = vst [vmem:[#allocation37_spill] sm:$0xff] %v7555_v19  ;;  %v3033_v50 = vmax.f32 %v3031_v8, %v7555_v19 }
 0x6fe   : > { %v7561_v13 = vpop.f32.mrf.mxu0 }
 0x6ff   : > { %9390 = vst [vmem:[#allocation39_spill] sm:$0xff] %v7561_v13  ;;  %v3070_v56 = vmax.f32 %v3068_v14, %v7561_v13 }
 0x700   : > { %v7567_v46 = vpop.f32.mrf.mxu0 }
 0x701   : > { %9391 = vst [vmem:[#allocation18_spill] sm:$0xff] %v7567_v46  ;;  %v3034_v5 = vmax.f32 %v3032_v39, %v7567_v46 }
 0x702   : > { %v7573_v58 = vpop.f32.mrf.mxu0 }
 0x703   : > { %v3071_v62 = vmax.f32 %v3069_v25, %v7573_v58  ;;  %v7590_v25 = vld [vmem:[#allocation3 + $0x2] ss:$4 sm:$0x3] }
 0x704   : > { %v7579_v0 = vpop.f32.mrf.mxu0  ;;  %9393 = vst [vmem:[#allocation35_spill] sm:$0xff] %v7590_v25 }
 0x705   : > { %9392 = vst [vmem:[#allocation20_spill] sm:$0xff] %v7579_v0  ;;  %v3035_v55 = vmax.f32 %v3033_v50, %v7579_v0 }
 0x706   : > { %v7585_v57 = vpop.f32.mrf.mxu0 }
 0x707   : > { %v3036_v32 = vmax.f32 %v3034_v5, %v3035_v55  ;;  %v3072_v24 = vmax.f32 %v3070_v56, %v7585_v57 }
 0x709   : > { %v3037_v16 = vrot.slane %v3036_v32, 4  ;;  %v3073_v51 = vmax.f32 %v3071_v62, %v3072_v24  ;;  %v9397_v62 = vld [vmem:[#allocation69_spill] sm:$0xff] }
 0x70b   : > { %v3038_v8 = vmax.f32 %v3036_v32, %v3037_v16  ;;  %v3074_v19 = vrot.slane %v3073_v51, 4 }
 0x70d   : > { %v3039_v54 = vrot.slane %v3038_v8, 2  ;;  %v3075_v34 = vmax.f32 %v3073_v51, %v3074_v19  ;;  %v9395_v19 = vld [vmem:[#allocation67_spill] sm:$0xff] }
 0x70f   : > { %v3040_v6 = vmax.f32 %v3038_v8, %v3039_v54  ;;  %v3076_v59 = vrot.slane %v3075_v34, 2  ;;  %v9398_v8 = vld [vmem:[#allocation70_spill] sm:$0xff] }
 0x711   : > { %v3041_v14 = vrot.slane %v3040_v6, 1  ;;  %v3077_v13 = vmax.f32 %v3075_v34, %v3076_v59 }
 0x713   : > { %v3078_v39 = vrot.slane %v3077_v13, 1  ;;  %v3042_v46 = vmax.f32 %v3040_v6, %v3041_v14 }
 0x715   : > { %v3079_v50 = vmax.f32 %v3077_v13, %v3078_v39 }
 0x717   : > { %v3082_v0 = vcombine.low %v3042_v46, %v3079_v50  ;;  %v9396_v46 = vld [vmem:[#allocation68_spill] sm:$0xff] }
 0x719   : > { %v3089_v29 = vrot.slane %v3082_v0, %v9334_v38 }
 0x71b   : > { %v3096_v56 = vrot.slane %v3089_v29, %v9334_v38 }
 0x71d   : > { %v7594_v5 = vmax.f32 %v7590_v25, %v3096_v56  ;;  %v9399_v56 = vld [vmem:[#allocation71_spill] sm:$0xff] }
 0x71f   : > { %9394 = vst [vmem:[#allocation34_spill] sm:$0xff] %v7594_v5  ;;  %3530 = vst.msk [vmem:[#allocation3 + $0x2] ss:$4 sm:$0x3] %vm6084_vm3, %v7594_v5  ;;  %v7603_v34 = vrot.slane %v7594_v5, %v9357_v20  ;;  %v7607_v0 = vrot.slane %v7594_v5, %v9358_v42 }
 0x721   : > { %v3113_v29 = vsub.f32 %v7389_v48, %v7603_v34  ;;  %v3114_v54 = vsub.f32 %v7397_v22, %v7607_v0  ;;  %v3115_v51 = vsub.f32 %v7401_v45, %v7603_v34  ;;  %v3116_v59 = vsub.f32 %v7403_v40, %v7607_v0 }
 0x722   : > { %v3117_v13 = vsub.f32 %v9395_v19, %v7603_v34  ;;  %v3118_v55 = vsub.f32 %v9396_v46, %v7607_v0  ;;  %v3119_v24 = vsub.f32 %v9397_v62, %v7603_v34  ;;  %v3120_v22 = vsub.f32 %v9398_v8, %v7607_v0  ;;  %v9400_v46 = vld [vmem:[#allocation72_spill] sm:$0xff] }
 0x723   : > { %v3177_v16 = vmul.f32 1.442695, %v3113_v29  ;;  %v3179_v48 = vmul.f32 1.442695, %v3114_v54  ;;  %v3181_v6 = vmul.f32 1.442695, %v3115_v51  ;;  %v3121_v45 = vsub.f32 %v7413_v3, %v7603_v34 }
 0x724   : > { %v3183_v14 = vmul.f32 1.442695, %v3116_v59  ;;  %v3185_v40 = vmul.f32 1.442695, %v3117_v13  ;;  %v3122_v39 = vsub.f32 %v7415_v12, %v7607_v0  ;;  %v3187_v50 = vmul.f32 1.442695, %v3118_v55 }
 0x725   : > { %5192 = vpow2.f32 %v3177_v16  ;;  %v3123_v19 = vsub.f32 %v9399_v56, %v7603_v34  ;;  %v3189_v29 = vmul.f32 1.442695, %v3119_v24  ;;  %v3124_v54 = vsub.f32 %v7419_v60, %v7607_v0 }
 0x726   : > { %5194 = vpow2.f32 %v3179_v48  ;;  %v3191_v51 = vmul.f32 1.442695, %v3120_v22  ;;  %v3125_v3 = vsub.f32 %v7421_v4, %v7603_v34  ;;  %v3193_v59 = vmul.f32 1.442695, %v3121_v45  ;;  %v9401_v48 = vld [vmem:[#allocation73_spill] sm:$0xff] }
 0x727   : > { %5196 = vpow2.f32 %v3181_v6  ;;  %v3126_v12 = vsub.f32 %v7423_v9, %v7607_v0  ;;  %v3195_v13 = vmul.f32 1.442695, %v3122_v39  ;;  %v3127_v55 = vsub.f32 %v9400_v46, %v7603_v34 }
 0x728   : > { %5198 = vpow2.f32 %v3183_v14  ;;  %v3197_v62 = vmul.f32 1.442695, %v3123_v19  ;;  %v3128_v60 = vsub.f32 %v7427_v31, %v7607_v0  ;;  %v3199_v24 = vmul.f32 1.442695, %v3124_v54 }
 0x729   : > { %5200 = vpow2.f32 %v3185_v40  ;;  %v3129_v4 = vsub.f32 %v7429_v36, %v7603_v34  ;;  %v3130_v16 = vsub.f32 %v7431_v61, %v7607_v0  ;;  %v3201_v9 = vmul.f32 1.442695, %v3125_v3  ;;  %v9402_v61 = vld [vmem:[#allocation74_spill] sm:$0xff] }
 0x72a   : > { %5202 = vpow2.f32 %v3187_v50  ;;  %v3131_v8 = vsub.f32 %v9401_v48, %v7603_v34  ;;  %v3132_v22 = vsub.f32 %v7435_v27, %v7607_v0  ;;  %v3203_v6 = vmul.f32 1.442695, %v3126_v12 }
 0x72b   : > { %5204 = vpow2.f32 %v3189_v29  ;;  %v3133_v31 = vsub.f32 %v7437_v63, %v7603_v34  ;;  %v3134_v14 = vsub.f32 %v7439_v52, %v7607_v0  ;;  %v3205_v36 = vmul.f32 1.442695, %v3127_v55  ;;  %v9404_v52 = vld [vmem:[#allocation75_spill] sm:$0xff] }
 0x72c   : > { %5206 = vpow2.f32 %v3191_v51  ;;  %v3135_v45 = vsub.f32 %v9402_v61, %v7603_v34  ;;  %v3136_v40 = vsub.f32 %v7443_v10, %v7607_v0  ;;  %v3207_v39 = vmul.f32 1.442695, %v3128_v60  ;;  %v9407_v60 = vld [vmem:[#allocation77_spill] sm:$0xff] }
 0x72d   : > { %5208 = vpow2.f32 %v3193_v59  ;;  %v3137_v27 = vsub.f32 %v7445_v33, %v7603_v34  ;;  %v3138_v50 = vsub.f32 %v7447_v30, %v7607_v0  ;;  %v3209_v63 = vmul.f32 1.442695, %v3129_v4  ;;  %v9406_v59 = vld [vmem:[#allocation76_spill] sm:$0xff] }
 0x72e   : > { %5210 = vpow2.f32 %v3195_v13  ;;  %v3139_v19 = vsub.f32 %v9404_v52, %v7603_v34  ;;  %v3140_v29 = vsub.f32 %v7451_v37, %v7607_v0  ;;  %v3211_v10 = vmul.f32 1.442695, %v3130_v16 }
 0x72f   : > { %5212 = vpow2.f32 %v3197_v62  ;;  %v3141_v33 = vsub.f32 %v7453_v17, %v7603_v34  ;;  %v3142_v30 = vsub.f32 %v7455_v15, %v7607_v0  ;;  %v3213_v51 = vmul.f32 1.442695, %v3131_v8 }
 0x730   : > { %5214 = vpow2.f32 %v3199_v24  ;;  %v3143_v12 = vsub.f32 %v9406_v59, %v7603_v34  ;;  %v3144_v37 = vsub.f32 %v7459_v21, %v7607_v0  ;;  %v3215_v13 = vmul.f32 1.442695, %v3132_v22  ;;  %v9408_v22 = vld [vmem:[#allocation78_spill] sm:$0xff] }
 0x731   : > { %5216 = vpow2.f32 %v3201_v9  ;;  %v3145_v17 = vsub.f32 %v7461_v53, %v7603_v34  ;;  %v3146_v15 = vsub.f32 %v7463_v11, %v7607_v0  ;;  %v3217_v55 = vmul.f32 1.442695, %v3133_v31 }
 0x732   : > { %v7661_v56 = vpop.eup %5192  ;;  %5218 = vpow2.f32 %v3203_v6  ;;  %v3147_v24 = vsub.f32 %v9407_v60, %v7603_v34  ;;  %v3148_v21 = vsub.f32 %v7467_v41, %v7607_v0  ;;  %v3219_v4 = vmul.f32 1.442695, %v3134_v14 }
 0x733   : > { %9403 = vst [vmem:[#allocation23_spill] sm:$0xff] %v7661_v56  ;;  %v7667_v54 = vpop.eup %5194  ;;  %5220 = vpow2.f32 %v3205_v36  ;;  %v3149_v53 = vsub.f32 %v7469_v2, %v7603_v34  ;;  %v3150_v9 = vsub.f32 %v7471_v43, %v7607_v0  ;;  %v3221_v48 = vmul.f32 1.442695, %v3135_v45 }
 0x734   : > { %v7673_v3 = vpop.eup %5196  ;;  %5222 = vpow2.f32 %v3207_v39  ;;  %v3223_v31 = vmul.f32 1.442695, %v3136_v40  ;;  %v3225_v61 = vmul.f32 1.442695, %v3137_v27  ;;  %v3227_v52 = vmul.f32 1.442695, %v3138_v50 }
 0x735   : > { %9405 = vst [vmem:[#allocation21_spill] sm:$0xff] %v7673_v3  ;;  %v7679_v46 = vpop.eup %5198  ;;  %5224 = vpow2.f32 %v3209_v63  ;;  %v3308_v14 = vadd.f32 %v7673_v3, %v7661_v56  ;;  %v3229_v59 = vmul.f32 1.442695, %v3139_v19  ;;  %v3231_v50 = vmul.f32 1.442695, %v3140_v29 }
 0x736   : > { %v7685_v62 = vpop.eup %5200  ;;  %5226 = vpow2.f32 %v3211_v10  ;;  %v3345_v39 = vadd.f32 %v7679_v46, %v7667_v54  ;;  %v3233_v45 = vmul.f32 1.442695, %v3141_v33  ;;  %v3237_v40 = vmul.f32 1.442695, %v3143_v12 }
 0x737   : > { %v7691_v16 = vpop.eup %5202  ;;  %5228 = vpow2.f32 %v3213_v51  ;;  %v3309_v10 = vadd.f32 %v7685_v62, %v3308_v14  ;;  %v3239_v27 = vmul.f32 1.442695, %v3144_v37  ;;  %v3243_v37 = vmul.f32 1.442695, %v3146_v15 }
 0x738   : > { %v7697_v8 = vpop.eup %5204  ;;  %5230 = vpow2.f32 %v3215_v13  ;;  %v3346_v13 = vadd.f32 %v7691_v16, %v3345_v39  ;;  %v9409_v39 = vld [vmem:[#allocation79_spill] sm:$0xff]  ;;  %v3247_v15 = vmul.f32 1.442695, %v3148_v21  ;;  %v3251_v21 = vmul.f32 1.442695, %v3150_v9 }
 0x739   : > { %v7703_v36 = vpop.eup %5206  ;;  %5232 = vpow2.f32 %v3217_v55  ;;  %v3310_v14 = vadd.f32 %v7697_v8, %v3309_v10  ;;  %v3241_v10 = vmul.f32 1.442695, %v3145_v17  ;;  %v3245_v17 = vmul.f32 1.442695, %v3147_v24 }
 0x73a   : > { %v7709_v63 = vpop.eup %5208  ;;  %5234 = vpow2.f32 %v3219_v4  ;;  %v3347_v19 = vadd.f32 %v7703_v36, %v3346_v13  ;;  %v3235_v4 = vmul.f32 1.442695, %v3142_v30  ;;  %v3249_v24 = vmul.f32 1.442695, %v3149_v53 }
 0x73b   : > { %v7714_v51 = vpop.eup %5210  ;;  %5236 = vpow2.f32 %v3221_v48  ;;  %v3311_v29 = vadd.f32 %v7709_v63, %v3310_v14  ;;  %v9413_v53 = vsub.f32 %v9408_v22, %v7603_v34  ;;  %v9415_v9 = vsub.f32 %v7475_v26, %v7607_v0  ;;  %v9430_v26 = vld [vmem:[#allocation18_spill] sm:$0xff] }
 0x73c   : > { %v7719_v55 = vpop.eup %5212  ;;  %5238 = vpow2.f32 %v3223_v31  ;;  %v3348_v33 = vadd.f32 %v7714_v51, %v3347_v19  ;;  %v9410_v19 = vld [vmem:[#allocation80_spill] sm:$0xff] }
 0x73d   : > { %v7724_v32 = vpop.eup %5214  ;;  %5240 = vpow2.f32 %v3225_v61  ;;  %v3312_v30 = vadd.f32 %v7719_v55, %v3311_v29 }
 0x73e   : > { %v7729_v48 = vpop.eup %5216  ;;  %5242 = vpow2.f32 %v3227_v52  ;;  %v3349_v12 = vadd.f32 %v7724_v32, %v3348_v33 }
 0x73f   : > { %v7734_v31 = vpop.eup %5218  ;;  %5244 = vpow2.f32 %v3229_v59 }
 0x740   : > { %v7739_v61 = vpop.eup %5220  ;;  %5246 = vpow2.f32 %v3231_v50  ;;  %v3313_v50 = vadd.f32 %v7729_v48, %v3312_v30  ;;  %v3350_v33 = vadd.f32 %v7734_v31, %v3349_v12 }
 0x741   : > { %v7744_v52 = vpop.eup %5222  ;;  %5248 = vpow2.f32 %v3233_v45 }
 0x742   : > { %v7749_v59 = vpop.eup %5224  ;;  %5250 = vpow2.f32 %v3235_v4  ;;  %v3314_v4 = vadd.f32 %v7739_v61, %v3313_v50 }
 0x743   : > { %v7757_v29 = vpop.eup %5226  ;;  %5252 = vpow2.f32 %v3237_v40  ;;  %v3351_v40 = vadd.f32 %v7744_v52, %v3350_v33  ;;  %v3253_v33 = vmul.f32 1.442695, %v9413_v53 }
 0x744   : > { %v7765_v6 = vpop.eup %5228  ;;  %5254 = vpow2.f32 %v3239_v27  ;;  %v9411_v27 = vld [vmem:[#allocation81_spill] sm:$0xff]  ;;  %v3315_v50 = vadd.f32 %v7749_v59, %v3314_v4  ;;  %v3255_v4 = vmul.f32 1.442695, %v9415_v9 }
 0x745   : > { %v7773_v30 = vpop.eup %5230  ;;  %5256 = vpow2.f32 %v3241_v10  ;;  %v9412_v10 = vld [vmem:[#allocation82_spill] sm:$0xff]  ;;  %v3352_v11 = vadd.f32 %v7757_v29, %v3351_v40  ;;  %v9417_v40 = vsub.f32 %v7477_v47, %v7603_v34  ;;  %v9421_v47 = vsub.f32 %v9409_v39, %v7603_v34 }
 0x746   : > { %v7781_v12 = vpop.eup %5232  ;;  %5258 = vpow2.f32 %v3243_v37  ;;  %v9414_v37 = vld [vmem:[#allocation61_spill] sm:$0xff]  ;;  %v3316_v45 = vadd.f32 %v7765_v6, %v3315_v50  ;;  %v9419_v50 = vsub.f32 %v7479_v49, %v7607_v0  ;;  %v9423_v49 = vsub.f32 %v7483_v35, %v7607_v0 }
 0x747   : > { %v7789_v60 = vpop.eup %5234  ;;  %5260 = vpow2.f32 %v3245_v17  ;;  %v9416_v17 = vld [vmem:[#allocation58_spill] sm:$0xff]  ;;  %v3257_v53 = vmul.f32 1.442695, %v9417_v40  ;;  %v3353_v14 = vadd.f32 %v7773_v30, %v3352_v11  ;;  %v3261_v11 = vmul.f32 1.442695, %v9421_v47 }
 0x748   : > { %v7797_v41 = vpop.eup %5236  ;;  %5262 = vpow2.f32 %v3247_v15  ;;  %v9418_v15 = vld [vmem:[#allocation83_spill] sm:$0xff]  ;;  %v3259_v9 = vmul.f32 1.442695, %v9419_v50  ;;  %v3317_v13 = vadd.f32 %v7781_v12, %v3316_v45  ;;  %v3263_v45 = vmul.f32 1.442695, %v9423_v49 }
 0x749   : > { %v7805_v2 = vpop.eup %5238  ;;  %5264 = vpow2.f32 %v3249_v24  ;;  %v9420_v24 = vld [vmem:[#allocation84_spill] sm:$0xff]  ;;  %v3354_v40 = vadd.f32 %v7789_v60, %v3353_v14  ;;  %v9425_v39 = vsub.f32 %v7485_v44, %v7603_v34  ;;  %v9427_v35 = vsub.f32 %v7487_v1, %v7607_v0 }
 0x74a   : > { %v7813_v43 = vpop.eup %5240  ;;  %5266 = vpow2.f32 %v3251_v21  ;;  %v9422_v21 = vld [vmem:[#allocation22_spill] sm:$0xff]  ;;  %v3318_v50 = vadd.f32 %v7797_v41, %v3317_v13  ;;  %v9429_v44 = vsub.f32 %v9410_v19, %v7603_v34  ;;  %v9431_v1 = vsub.f32 %v7491_v28, %v7607_v0 }
 0x74b   : > { %v5243_v22 = vpop.eup %5242  ;;  %5268 = vpow2.f32 %v3253_v33  ;;  %v9424_v33 = vld [vmem:[#allocation24_spill] sm:$0xff]  ;;  %v3265_v14 = vmul.f32 1.442695, %v9425_v39  ;;  %v3355_v47 = vadd.f32 %v7805_v2, %v3354_v40  ;;  %v3267_v13 = vmul.f32 1.442695, %v9427_v35 }
 0x74c   : > { %v7827_v20 = vpop.eup %5244  ;;  %5270 = vpow2.f32 %v3255_v4  ;;  %v9426_v4 = vld [vmem:[#allocation37_spill] sm:$0xff]  ;;  %v3319_v49 = vadd.f32 %v7813_v43, %v3318_v50  ;;  %v3269_v40 = vmul.f32 1.442695, %v9429_v44  ;;  %v3271_v35 = vmul.f32 1.442695, %v9431_v1 }
 0x74d   : > { %v5247_v42 = vpop.eup %5246  ;;  %5272 = vpow2.f32 %v3257_v53  ;;  %v9428_v53 = vld [vmem:[#allocation39_spill] sm:$0xff]  ;;  %v3356_v39 = vadd.f32 %v5243_v22, %v3355_v47 }
 0x74e   : > { %v5249_v38 = vpop.eup %5248  ;;  %5274 = vpow2.f32 %v3259_v9  ;;  %v3320_v50 = vadd.f32 %v7827_v20, %v3319_v49 }
 0x74f   : > { %v5251_v5 = vpop.eup %5250  ;;  %5276 = vpow2.f32 %v3261_v11  ;;  %v9432_v11 = vsub.f32 %v7493_v18, %v7603_v34  ;;  %v3357_v19 = vadd.f32 %v5247_v42, %v3356_v39  ;;  %v9434_v18 = vsub.f32 %v9411_v27, %v7603_v34 }
 0x750   : > { %v5253_v25 = vpop.eup %5252  ;;  %5278 = vpow2.f32 %v3263_v45  ;;  %v9433_v45 = vsub.f32 %v7499_v23, %v7607_v0  ;;  %v3321_v3 = vadd.f32 %v5249_v38, %v3320_v50  ;;  %v9435_v23 = vsub.f32 %v9412_v10, %v7607_v0 }
 0x751   : > { %v5255_v56 = vpop.eup %5254  ;;  %5280 = vpow2.f32 %v3265_v14  ;;  %v3273_v7 = vmul.f32 1.442695, %v9432_v11  ;;  %v3443_v44 = vpack.c.bf16 %v5253_v25, %v5249_v38  ;;  %v3174_v14 = vsub.f32 %v7573_v58, %v7607_v0 }
 0x752   : > { %v7861_v47 = vpop.eup %5256  ;;  %5282 = vpow2.f32 %v3267_v13  ;;  %v3275_v9 = vmul.f32 1.442695, %v9433_v45  ;;  %v3444_v28 = vpack.c.bf16 %v5255_v56, %v5251_v5  ;;  %v3277_v49 = vmul.f32 1.442695, %v9434_v18 }
 0x753   : > { %v7866_v1 = vpop.eup %5258  ;;  %5284 = vpow2.f32 %v3269_v40  ;;  %v3358_v39 = vadd.f32 %v5251_v5, %v3357_v19  ;;  %v3279_v13 = vmul.f32 1.442695, %v9435_v23  ;;  %v3322_v38 = vadd.f32 %v5253_v25, %v3321_v3 }
 0x754   : > { %v7873_v11 = vpop.eup %5260  ;;  %5286 = vpow2.f32 %v3271_v35  ;;  %3461 = vmatprep.subr.bf16.mxu1 %v3444_v28  ;;  %v3442_v50 = vpack.c.bf16 %v5247_v42, %v5243_v22  ;;  %v9436_v58 = vsub.f32 %v9414_v37, %v7603_v34  ;;  %v9437_v25 = vsub.f32 %v9416_v17, %v7607_v0 }
 0x755   : > { %v7878_v45 = vpop.eup %5262  ;;  %5288 = vpow2.f32 %v3273_v7  ;;  %v3359_v27 = vadd.f32 %v5255_v56, %v3358_v39  ;;  %3462 = vmatpush1.bf16.msra.mxu1 %v3443_v44  ;;  %v3445_v5 = vpack.c.bf16 %v7873_v11, %v7861_v47  ;;  %v3323_v42 = vadd.f32 %v7861_v47, %v3322_v38  ;;  %v9468_v47 = vld [vmem:[#allocation25_spill] sm:$0xff] }
 0x756   : > { %v3281_v40 = vmul.f32 1.442695, %v9436_v58  ;;  %v7885_v35 = vpop.eup %5264  ;;  %5290 = vpow2.f32 %v3275_v9  ;;  %v3283_v3 = vmul.f32 1.442695, %v9437_v25  ;;  %3463 = vmatprep.subr.bf16.mxu1 %v3442_v50  ;;  %v3446_v7 = vpack.c.bf16 %v7878_v45, %v7866_v1 }
 0x757   : > { %v7893_v10 = vpop.eup %5266  ;;  %5292 = vpow2.f32 %v3277_v49  ;;  %v9438_v56 = vsub.f32 %v9418_v15, %v7603_v34  ;;  %v3360_v22 = vadd.f32 %v7866_v1, %v3359_v27  ;;  %v3441_v9 = vpack.c.bf16 %v7827_v20, %v7813_v43  ;;  %v9440_v15 = vld [vmem:[#allocation20_spill] sm:$0xff]  ;;  %v9464_v1 = vld [vmem:[#allocation31_spill] sm:$0xff] }
 0x758   : > { %v7901_v17 = vpop.eup %5268  ;;  %5294 = vpow2.f32 %v3279_v13  ;;  %v9439_v19 = vsub.f32 %v9420_v24, %v7607_v0  ;;  %v3324_v28 = vadd.f32 %v7873_v11, %v3323_v42  ;;  %v3440_v18 = vpack.c.bf16 %v7805_v2, %v7789_v60 }
 0x759   : > { %v3285_v37 = vmul.f32 1.442695, %v9438_v56  ;;  %v7909_v49 = vpop.eup %5270  ;;  %v3175_v39 = vsub.f32 %v9440_v15, %v7603_v34  ;;  %5296 = vpow2.f32 %v3281_v40  ;;  %v9441_v20 = vsub.f32 %v9422_v21, %v7603_v34  ;;  %3464 = vmatpush1.bf16.msra.mxu1 %v3441_v9 }
 0x75a   : > { %v3287_v44 = vmul.f32 1.442695, %v9439_v19  ;;  %v3361_v23 = vadd.f32 %v7878_v45, %v3360_v22  ;;  %v7917_v24 = vpop.eup %5272  ;;  %v3176_v13 = vsub.f32 %v7585_v57, %v7607_v0  ;;  %5298 = vpow2.f32 %v3283_v3  ;;  %3465 = vmatprep.subr.bf16.mxu1 %v3440_v18  ;;  %v9465_v45 = vld [vmem:[#allocation29_spill] sm:$0xff] }
 0x75b   : > { %v3289_v43 = vmul.f32 1.442695, %v9441_v20  ;;  %v9442_v60 = vsub.f32 %v9424_v33, %v7607_v0  ;;  %v3325_v38 = vadd.f32 %v7885_v35, %v3324_v28  ;;  %v7925_v50 = vpop.eup %5274  ;;  %5300 = vpow2.f32 %v3285_v37 }
 0x75c   : > { %v9443_v21 = vsub.f32 %v9426_v4, %v7603_v34  ;;  %v3362_v40 = vadd.f32 %v7893_v10, %v3361_v23  ;;  %v3439_v57 = vpack.c.bf16 %v7797_v41, %v7781_v12  ;;  %v7933_v27 = vpop.eup %5276  ;;  %5302 = vpow2.f32 %v3287_v44 }
 0x75d   : > { %v3291_v2 = vmul.f32 1.442695, %v9442_v60  ;;  %v9444_v33 = vsub.f32 %v9428_v53, %v7607_v0  ;;  %v3326_v3 = vadd.f32 %v7901_v17, %v3325_v38  ;;  %v3438_v42 = vpack.c.bf16 %v7773_v30, %v7757_v29  ;;  %v7941_v56 = vpop.eup %5278 }
 0x75e   : > { %v3293_v58 = vmul.f32 1.442695, %v9443_v21  ;;  %5304 = vpow2.f32 %v3289_v43  ;;  %v9445_v4 = vsub.f32 %v9430_v26, %v7603_v34  ;;  %v3363_v12 = vadd.f32 %v7909_v49, %v3362_v40  ;;  %3466 = vmatpush1.bf16.msra.mxu1 %v3439_v57  ;;  %v7947_v41 = vpop.eup %5280 }
 0x75f   : > { %v3295_v25 = vmul.f32 1.442695, %v9444_v33  ;;  %5306 = vpow2.f32 %v3291_v2  ;;  %v3299_v0 = vmul.f32 1.442695, %v3174_v14  ;;  %v3327_v53 = vadd.f32 %v7917_v24, %v3326_v3  ;;  %3467 = vmatprep.subr.bf16.mxu1 %v3438_v42  ;;  %v7950_v22 = vpop.eup %5282 }
 0x760   : > { %v3297_v37 = vmul.f32 1.442695, %v9445_v4  ;;  %5308 = vpow2.f32 %v3293_v58  ;;  %v3301_v29 = vmul.f32 1.442695, %v3175_v39  ;;  %v3364_v30 = vadd.f32 %v7925_v50, %v3363_v12  ;;  %v7955_v26 = vpop.eup %5284 }
 0x761   : > { %v3437_v34 = vpack.c.bf16 %v7765_v6, %v7749_v59  ;;  %5310 = vpow2.f32 %v3295_v25  ;;  %v3303_v9 = vmul.f32 1.442695, %v3176_v13  ;;  %v3328_v19 = vadd.f32 %v7933_v27, %v3327_v53  ;;  %v7960_v44 = vpop.eup %5286 }
 0x762   : > { %v3436_v14 = vpack.c.bf16 %v7744_v52, %v7734_v31  ;;  %5312 = vpow2.f32 %v3297_v37  ;;  %v3365_v28 = vadd.f32 %v7941_v56, %v3364_v30  ;;  %v7963_v18 = vpop.eup %5288  ;;  %v3435_v31 = vpack.c.bf16 %v7739_v61, %v7729_v48 }
 0x763   : > { %3468 = vmatpush1.bf16.msra.mxu1 %v3437_v34  ;;  %5314 = vpow2.f32 %v3299_v0  ;;  %v3329_v6 = vadd.f32 %v7947_v41, %v3328_v19  ;;  %v7966_v59 = vpop.eup %5290  ;;  %v3434_v20 = vpack.c.bf16 %v7724_v32, %v7714_v51  ;;  %v3433_v61 = vpack.c.bf16 %v7719_v55, %v7709_v63 }
 0x764   : > { %3469 = vmatprep.subr.bf16.mxu1 %v3436_v14  ;;  %5316 = vpow2.f32 %v3301_v29  ;;  %v3366_v15 = vadd.f32 %v7950_v22, %v3365_v28  ;;  %v7971_v52 = vpop.eup %5292  ;;  %v3432_v32 = vpack.c.bf16 %v7703_v36, %v7691_v16  ;;  %v3431_v63 = vpack.c.bf16 %v7697_v8, %v7685_v62  ;;  %v9447_v62 = vld [vmem:[#allocation21_spill] sm:$0xff]  ;;  %v9448_v8 = vld [vmem:[#allocation23_spill] sm:$0xff] }
 0x765   : > { %5318 = vpow2.f32 %v3303_v9  ;;  %v3330_v39 = vadd.f32 %v7955_v26, %v3329_v6  ;;  %v7976_v43 = vpop.eup %5294  ;;  %v9446_v53 = vpack.c.bf16 %v7679_v46, %v7667_v54  ;;  %v9449_v6 = vpack.c.bf16 %v9447_v62, %v9448_v8  ;;  %v3539_v62 = vpop.trf.xlu0 }
 0x766   : > { %v3367_v23 = vadd.f32 %v7960_v44, %v3366_v15  ;;  %v5297_v13 = vpop.eup %5296 }
 0x767   : > { %3470 = vmatpush1.bf16.msra.mxu1 %v3435_v31  ;;  %v3331_v60 = vadd.f32 %v7963_v18, %v3330_v39  ;;  %v5299_v2 = vpop.eup %5298 }
 0x768   : > { %3471 = vmatprep.subr.bf16.mxu1 %v3434_v20  ;;  %v3368_v48 = vadd.f32 %v7966_v59, %v3367_v23  ;;  %v5301_v38 = vpop.eup %5300  ;;  %v9450_v20 = vld [vmem:[#allocation35_spill] sm:$0xff]  ;;  %v9451_v23 = vld [vmem:[#allocation34_spill] sm:$0xff] }
 0x769   : > { %v3332_v21 = vadd.f32 %v7971_v52, %v3331_v60  ;;  %v5303_v51 = vpop.eup %5302  ;;  %v3455_v40 = vpack.c.bf16 %v5301_v38, %v5297_v13  ;;  %v3540_v8 = vpop.trf.xlu0 }
 0x76a   : > { %v3369_v58 = vadd.f32 %v7976_v43, %v3368_v48  ;;  %v3456_v25 = vpack.c.bf16 %v5303_v51, %v5299_v2 }
 0x76b   : > { %3472 = vmatpush1.bf16.msra.mxu1 %v3433_v61  ;;  %v5305_v57 = vpop.eup %5304  ;;  %v3333_v33 = vadd.f32 %v5297_v13, %v3332_v21  ;;  %v9452_v13 = vsub.f32 %v9450_v20, %v9451_v23 }
 0x76c   : > { %3473 = vmatprep.subr.bf16.mxu1 %v3432_v32  ;;  %v5307_v3 = vpop.eup %5306  ;;  %v3370_v42 = vadd.f32 %v5299_v2, %v3369_v58 }
 0x76d   : > { %v5309_v55 = vpop.eup %5308  ;;  %v3334_v4 = vadd.f32 %v5301_v38, %v3333_v33  ;;  %v3100_v60 = vmul.f32 1.442695, %v9452_v13  ;;  %v3555_v13 = vpop.trf.xlu1 }
 0x76e   : > { %v5311_v37 = vpop.eup %5310  ;;  %v3371_v12 = vadd.f32 %v5303_v51, %v3370_v42  ;;  %v3457_v16 = vpack.c.bf16 %v5309_v55, %v5305_v57 }
 0x76f   : > { %3474 = vmatpush1.bf16.msra.mxu1 %v3431_v63  ;;  %v5313_v36 = vpop.eup %5312  ;;  %v3335_v0 = vadd.f32 %v5305_v57, %v3334_v4  ;;  %v3458_v29 = vpack.c.bf16 %v5311_v37, %v5307_v3  ;;  %5320 = vpow2.f32 %v3100_v60  ;;  %v3454_v57 = vpack.c.bf16 %v7976_v43, %v7966_v59  ;;  %v3306_v43 = vld [vmem:[#allocation4 + $0x2] ss:$4 sm:$0x3] }
 0x770   : > { %3475 = vmatprep.subr.bf16.mxu1 %v9446_v53  ;;  %v5315_v30 = vpop.eup %5314  ;;  %v3372_v34 = vadd.f32 %v5307_v3, %v3371_v12  ;;  %v3453_v63 = vpack.c.bf16 %v7971_v52, %v7963_v18  ;;  %v3452_v4 = vpack.c.bf16 %v7960_v44, %v7950_v22  ;;  %v3451_v12 = vpack.c.bf16 %v7955_v26, %v7947_v41  ;;  %v9459_v53 = vld [vmem:[#allocation26_spill] sm:$0xff] }
 0x771   : > { %v5317_v9 = vpop.eup %5316  ;;  %v3336_v19 = vadd.f32 %v5309_v55, %v3335_v0  ;;  %v3449_v44 = vpack.c.bf16 %v7933_v27, %v7917_v24  ;;  %v3448_v41 = vpack.c.bf16 %v7909_v49, %v7893_v10  ;;  %v9456_v0 = vld [vmem:[#allocation32_spill] sm:$0xff]  ;;  %v9457_v10 = vld [vmem:[#allocation43_spill] sm:$0xff]  ;;  %v9458_v49 = vld [vmem:[#allocation45_spill] sm:$0xff]  ;;  %v3556_v60 = vpop.trf.xlu1 }
 0x772   : > { %v5319_v14 = vpop.eup %5318  ;;  %v3373_v28 = vadd.f32 %v5311_v37, %v3372_v34  ;;  %v3459_v15 = vpack.c.bf16 %v5317_v9, %v5313_v36  ;;  %v1075_v27 = vpack.c.bf16 %v9458_v49, %v9457_v10 }
 0x773   : > { %3476 = vmatpush1.bf16.msra.mxu1 %v9449_v6  ;;  %v3337_v31 = vadd.f32 %v5313_v36, %v3336_v19  ;;  %v3460_v39 = vpack.c.bf16 %v5319_v14, %v5315_v30  ;;  %v9471_v19 = vld [vmem:[#allocation42_spill] sm:$0xff]  ;;  %v3541_v6 = vpop.trf.xlu0 }
 0x774   : > { %v3374_v54 = vadd.f32 %v5315_v30, %v3373_v28  ;;  %v9473_v28 = vmov 0  }
 0x775   : > { %v3338_v46 = vadd.f32 %v5317_v9, %v3337_v31  ;;  %3477 = vmatprep.subr.bf16.mxu1 %v3460_v39  ;;  %v9467_v9 = vld [vmem:[#allocation27_spill] sm:$0xff] }
 0x776   : > { %v3375_v2 = vadd.f32 %v5319_v14, %v3374_v54  ;;  %v9469_v11 = vpack.c.bf16 %v9467_v9, %v9468_v47  ;;  %v3557_v54 = vpop.trf.xlu1 }
 0x777   : > { %3478 = vmatpush2.bf16.msra.mxu1 %v3459_v15  ;;  %v3339_v48 = vrot.slane %v3338_v46, 4  ;;  %v3542_v15 = vpop.trf.xlu0 }
 0x778   : > { %3479 = vmatprep.subr.bf16.mxu1 %v3458_v29  ;;  %v3376_v61 = vrot.slane %v3375_v2, 4  ;;  %v9460_v29 = vld [vmem:[#allocation28_spill] sm:$0xff] }
 0x779   : > { %v3340_v38 = vadd.f32 %v3339_v48, %v3338_v46  ;;  %v1125_v30 = vpack.c.bf16 %v9460_v29, %v9459_v53 }
 0x77a   : > { %v3377_v21 = vadd.f32 %v3376_v61, %v3375_v2  ;;  %v3558_v46 = vpop.trf.xlu1 }
 0x77b   : > { %3480 = vmatpush2.bf16.msra.mxu1 %v3457_v16  ;;  %v3341_v32 = vrot.slane %v3340_v38, 2  ;;  %v9453_v16 = vld [vmem:[#allocation57_spill] sm:$0xff]  ;;  %v3543_v31 = vpop.trf.xlu0 }
 0x77c   : > { %3481 = vmatprep.subr.bf16.mxu1 %v3456_v25  ;;  %v3378_v51 = vrot.slane %v3377_v21, 2  ;;  %v8006_v59 = vpop.eup %5320 }
 0x77d   : > { %v3342_v58 = vadd.f32 %v3341_v32, %v3340_v38  ;;  %v3307_v18 = vmul.f32 %v8006_v59, %v3306_v43  ;;  %v9474_v32 = vld [vmem:[#allocation63_spill] sm:$0xff] }
 0x77e   : > { %v3379_v33 = vadd.f32 %v3378_v51, %v3377_v21  ;;  %v3559_v2 = vpop.trf.xlu1  ;;  %v3414_v51 = vrot.slane %v8006_v59, %v9474_v32 }
 0x77f   : > { %3482 = vmatpush2.bf16.msra.mxu1 %v3455_v40  ;;  %v3343_v3 = vrot.slane %v3342_v58, 1  ;;  %v3450_v40 = vpack.c.bf16 %v7941_v56, %v7925_v50  ;;  %v3447_v50 = vpack.c.bf16 %v7901_v17, %v7885_v35  ;;  %v9455_v56 = vld [vmem:[#allocation30_spill] sm:$0xff]  ;;  %v9461_v35 = vld [vmem:[#allocation41_spill] sm:$0xff]  ;;  %v9462_v17 = vld [vmem:[#allocation40_spill] sm:$0xff]  ;;  %v3544_v39 = vpop.trf.xlu0 }
 0x780   : > { %3483 = vmatprep.subr.bf16.mxu1 %v3454_v57  ;;  %v3380_v42 = vrot.slane %v3379_v33, 1  ;;  %v1127_v24 = vpack.c.bf16 %v9456_v0, %v9455_v56  ;;  %v9463_v34 = vpack.c.bf16 %v9461_v35, %v9462_v17 }
 0x781   : > { %v3344_v55 = vadd.f32 %v3343_v3, %v3342_v58  ;;  %v9475_v58 = vld [vmem:[#allocation64_spill] sm:$0xff] }
 0x782   : > { %v3381_v37 = vadd.f32 %v3380_v42, %v3379_v33  ;;  %v3560_v48 = vpop.trf.xlu1  ;;  %v3418_v57 = vrot.slane %v8006_v59, %v9475_v58  ;;  %v3421_v33 = vmul.f32 0.0, %v3414_v51 }
 0x783   : > { %3484 = vmatpush2.bf16.msra.mxu1 %v3453_v63  ;;  %v3545_v20 = vpop.trf.xlu0 }
 0x784   : > { %3485 = vmatprep.subr.bf16.mxu1 %v3452_v4  ;;  %v3384_v25 = vcombine.low %v3344_v55, %v3381_v37  ;;  %v3422_v63 = vmul.f32 0.0, %v3418_v57 }
 0x786   : > { %v3391_v36 = vrot.slane %v3384_v25, %v9453_v16  ;;  %v3561_v61 = vpop.trf.xlu1 }
 0x787   : > { %3486 = vmatpush2.bf16.msra.mxu1 %v3451_v12  ;;  %v3546_v23 = vpop.trf.xlu0 }
 0x788   : > { %3487 = vmatprep.subr.bf16.mxu1 %v3450_v40  ;;  %v3398_v22 = vrot.slane %v3391_v36, %v9453_v16 }
 0x78a   : > { %v3400_v26 = vadd.f32 %v3398_v22, %v3307_v18  ;;  %v3562_v38 = vpop.trf.xlu1 }
 0x78b   : > { %3488 = vmatpush2.bf16.msra.mxu1 %v3449_v44 }
 0x78c   : > { %3489 = vmatprep.subr.bf16.mxu1 %v3448_v41  ;;  %3401 = vst.msk [vmem:[#allocation4 + $0x2] ss:$4 sm:$0x3] %vm6084_vm3, %v3400_v26 }
 0x78f   : > { %3490 = vmatpush2.bf16.msra.mxu1 %v3447_v50 }
 0x790   : > { %3491 = vmatprep.subr.bf16.mxu1 %v3446_v7  ;;  %v9466_v7 = vpack.c.bf16 %v9464_v1, %v9465_v45 }
 0x793   : > { %3492 = vmatpush2.bf16.msra.mxu1 %v3445_v5  ;;  %v9470_v5 = vld [vmem:[#allocation44_spill] sm:$0xff] }
 0x794   : > { %3623 = vmatprep.subr.bf16.mxu1 %v1127_v24  ;;  %v9472_v14 = vpack.c.bf16 %v9470_v5, %v9471_v19  ;;  %v4418_v21 = vld [vmem:[#allocation4 + $0x2] ss:$4 sm:$0x3] }
 0x795   : > { %5322 = vrcp.f32 %v4418_v21 }
 0x796   : > { %3494 = vmatmul.mubr.bf16.vlgmr.msra.gmra.mxu1 %v9463_v34 }
 0x797   : > { %3503 = vmatprep.mubr.bf16.mxu1 %v1075_v27  ;;  %3624 = vmatpush1.bf16.msra.mxu1 %v9466_v7 }
 0x798   : > { %3625 = vmatprep.subr.bf16.mxu1 %v1125_v30 }
 0x79b   : > { %3626 = vmatpush1.bf16.msra.mxu1 %v9469_v11 }
 0x79e   : > { %3504 = vmatmul.mubr.bf16.gmra.mxu1 %v9472_v14 }
 0x79f   : > { %3643 = vmatprep.mubr.bf16.mxu1 %v9473_v28 }
 0x7a2   : > { %v5323_v55 = vpop.eup %5322 }
 0x7a3   : > { %v4425_v12 = vrot.slane %v5323_v55, %v9474_v32  ;;  %v4429_v18 = vrot.slane %v5323_v55, %v9475_v58 }
 0x7a6   : > { %4810 = vmatmul.mubr.msk.bf16.vlgmr.msra.gmra.mxu1 %vm1160_vm2, %v3539_v62 }
 0x7a7   : > { %3653 = vmatprep.mubr.bf16.mxu1 %v9473_v28 }
 0x7ae   : > { %4811 = vmatmul.mubr.msk.bf16.gmra.mxu1 %vm1160_vm2, %v3540_v8 }
 0x7af   : > { %3663 = vmatprep.mubr.bf16.mxu1 %v9473_v28 }
 0x7b6   : > { %4812 = vmatmul.mubr.msk.bf16.gmra.mxu1 %vm1160_vm2, %v3541_v6 }
 0x7b7   : > { %3673 = vmatprep.mubr.bf16.mxu1 %v9473_v28 }
 0x7be   : > { %4813 = vmatmul.mubr.msk.bf16.gmra.mxu1 %vm1160_vm2, %v3542_v15 }
 0x7bf   : > { %3683 = vmatprep.mubr.bf16.mxu1 %v9473_v28 }
 0x7c6   : > { %4814 = vmatmul.mubr.msk.bf16.gmra.mxu1 %vm1160_vm2, %v3543_v31 }
 0x7c7   : > { %3693 = vmatprep.mubr.bf16.mxu1 %v9473_v28 }
 0x7ce   : > { %4815 = vmatmul.mubr.msk.bf16.gmra.mxu1 %vm1160_vm2, %v3544_v39 }
 0x7cf   : > { %3703 = vmatprep.mubr.bf16.mxu1 %v9473_v28 }
 0x7d6   : > { %4816 = vmatmul.mubr.msk.bf16.gmra.mxu1 %vm1160_vm2, %v3545_v20 }
 0x7d7   : > { %3713 = vmatprep.mubr.bf16.mxu1 %v9473_v28 }
 0x7de   : > { %4817 = vmatmul.mubr.msk.bf16.gmra.mxu1 %vm1160_vm2, %v3546_v23 }
 0x7df   : > { %3723 = vmatprep.mubr.bf16.mxu1 %v9473_v28 }
 0x7e6   : > { %4818 = vmatmul.mubr.msk.bf16.gmra.mxu1 %vm1160_vm2, %v3555_v13 }
 0x7e7   : > { %3733 = vmatprep.mubr.bf16.mxu1 %v9473_v28 }
 0x7ee   : > { %4819 = vmatmul.mubr.msk.bf16.gmra.mxu1 %vm1160_vm2, %v3556_v60 }
 0x7ef   : > { %3743 = vmatprep.mubr.bf16.mxu1 %v9473_v28 }
 0x7f6   : > { %4820 = vmatmul.mubr.msk.bf16.gmra.mxu1 %vm1160_vm2, %v3557_v54 }
 0x7f7   : > { %3753 = vmatprep.mubr.bf16.mxu1 %v9473_v28 }
 0x7fe   : > { %4821 = vmatmul.mubr.msk.bf16.gmra.mxu1 %vm1160_vm2, %v3558_v46 }
 0x7ff   : > { %3763 = vmatprep.mubr.bf16.mxu1 %v9473_v28 }
 0x806   : > { %4822 = vmatmul.mubr.msk.bf16.gmra.mxu1 %vm1160_vm2, %v3559_v2 }
 0x807   : > { %3773 = vmatprep.mubr.bf16.mxu1 %v9473_v28 }
 0x80e   : > { %4823 = vmatmul.mubr.msk.bf16.gmra.mxu1 %vm1160_vm2, %v3560_v48 }
 0x80f   : > { %3783 = vmatprep.mubr.bf16.mxu1 %v9473_v28 }
 0x816   : > { %4824 = vmatmul.mubr.msk.bf16.gmra.mxu1 %vm1160_vm2, %v3561_v61 }
 0x817   : > { %3793 = vmatprep.mubr.bf16.mxu1 %v9473_v28 }
 0x81e   : > { %4825 = vmatmul.mubr.msk.bf16.gmra.mxu1 %vm1160_vm2, %v3562_v38 }
 0x856   : > { %v3495_v3 = vpop.f32.mrf.mxu1 }
 0x857   : > { %v3514_v42 = vadd.f32 %v3495_v3, %v3421_v33 }
 0x858   : > { %v3497_v4 = vpop.f32.mrf.mxu1 }
 0x859   : > { %v3515_v37 = vadd.f32 %v3497_v4, %v3422_v63  ;;  %v8082_v36 = vmul.f32 %v4425_v12, %v3514_v42 }
 0x85a   : > { %v3499_v25 = vpop.f32.mrf.mxu1 }
 0x85b   : > { %v3516_v43 = vadd.f32 %v3499_v25, %v3421_v33  ;;  %9476 = vst [vmem:[#allocation19_spill] sm:$0xff] %v8082_v36  ;;  %v8087_v41 = vmul.f32 %v4429_v18, %v3515_v37 }
 0x85c   : > { %v3501_v40 = vpop.f32.mrf.mxu1 }
 0x85d   : > { %v8085_v22 = vmul.f32 %v4425_v12, %v3516_v43  ;;  %v3517_v44 = vadd.f32 %v3501_v40, %v3422_v63  ;;  %9478 = vst [vmem:[#allocation38_spill] sm:$0xff] %v8087_v41 }
 0x85e   : > { %v3505_v59 = vpop.f32.mrf.mxu1 }
 0x85f   : > { %9477 = vst [vmem:[#allocation17_spill] sm:$0xff] %v8085_v22  ;;  %v8091_v50 = vmul.f32 %v4429_v18, %v3517_v44  ;;  %v3518_v56 = vadd.f32 %v3505_v59, %v3421_v33 }
 0x860   : > { %v3507_v0 = vpop.f32.mrf.mxu1 }
 0x861   : > { %9479 = vst [vmem:[#allocation36_spill] sm:$0xff] %v8091_v50  ;;  %v3519_v24 = vadd.f32 %v3507_v0, %v3422_v63  ;;  %v8095_v29 = vmul.f32 %v4425_v12, %v3518_v56 }
 0x862   : > { %v3509_v49 = vpop.f32.mrf.mxu1 }
 0x863   : > { %v3520_v27 = vadd.f32 %v3509_v49, %v3421_v33  ;;  %9480 = vst [vmem:[#allocation47_spill] sm:$0xff] %v8095_v29  ;;  %v8101_v34 = vmul.f32 %v4429_v18, %v3519_v24 }
 0x864   : > { %v3511_v53 = vpop.f32.mrf.mxu1 }
 0x865   : > { %v8097_v30 = vmul.f32 %v4425_v12, %v3520_v27  ;;  %v3521_v35 = vadd.f32 %v3511_v53, %v3422_v63  ;;  %9482 = vst [vmem:[#allocation67_spill] sm:$0xff] %v8101_v34 }
 0x866   : > { %v8099_v17 = vpop.f32.mrf.mxu1 }
 0x867   : > { %9481 = vst [vmem:[#allocation49_spill] sm:$0xff] %v8097_v30  ;;  %v8105_v45 = vmul.f32 %v4429_v18, %v3521_v35 }
 0x868   : > { %v8107_v7 = vpop.f32.mrf.mxu1 }
 0x869   : > { %9483 = vst [vmem:[#allocation68_spill] sm:$0xff] %v8105_v45 }
 0x86a   : > { %v8111_v47 = vpop.f32.mrf.mxu1 }
 0x86c   : > { %v8113_v11 = vpop.f32.mrf.mxu1 }
 0x86e   : > { %v8115_v5 = vpop.f32.mrf.mxu1 }
 0x86f   : > { %9484 = vst [vmem:[#allocation69_spill] sm:$0xff] %v8115_v5  ;;  %v3806_v1 = vmax.f32 %v8099_v17, %v8115_v5 }
 0x870   : > { %v8117_v19 = vpop.f32.mrf.mxu1 }
 0x871   : > { %9485 = vst [vmem:[#allocation70_spill] sm:$0xff] %v8117_v19  ;;  %v3843_v22 = vmax.f32 %v8107_v7, %v8117_v19 }
 0x872   : > { %v8119_v14 = vpop.f32.mrf.mxu1 }
 0x873   : > { %9486 = vst [vmem:[#allocation71_spill] sm:$0xff] %v8119_v14  ;;  %v3807_v9 = vmax.f32 %v8111_v47, %v8119_v14 }
 0x874   : > { %v8121_v62 = vpop.f32.mrf.mxu1 }
 0x875   : > { %9487 = vst [vmem:[#allocation72_spill] sm:$0xff] %v8121_v62  ;;  %v3844_v41 = vmax.f32 %v8113_v11, %v8121_v62 }
 0x876   : > { %v8123_v8 = vpop.f32.mrf.mxu1 }
 0x877   : > { %v3808_v50 = vmax.f32 %v3806_v1, %v8123_v8 }
 0x878   : > { %v8125_v6 = vpop.f32.mrf.mxu1 }
 0x879   : > { %v3845_v34 = vmax.f32 %v3843_v22, %v8125_v6 }
 0x87a   : > { %v8127_v15 = vpop.f32.mrf.mxu1 }
 0x87b   : > { %9488 = vst [vmem:[#allocation73_spill] sm:$0xff] %v8127_v15  ;;  %v3809_v29 = vmax.f32 %v3807_v9, %v8127_v15 }
 0x87c   : > { %v8129_v31 = vpop.f32.mrf.mxu1 }
 0x87d   : > { %v3846_v45 = vmax.f32 %v3844_v41, %v8129_v31 }
 0x87e   : > { %v8131_v39 = vpop.f32.mrf.mxu1 }
 0x87f   : > { %v3810_v28 = vmax.f32 %v3808_v50, %v8131_v39 }
 0x880   : > { %v8133_v20 = vpop.f32.mrf.mxu1 }
 0x881   : > { %v3847_v19 = vmax.f32 %v3845_v34, %v8133_v20 }
 0x882   : > { %v8135_v23 = vpop.f32.mrf.mxu1 }
 0x883   : > { %9489 = vst [vmem:[#allocation74_spill] sm:$0xff] %v8135_v23  ;;  %v3811_v14 = vmax.f32 %v3809_v29, %v8135_v23 }
 0x884   : > { %v8137_v13 = vpop.f32.mrf.mxu1 }
 0x885   : > { %v3848_v62 = vmax.f32 %v3846_v45, %v8137_v13 }
 0x886   : > { %v8139_v60 = vpop.f32.mrf.mxu1 }
 0x887   : > { %v3812_v1 = vmax.f32 %v3810_v28, %v8139_v60 }
 0x888   : > { %v8141_v54 = vpop.f32.mrf.mxu1 }
 0x889   : > { %v3849_v22 = vmax.f32 %v3847_v19, %v8141_v54 }
 0x88a   : > { %v8143_v46 = vpop.f32.mrf.mxu1 }
 0x88b   : > { %9490 = vst [vmem:[#allocation75_spill] sm:$0xff] %v8143_v46  ;;  %v3813_v9 = vmax.f32 %v3811_v14, %v8143_v46 }
 0x88c   : > { %v8145_v2 = vpop.f32.mrf.mxu1 }
 0x88d   : > { %v3850_v41 = vmax.f32 %v3848_v62, %v8145_v2 }
 0x88e   : > { %v8147_v48 = vpop.f32.mrf.mxu1 }
 0x88f   : > { %v3814_v50 = vmax.f32 %v3812_v1, %v8147_v48 }
 0x890   : > { %v8149_v61 = vpop.f32.mrf.mxu1 }
 0x891   : > { %v3851_v34 = vmax.f32 %v3849_v22, %v8149_v61 }
 0x892   : > { %v8151_v38 = vpop.f32.mrf.mxu1 }
 0x893   : > { %9491 = vst [vmem:[#allocation76_spill] sm:$0xff] %v8151_v38  ;;  %v3815_v29 = vmax.f32 %v3813_v9, %v8151_v38 }
 0x894   : > { %v8153_v21 = vpop.f32.mrf.mxu1 }
 0x895   : > { %v3852_v45 = vmax.f32 %v3850_v41, %v8153_v21 }
 0x896   : > { %v8155_v51 = vpop.f32.mrf.mxu1 }
 0x897   : > { %v3816_v28 = vmax.f32 %v3814_v50, %v8155_v51 }
 0x898   : > { %v8157_v57 = vpop.f32.mrf.mxu1 }
 0x899   : > { %v3853_v19 = vmax.f32 %v3851_v34, %v8157_v57 }
 0x89a   : > { %v8159_v33 = vpop.f32.mrf.mxu1 }
 0x89b   : > { %9492 = vst [vmem:[#allocation77_spill] sm:$0xff] %v8159_v33  ;;  %v3817_v14 = vmax.f32 %v3815_v29, %v8159_v33 }
 0x89c   : > { %v8161_v3 = vpop.f32.mrf.mxu1 }
 0x89d   : > { %v3854_v62 = vmax.f32 %v3852_v45, %v8161_v3 }
 0x89e   : > { %v8163_v42 = vpop.f32.mrf.mxu1 }
 0x89f   : > { %v3818_v1 = vmax.f32 %v3816_v28, %v8163_v42 }
 0x8a0   : > { %v8165_v63 = vpop.f32.mrf.mxu1 }
 0x8a1   : > { %v3855_v22 = vmax.f32 %v3853_v19, %v8165_v63 }
 0x8a2   : > { %v8167_v55 = vpop.f32.mrf.mxu1 }
 0x8a3   : > { %9493 = vst [vmem:[#allocation78_spill] sm:$0xff] %v8167_v55  ;;  %v3819_v9 = vmax.f32 %v3817_v14, %v8167_v55 }
 0x8a4   : > { %v8169_v4 = vpop.f32.mrf.mxu1 }
 0x8a5   : > { %v3856_v41 = vmax.f32 %v3854_v62, %v8169_v4 }
 0x8a6   : > { %v8171_v37 = vpop.f32.mrf.mxu1 }
 0x8a7   : > { %v3820_v50 = vmax.f32 %v3818_v1, %v8171_v37 }
 0x8a8   : > { %v8173_v25 = vpop.f32.mrf.mxu1 }
 0x8a9   : > { %v3857_v34 = vmax.f32 %v3855_v22, %v8173_v25 }
 0x8aa   : > { %v8175_v12 = vpop.f32.mrf.mxu1 }
 0x8ab   : > { %9494 = vst [vmem:[#allocation79_spill] sm:$0xff] %v8175_v12  ;;  %v3821_v29 = vmax.f32 %v3819_v9, %v8175_v12 }
 0x8ac   : > { %v8177_v43 = vpop.f32.mrf.mxu1 }
 0x8ad   : > { %v3858_v45 = vmax.f32 %v3856_v41, %v8177_v43 }
 0x8ae   : > { %v8179_v40 = vpop.f32.mrf.mxu1 }
 0x8af   : > { %v3822_v28 = vmax.f32 %v3820_v50, %v8179_v40 }
 0x8b0   : > { %v8181_v18 = vpop.f32.mrf.mxu1 }
 0x8b1   : > { %v3859_v19 = vmax.f32 %v3857_v34, %v8181_v18 }
 0x8b2   : > { %v8183_v44 = vpop.f32.mrf.mxu1 }
 0x8b3   : > { %9495 = vst [vmem:[#allocation80_spill] sm:$0xff] %v8183_v44  ;;  %v3823_v14 = vmax.f32 %v3821_v29, %v8183_v44 }
 0x8b4   : > { %v8185_v59 = vpop.f32.mrf.mxu1 }
 0x8b5   : > { %v3860_v62 = vmax.f32 %v3858_v45, %v8185_v59 }
 0x8b6   : > { %v8187_v56 = vpop.f32.mrf.mxu1 }
 0x8b7   : > { %v3824_v1 = vmax.f32 %v3822_v28, %v8187_v56 }
 0x8b8   : > { %v8189_v0 = vpop.f32.mrf.mxu1 }
 0x8b9   : > { %v3861_v22 = vmax.f32 %v3859_v19, %v8189_v0 }
 0x8ba   : > { %v8191_v24 = vpop.f32.mrf.mxu1 }
 0x8bb   : > { %9496 = vst [vmem:[#allocation81_spill] sm:$0xff] %v8191_v24  ;;  %v3825_v9 = vmax.f32 %v3823_v14, %v8191_v24 }
 0x8bc   : > { %v8193_v49 = vpop.f32.mrf.mxu1 }
 0x8bd   : > { %v3862_v41 = vmax.f32 %v3860_v62, %v8193_v49 }
 0x8be   : > { %v8195_v27 = vpop.f32.mrf.mxu1 }
 0x8bf   : > { %v3826_v50 = vmax.f32 %v3824_v1, %v8195_v27 }
 0x8c0   : > { %v8197_v53 = vpop.f32.mrf.mxu1 }
 0x8c1   : > { %v3863_v34 = vmax.f32 %v3861_v22, %v8197_v53 }
 0x8c2   : > { %v8199_v35 = vpop.f32.mrf.mxu1 }
 0x8c3   : > { %9497 = vst [vmem:[#allocation82_spill] sm:$0xff] %v8199_v35  ;;  %v3827_v29 = vmax.f32 %v3825_v9, %v8199_v35 }
 0x8c4   : > { %v8201_v26 = vpop.f32.mrf.mxu1 }
 0x8c5   : > { %v3864_v45 = vmax.f32 %v3862_v41, %v8201_v26 }
 0x8c6   : > { %v8203_v10 = vpop.f32.mrf.mxu1 }
 0x8c7   : > { %v3828_v28 = vmax.f32 %v3826_v50, %v8203_v10 }
 0x8c8   : > { %v8209_v36 = vpop.f32.mrf.mxu1 }
 0x8c9   : > { %v3865_v19 = vmax.f32 %v3863_v34, %v8209_v36 }
 0x8ca   : > { %v8217_v30 = vpop.f32.mrf.mxu1 }
 0x8cb   : > { %9498 = vst [vmem:[#allocation61_spill] sm:$0xff] %v8217_v30  ;;  %v3829_v14 = vmax.f32 %v3827_v29, %v8217_v30 }
 0x8cc   : > { %v8223_v5 = vpop.f32.mrf.mxu1 }
 0x8cd   : > { %9499 = vst [vmem:[#allocation58_spill] sm:$0xff] %v8223_v5  ;;  %v3866_v62 = vmax.f32 %v3864_v45, %v8223_v5 }
 0x8ce   : > { %v8229_v15 = vpop.f32.mrf.mxu1 }
 0x8cf   : > { %9500 = vst [vmem:[#allocation83_spill] sm:$0xff] %v8229_v15  ;;  %v3830_v1 = vmax.f32 %v3828_v28, %v8229_v15 }
 0x8d0   : > { %v8235_v23 = vpop.f32.mrf.mxu1 }
 0x8d1   : > { %9501 = vst [vmem:[#allocation84_spill] sm:$0xff] %v8235_v23  ;;  %v3867_v22 = vmax.f32 %v3865_v19, %v8235_v23 }
 0x8d2   : > { %v8241_v46 = vpop.f32.mrf.mxu1 }
 0x8d3   : > { %9502 = vst [vmem:[#allocation22_spill] sm:$0xff] %v8241_v46  ;;  %v3831_v9 = vmax.f32 %v3829_v14, %v8241_v46 }
 0x8d4   : > { %v8247_v38 = vpop.f32.mrf.mxu1 }
 0x8d5   : > { %9503 = vst [vmem:[#allocation24_spill] sm:$0xff] %v8247_v38  ;;  %v3868_v41 = vmax.f32 %v3866_v62, %v8247_v38 }
 0x8d6   : > { %v8253_v33 = vpop.f32.mrf.mxu1 }
 0x8d7   : > { %9504 = vst [vmem:[#allocation37_spill] sm:$0xff] %v8253_v33  ;;  %v3832_v50 = vmax.f32 %v3830_v1, %v8253_v33 }
 0x8d8   : > { %v8259_v55 = vpop.f32.mrf.mxu1 }
 0x8d9   : > { %9505 = vst [vmem:[#allocation39_spill] sm:$0xff] %v8259_v55  ;;  %v3869_v34 = vmax.f32 %v3867_v22, %v8259_v55 }
 0x8da   : > { %v8265_v12 = vpop.f32.mrf.mxu1 }
 0x8db   : > { %9506 = vst [vmem:[#allocation18_spill] sm:$0xff] %v8265_v12  ;;  %v3833_v29 = vmax.f32 %v3831_v9, %v8265_v12 }
 0x8dc   : > { %v8271_v44 = vpop.f32.mrf.mxu1 }
 0x8dd   : > { %9507 = vst [vmem:[#allocation20_spill] sm:$0xff] %v8271_v44  ;;  %v3870_v45 = vmax.f32 %v3868_v41, %v8271_v44 }
 0x8de   : > { %v8277_v24 = vpop.f32.mrf.mxu1 }
 0x8df   : > { %9508 = vst [vmem:[#allocation21_spill] sm:$0xff] %v8277_v24  ;;  %v3834_v28 = vmax.f32 %v3832_v50, %v8277_v24 }
 0x8e0   : > { %v8283_v35 = vpop.f32.mrf.mxu1 }
 0x8e1   : > { %v3871_v19 = vmax.f32 %v3869_v34, %v8283_v35  ;;  %v8300_v34 = vld [vmem:[#allocation3 + $0x3] ss:$4 sm:$0x3] }
 0x8e2   : > { %v8289_v30 = vpop.f32.mrf.mxu1  ;;  %9510 = vst [vmem:[#allocation35_spill] sm:$0xff] %v8300_v34 }
 0x8e3   : > { %9509 = vst [vmem:[#allocation23_spill] sm:$0xff] %v8289_v30  ;;  %v3835_v14 = vmax.f32 %v3833_v29, %v8289_v30 }
 0x8e4   : > { %v8295_v46 = vpop.f32.mrf.mxu1 }
 0x8e5   : > { %v3836_v23 = vmax.f32 %v3834_v28, %v3835_v14  ;;  %v3872_v62 = vmax.f32 %v3870_v45, %v8295_v46 }
 0x8e7   : > { %v3837_v1 = vrot.slane %v3836_v23, 4  ;;  %v3873_v33 = vmax.f32 %v3871_v19, %v3872_v62  ;;  %v9514_v19 = vld [vmem:[#allocation71_spill] sm:$0xff] }
 0x8e9   : > { %v3838_v9 = vmax.f32 %v3836_v23, %v3837_v1  ;;  %v3874_v12 = vrot.slane %v3873_v33, 4 }
 0x8eb   : > { %v3839_v38 = vrot.slane %v3838_v9, 2  ;;  %v3875_v15 = vmax.f32 %v3873_v33, %v3874_v12  ;;  %v9512_v12 = vld [vmem:[#allocation69_spill] sm:$0xff] }
 0x8ed   : > { %v3840_v22 = vmax.f32 %v3838_v9, %v3839_v38  ;;  %v3876_v55 = vrot.slane %v3875_v15, 2  ;;  %v9515_v9 = vld [vmem:[#allocation72_spill] sm:$0xff] }
 0x8ef   : > { %v3841_v41 = vrot.slane %v3840_v22, 1  ;;  %v3877_v44 = vmax.f32 %v3875_v15, %v3876_v55 }
 0x8f1   : > { %v3878_v50 = vrot.slane %v3877_v44, 1  ;;  %v3842_v24 = vmax.f32 %v3840_v22, %v3841_v41 }
 0x8f3   : > { %v3879_v29 = vmax.f32 %v3877_v44, %v3878_v50 }
 0x8f5   : > { %v3882_v30 = vcombine.low %v3842_v24, %v3879_v29  ;;  %v9513_v24 = vld [vmem:[#allocation70_spill] sm:$0xff] }
 0x8f7   : > { %v3889_v5 = vrot.slane %v3882_v30, %v9453_v16 }
 0x8f9   : > { %v3896_v45 = vrot.slane %v3889_v5, %v9453_v16 }
 0x8fb   : > { %v8304_v28 = vmax.f32 %v8300_v34, %v3896_v45  ;;  %v9516_v45 = vld [vmem:[#allocation73_spill] sm:$0xff] }
 0x8fd   : > { %9511 = vst [vmem:[#allocation34_spill] sm:$0xff] %v8304_v28  ;;  %4330 = vst.msk [vmem:[#allocation3 + $0x3] ss:$4 sm:$0x3] %vm6084_vm3, %v8304_v28  ;;  %v8313_v15 = vrot.slane %v8304_v28, %v9474_v32  ;;  %v8317_v30 = vrot.slane %v8304_v28, %v9475_v58 }
 0x8ff   : > { %v3913_v5 = vsub.f32 %v8099_v17, %v8313_v15  ;;  %v3914_v38 = vsub.f32 %v8107_v7, %v8317_v30  ;;  %v3915_v33 = vsub.f32 %v8111_v47, %v8313_v15  ;;  %v3916_v55 = vsub.f32 %v8113_v11, %v8317_v30 }
 0x900   : > { %v3917_v44 = vsub.f32 %v9512_v12, %v8313_v15  ;;  %v3918_v14 = vsub.f32 %v9513_v24, %v8317_v30  ;;  %v3919_v62 = vsub.f32 %v9514_v19, %v8313_v15  ;;  %v3920_v7 = vsub.f32 %v9515_v9, %v8317_v30  ;;  %v9517_v24 = vld [vmem:[#allocation74_spill] sm:$0xff] }
 0x901   : > { %v3977_v1 = vmul.f32 1.442695, %v3913_v5  ;;  %v3979_v17 = vmul.f32 1.442695, %v3914_v38  ;;  %v3981_v22 = vmul.f32 1.442695, %v3915_v33  ;;  %v3921_v47 = vsub.f32 %v8123_v8, %v8313_v15 }
 0x902   : > { %v3983_v41 = vmul.f32 1.442695, %v3916_v55  ;;  %v3985_v11 = vmul.f32 1.442695, %v3917_v44  ;;  %v3922_v50 = vsub.f32 %v8125_v6, %v8317_v30  ;;  %v3987_v29 = vmul.f32 1.442695, %v3918_v14 }
 0x903   : > { %5324 = vpow2.f32 %v3977_v1  ;;  %v3923_v12 = vsub.f32 %v9516_v45, %v8313_v15  ;;  %v3989_v5 = vmul.f32 1.442695, %v3919_v62  ;;  %v3924_v38 = vsub.f32 %v8129_v31, %v8317_v30 }
 0x904   : > { %5326 = vpow2.f32 %v3979_v17  ;;  %v3991_v33 = vmul.f32 1.442695, %v3920_v7  ;;  %v3925_v8 = vsub.f32 %v8131_v39, %v8313_v15  ;;  %v3993_v55 = vmul.f32 1.442695, %v3921_v47  ;;  %v9518_v17 = vld [vmem:[#allocation75_spill] sm:$0xff] }
 0x905   : > { %5328 = vpow2.f32 %v3981_v22  ;;  %v3926_v6 = vsub.f32 %v8133_v20, %v8317_v30  ;;  %v3995_v44 = vmul.f32 1.442695, %v3922_v50  ;;  %v3927_v14 = vsub.f32 %v9517_v24, %v8313_v15 }
 0x906   : > { %5330 = vpow2.f32 %v3983_v41  ;;  %v3997_v19 = vmul.f32 1.442695, %v3923_v12  ;;  %v3928_v31 = vsub.f32 %v8137_v13, %v8317_v30  ;;  %v3999_v62 = vmul.f32 1.442695, %v3924_v38 }
 0x907   : > { %5332 = vpow2.f32 %v3985_v11  ;;  %v3929_v39 = vsub.f32 %v8139_v60, %v8313_v15  ;;  %v3930_v1 = vsub.f32 %v8141_v54, %v8317_v30  ;;  %v4001_v20 = vmul.f32 1.442695, %v3925_v8  ;;  %v9519_v54 = vld [vmem:[#allocation76_spill] sm:$0xff] }
 0x908   : > { %5334 = vpow2.f32 %v3987_v29  ;;  %v3931_v9 = vsub.f32 %v9518_v17, %v8313_v15  ;;  %v3932_v7 = vsub.f32 %v8145_v2, %v8317_v30  ;;  %v4003_v22 = vmul.f32 1.442695, %v3926_v6 }
 0x909   : > { %5336 = vpow2.f32 %v3989_v5  ;;  %v3933_v13 = vsub.f32 %v8147_v48, %v8313_v15  ;;  %v3934_v41 = vsub.f32 %v8149_v61, %v8317_v30  ;;  %v4005_v60 = vmul.f32 1.442695, %v3927_v14  ;;  %v9521_v61 = vld [vmem:[#allocation77_spill] sm:$0xff] }
 0x90a   : > { %5338 = vpow2.f32 %v3991_v33  ;;  %v3935_v47 = vsub.f32 %v9519_v54, %v8313_v15  ;;  %v3936_v11 = vsub.f32 %v8153_v21, %v8317_v30  ;;  %v4007_v50 = vmul.f32 1.442695, %v3928_v31  ;;  %v9524_v31 = vld [vmem:[#allocation79_spill] sm:$0xff] }
 0x90b   : > { %5340 = vpow2.f32 %v3993_v55  ;;  %v3937_v2 = vsub.f32 %v8155_v51, %v8313_v15  ;;  %v3938_v29 = vsub.f32 %v8157_v57, %v8317_v30  ;;  %v4009_v48 = vmul.f32 1.442695, %v3929_v39  ;;  %v9523_v55 = vld [vmem:[#allocation78_spill] sm:$0xff] }
 0x90c   : > { %5342 = vpow2.f32 %v3995_v44  ;;  %v3939_v12 = vsub.f32 %v9521_v61, %v8313_v15  ;;  %v3940_v5 = vsub.f32 %v8161_v3, %v8317_v30  ;;  %v4011_v21 = vmul.f32 1.442695, %v3930_v1 }
 0x90d   : > { %5344 = vpow2.f32 %v3997_v19  ;;  %v3941_v51 = vsub.f32 %v8163_v42, %v8313_v15  ;;  %v3942_v57 = vsub.f32 %v8165_v63, %v8317_v30  ;;  %v4013_v33 = vmul.f32 1.442695, %v3931_v9 }
 0x90e   : > { %5346 = vpow2.f32 %v3999_v62  ;;  %v3943_v6 = vsub.f32 %v9523_v55, %v8313_v15  ;;  %v3944_v3 = vsub.f32 %v8169_v4, %v8317_v30  ;;  %v4015_v44 = vmul.f32 1.442695, %v3932_v7  ;;  %v9525_v7 = vld [vmem:[#allocation80_spill] sm:$0xff] }
 0x90f   : > { %5348 = vpow2.f32 %v4001_v20  ;;  %v3945_v42 = vsub.f32 %v8171_v37, %v8313_v15  ;;  %v3946_v63 = vsub.f32 %v8173_v25, %v8317_v30  ;;  %v4017_v14 = vmul.f32 1.442695, %v3933_v13 }
 0x910   : > { %v8371_v45 = vpop.eup %5324  ;;  %5350 = vpow2.f32 %v4003_v22  ;;  %v3947_v62 = vsub.f32 %v9524_v31, %v8313_v15  ;;  %v3948_v4 = vsub.f32 %v8177_v43, %v8317_v30  ;;  %v4019_v39 = vmul.f32 1.442695, %v3934_v41 }
 0x911   : > { %9520 = vst [vmem:[#allocation30_spill] sm:$0xff] %v8371_v45  ;;  %v8377_v38 = vpop.eup %5326  ;;  %5352 = vpow2.f32 %v4005_v60  ;;  %v3949_v37 = vsub.f32 %v8179_v40, %v8313_v15  ;;  %v3950_v20 = vsub.f32 %v8181_v18, %v8317_v30  ;;  %v4021_v17 = vmul.f32 1.442695, %v3935_v47 }
 0x912   : > { %v8383_v8 = vpop.eup %5328  ;;  %5354 = vpow2.f32 %v4007_v50  ;;  %v4023_v13 = vmul.f32 1.442695, %v3936_v11  ;;  %v4025_v54 = vmul.f32 1.442695, %v3937_v2  ;;  %v4027_v61 = vmul.f32 1.442695, %v3938_v29 }
 0x913   : > { %9522 = vst [vmem:[#allocation32_spill] sm:$0xff] %v8383_v8  ;;  %v8389_v24 = vpop.eup %5330  ;;  %5356 = vpow2.f32 %v4009_v48  ;;  %v4108_v41 = vadd.f32 %v8383_v8, %v8371_v45  ;;  %v4029_v55 = vmul.f32 1.442695, %v3939_v12  ;;  %v4031_v29 = vmul.f32 1.442695, %v3940_v5 }
 0x914   : > { %v8395_v19 = vpop.eup %5332  ;;  %5358 = vpow2.f32 %v4011_v21  ;;  %v4145_v50 = vadd.f32 %v8389_v24, %v8377_v38  ;;  %v4033_v47 = vmul.f32 1.442695, %v3941_v51  ;;  %v4037_v11 = vmul.f32 1.442695, %v3943_v6 }
 0x915   : > { %v8401_v1 = vpop.eup %5334  ;;  %5360 = vpow2.f32 %v4013_v33  ;;  %v4109_v21 = vadd.f32 %v8395_v19, %v4108_v41  ;;  %v4039_v2 = vmul.f32 1.442695, %v3944_v3  ;;  %v4043_v3 = vmul.f32 1.442695, %v3946_v63 }
 0x916   : > { %v8407_v9 = vpop.eup %5336  ;;  %5362 = vpow2.f32 %v4015_v44  ;;  %v4146_v44 = vadd.f32 %v8401_v1, %v4145_v50  ;;  %v9526_v50 = vld [vmem:[#allocation81_spill] sm:$0xff]  ;;  %v4047_v63 = vmul.f32 1.442695, %v3948_v4  ;;  %v4051_v4 = vmul.f32 1.442695, %v3950_v20 }
 0x917   : > { %v8413_v60 = vpop.eup %5338  ;;  %5364 = vpow2.f32 %v4017_v14  ;;  %v4110_v41 = vadd.f32 %v8407_v9, %v4109_v21  ;;  %v4041_v21 = vmul.f32 1.442695, %v3945_v42  ;;  %v4045_v42 = vmul.f32 1.442695, %v3947_v62 }
 0x918   : > { %v8419_v48 = vpop.eup %5340  ;;  %5366 = vpow2.f32 %v4019_v39  ;;  %v4147_v12 = vadd.f32 %v8413_v60, %v4146_v44  ;;  %v4035_v39 = vmul.f32 1.442695, %v3942_v57  ;;  %v4049_v62 = vmul.f32 1.442695, %v3949_v37 }
 0x919   : > { %v8424_v33 = vpop.eup %5342  ;;  %5368 = vpow2.f32 %v4021_v17  ;;  %v4111_v5 = vadd.f32 %v8419_v48, %v4110_v41  ;;  %v9530_v37 = vsub.f32 %v9525_v7, %v8313_v15  ;;  %v9532_v20 = vsub.f32 %v8185_v59, %v8317_v30  ;;  %v9547_v59 = vld [vmem:[#allocation21_spill] sm:$0xff] }
 0x91a   : > { %v8429_v14 = vpop.eup %5344  ;;  %5370 = vpow2.f32 %v4023_v13  ;;  %v4148_v51 = vadd.f32 %v8424_v33, %v4147_v12  ;;  %v9527_v12 = vld [vmem:[#allocation82_spill] sm:$0xff] }
 0x91b   : > { %v8434_v23 = vpop.eup %5346  ;;  %5372 = vpow2.f32 %v4025_v54  ;;  %v4112_v57 = vadd.f32 %v8429_v14, %v4111_v5 }
 0x91c   : > { %v8439_v17 = vpop.eup %5348  ;;  %5374 = vpow2.f32 %v4027_v61  ;;  %v4149_v6 = vadd.f32 %v8434_v23, %v4148_v51 }
 0x91d   : > { %v8444_v13 = vpop.eup %5350  ;;  %5376 = vpow2.f32 %v4029_v55 }
 0x91e   : > { %v8449_v54 = vpop.eup %5352  ;;  %5378 = vpow2.f32 %v4031_v29  ;;  %v4113_v29 = vadd.f32 %v8439_v17, %v4112_v57  ;;  %v4150_v51 = vadd.f32 %v8444_v13, %v4149_v6 }
 0x91f   : > { %v8454_v61 = vpop.eup %5354  ;;  %5380 = vpow2.f32 %v4033_v47 }
 0x920   : > { %v8459_v55 = vpop.eup %5356  ;;  %5382 = vpow2.f32 %v4035_v39  ;;  %v4114_v39 = vadd.f32 %v8449_v54, %v4113_v29 }
 0x921   : > { %v8467_v5 = vpop.eup %5358  ;;  %5384 = vpow2.f32 %v4037_v11  ;;  %v4151_v11 = vadd.f32 %v8454_v61, %v4150_v51  ;;  %v4053_v51 = vmul.f32 1.442695, %v9530_v37 }
 0x922   : > { %v8475_v22 = vpop.eup %5360  ;;  %5386 = vpow2.f32 %v4039_v2  ;;  %v9528_v2 = vld [vmem:[#allocation61_spill] sm:$0xff]  ;;  %v4115_v29 = vadd.f32 %v8459_v55, %v4114_v39  ;;  %v4055_v39 = vmul.f32 1.442695, %v9532_v20 }
 0x923   : > { %v8483_v57 = vpop.eup %5362  ;;  %5388 = vpow2.f32 %v4041_v21  ;;  %v9529_v21 = vld [vmem:[#allocation58_spill] sm:$0xff]  ;;  %v4152_v25 = vadd.f32 %v8467_v5, %v4151_v11  ;;  %v9534_v11 = vsub.f32 %v8187_v56, %v8313_v15  ;;  %v9538_v56 = vsub.f32 %v9526_v50, %v8313_v15 }
 0x924   : > { %v8491_v6 = vpop.eup %5364  ;;  %5390 = vpow2.f32 %v4043_v3  ;;  %v9531_v3 = vld [vmem:[#allocation83_spill] sm:$0xff]  ;;  %v4116_v47 = vadd.f32 %v8475_v22, %v4115_v29  ;;  %v9536_v29 = vsub.f32 %v8189_v0, %v8317_v30  ;;  %v9540_v0 = vsub.f32 %v8193_v49, %v8317_v30 }
 0x925   : > { %v8499_v31 = vpop.eup %5366  ;;  %5392 = vpow2.f32 %v4045_v42  ;;  %v9533_v42 = vld [vmem:[#allocation84_spill] sm:$0xff]  ;;  %v4057_v37 = vmul.f32 1.442695, %v9534_v11  ;;  %v4153_v41 = vadd.f32 %v8483_v57, %v4152_v25  ;;  %v4061_v25 = vmul.f32 1.442695, %v9538_v56 }
 0x926   : > { %v8507_v43 = vpop.eup %5368  ;;  %5394 = vpow2.f32 %v4047_v63  ;;  %v9535_v63 = vld [vmem:[#allocation22_spill] sm:$0xff]  ;;  %v4059_v20 = vmul.f32 1.442695, %v9536_v29  ;;  %v4117_v44 = vadd.f32 %v8491_v6, %v4116_v47  ;;  %v4063_v47 = vmul.f32 1.442695, %v9540_v0 }
 0x927   : > { %v8515_v40 = vpop.eup %5370  ;;  %5396 = vpow2.f32 %v4049_v62  ;;  %v9537_v62 = vld [vmem:[#allocation24_spill] sm:$0xff]  ;;  %v4154_v11 = vadd.f32 %v8499_v31, %v4153_v41  ;;  %v9542_v50 = vsub.f32 %v8195_v27, %v8313_v15  ;;  %v9544_v49 = vsub.f32 %v8197_v53, %v8317_v30 }
 0x928   : > { %v8523_v18 = vpop.eup %5372  ;;  %5398 = vpow2.f32 %v4051_v4  ;;  %v9539_v4 = vld [vmem:[#allocation37_spill] sm:$0xff]  ;;  %v4118_v29 = vadd.f32 %v8507_v43, %v4117_v44  ;;  %v9546_v27 = vsub.f32 %v9527_v12, %v8313_v15  ;;  %v9548_v53 = vsub.f32 %v8201_v26, %v8317_v30 }
 0x929   : > { %v5375_v7 = vpop.eup %5374  ;;  %5400 = vpow2.f32 %v4053_v51  ;;  %v9541_v51 = vld [vmem:[#allocation39_spill] sm:$0xff]  ;;  %v4065_v41 = vmul.f32 1.442695, %v9542_v50  ;;  %v4155_v56 = vadd.f32 %v8515_v40, %v4154_v11  ;;  %v4067_v44 = vmul.f32 1.442695, %v9544_v49 }
 0x92a   : > { %v8537_v32 = vpop.eup %5376  ;;  %5402 = vpow2.f32 %v4055_v39  ;;  %v9543_v39 = vld [vmem:[#allocation18_spill] sm:$0xff]  ;;  %v4119_v0 = vadd.f32 %v8523_v18, %v4118_v29  ;;  %v4069_v11 = vmul.f32 1.442695, %v9546_v27  ;;  %v4071_v49 = vmul.f32 1.442695, %v9548_v53 }
 0x92b   : > { %v5379_v58 = vpop.eup %5378  ;;  %5404 = vpow2.f32 %v4057_v37  ;;  %v9545_v37 = vld [vmem:[#allocation20_spill] sm:$0xff]  ;;  %v4156_v50 = vadd.f32 %v5375_v7, %v4155_v56 }
 0x92c   : > { %v5381_v16 = vpop.eup %5380  ;;  %5406 = vpow2.f32 %v4059_v20  ;;  %v4120_v29 = vadd.f32 %v8537_v32, %v4119_v0 }
 0x92d   : > { %v5383_v28 = vpop.eup %5382  ;;  %5408 = vpow2.f32 %v4061_v25  ;;  %v9549_v25 = vsub.f32 %v8203_v10, %v8313_v15  ;;  %v4157_v12 = vadd.f32 %v5379_v58, %v4156_v50  ;;  %v9551_v10 = vsub.f32 %v9528_v2, %v8313_v15 }
 0x92e   : > { %v5385_v34 = vpop.eup %5384  ;;  %5410 = vpow2.f32 %v4063_v47  ;;  %v9550_v47 = vsub.f32 %v8209_v36, %v8317_v30  ;;  %v4121_v8 = vadd.f32 %v5381_v16, %v4120_v29  ;;  %v9552_v36 = vsub.f32 %v9529_v21, %v8317_v30 }
 0x92f   : > { %v5387_v45 = vpop.eup %5386  ;;  %5412 = vpow2.f32 %v4065_v41  ;;  %v4073_v52 = vmul.f32 1.442695, %v9549_v25  ;;  %v4243_v27 = vpack.c.bf16 %v5385_v34, %v5381_v16  ;;  %v3974_v41 = vsub.f32 %v8283_v35, %v8317_v30 }
 0x930   : > { %v8571_v56 = vpop.eup %5388  ;;  %5414 = vpow2.f32 %v4067_v44  ;;  %v4075_v20 = vmul.f32 1.442695, %v9550_v47  ;;  %v4244_v26 = vpack.c.bf16 %v5387_v45, %v5383_v28  ;;  %v4077_v0 = vmul.f32 1.442695, %v9551_v10 }
 0x931   : > { %v8576_v53 = vpop.eup %5390  ;;  %5416 = vpow2.f32 %v4069_v11  ;;  %v4158_v50 = vadd.f32 %v5383_v28, %v4157_v12  ;;  %v4079_v44 = vmul.f32 1.442695, %v9552_v36  ;;  %v4122_v16 = vadd.f32 %v5385_v34, %v4121_v8 }
 0x932   : > { %v8583_v25 = vpop.eup %5392  ;;  %5418 = vpow2.f32 %v4071_v49  ;;  %4261 = vmatprep.subr.bf16.mxu0 %v4244_v26  ;;  %v4242_v29 = vpack.c.bf16 %v5379_v58, %v5375_v7  ;;  %v9553_v35 = vsub.f32 %v9531_v3, %v8313_v15  ;;  %v9554_v34 = vsub.f32 %v9533_v42, %v8317_v30 }
 0x933   : > { %v8588_v47 = vpop.eup %5394  ;;  %5420 = vpow2.f32 %v4073_v52  ;;  %v4159_v2 = vadd.f32 %v5387_v45, %v4158_v50  ;;  %4262 = vmatpush1.bf16.msra.mxu0 %v4243_v27  ;;  %v4245_v28 = vpack.c.bf16 %v8583_v25, %v8571_v56  ;;  %v4123_v58 = vadd.f32 %v8571_v56, %v4122_v16 }
 0x934   : > { %v4081_v11 = vmul.f32 1.442695, %v9553_v35  ;;  %v8595_v49 = vpop.eup %5396  ;;  %5422 = vpow2.f32 %v4075_v20  ;;  %v4083_v8 = vmul.f32 1.442695, %v9554_v34  ;;  %4263 = vmatprep.subr.bf16.mxu0 %v4242_v29  ;;  %v4246_v52 = vpack.c.bf16 %v8588_v47, %v8576_v53 }
 0x935   : > { %v8603_v21 = vpop.eup %5398  ;;  %5424 = vpow2.f32 %v4077_v0  ;;  %v9555_v45 = vsub.f32 %v9535_v63, %v8313_v15  ;;  %v4160_v7 = vadd.f32 %v8576_v53, %v4159_v2  ;;  %v4241_v20 = vpack.c.bf16 %v8537_v32, %v8523_v18  ;;  %v9557_v63 = vld [vmem:[#allocation23_spill] sm:$0xff] }
 0x936   : > { %v8611_v42 = vpop.eup %5400  ;;  %5426 = vpow2.f32 %v4079_v44  ;;  %v9556_v12 = vsub.f32 %v9537_v62, %v8317_v30  ;;  %v4124_v26 = vadd.f32 %v8583_v25, %v4123_v58  ;;  %v4240_v10 = vpack.c.bf16 %v8515_v40, %v8499_v31 }
 0x937   : > { %v4085_v3 = vmul.f32 1.442695, %v9555_v45  ;;  %v8619_v0 = vpop.eup %5402  ;;  %v3975_v50 = vsub.f32 %v9557_v63, %v8313_v15  ;;  %5428 = vpow2.f32 %v4081_v11  ;;  %v9558_v32 = vsub.f32 %v9539_v4, %v8313_v15  ;;  %4264 = vmatpush1.bf16.msra.mxu0 %v4241_v20 }
 0x938   : > { %v4087_v27 = vmul.f32 1.442695, %v9556_v12  ;;  %v4161_v36 = vadd.f32 %v8588_v47, %v4160_v7  ;;  %v8627_v62 = vpop.eup %5404  ;;  %v3976_v44 = vsub.f32 %v8295_v46, %v8317_v30  ;;  %5430 = vpow2.f32 %v4083_v8  ;;  %4265 = vmatprep.subr.bf16.mxu0 %v4240_v10 }
 0x939   : > { %v4089_v18 = vmul.f32 1.442695, %v9558_v32  ;;  %v9559_v31 = vsub.f32 %v9541_v51, %v8317_v30  ;;  %v4125_v16 = vadd.f32 %v8595_v49, %v4124_v26  ;;  %v8635_v29 = vpop.eup %5406  ;;  %5432 = vpow2.f32 %v4085_v3 }
 0x93a   : > { %v9560_v4 = vsub.f32 %v9543_v39, %v8313_v15  ;;  %v4162_v11 = vadd.f32 %v8603_v21, %v4161_v36  ;;  %v4239_v46 = vpack.c.bf16 %v8507_v43, %v8491_v6  ;;  %v8643_v2 = vpop.eup %5408  ;;  %5434 = vpow2.f32 %v4087_v27 }
 0x93b   : > { %v4091_v40 = vmul.f32 1.442695, %v9559_v31  ;;  %v9561_v51 = vsub.f32 %v9545_v37, %v8317_v30  ;;  %v4126_v8 = vadd.f32 %v8611_v42, %v4125_v16  ;;  %v4238_v58 = vpack.c.bf16 %v8483_v57, %v8467_v5  ;;  %v8651_v45 = vpop.eup %5410 }
 0x93c   : > { %v4093_v35 = vmul.f32 1.442695, %v9560_v4  ;;  %5436 = vpow2.f32 %v4089_v18  ;;  %v9562_v39 = vsub.f32 %v9547_v59, %v8313_v15  ;;  %v4163_v6 = vadd.f32 %v8619_v0, %v4162_v11  ;;  %4266 = vmatpush1.bf16.msra.mxu0 %v4239_v46  ;;  %v8657_v43 = vpop.eup %5412 }
 0x93d   : > { %v4095_v34 = vmul.f32 1.442695, %v9561_v51  ;;  %5438 = vpow2.f32 %v4091_v40  ;;  %v4099_v30 = vmul.f32 1.442695, %v3974_v41  ;;  %v4127_v37 = vadd.f32 %v8627_v62, %v4126_v8  ;;  %4267 = vmatprep.subr.bf16.mxu0 %v4238_v58  ;;  %v8660_v7 = vpop.eup %5414 }
 0x93e   : > { %v4097_v3 = vmul.f32 1.442695, %v9562_v39  ;;  %5440 = vpow2.f32 %v4093_v35  ;;  %v4101_v5 = vmul.f32 1.442695, %v3975_v50  ;;  %v4164_v57 = vadd.f32 %v8635_v29, %v4163_v6  ;;  %v8665_v59 = vpop.eup %5416 }
 0x93f   : > { %v4237_v15 = vpack.c.bf16 %v8475_v22, %v8459_v55  ;;  %5442 = vpow2.f32 %v4095_v34  ;;  %v4103_v20 = vmul.f32 1.442695, %v3976_v44  ;;  %v4128_v12 = vadd.f32 %v8643_v2, %v4127_v37  ;;  %v8670_v27 = vpop.eup %5418 }
 0x940   : > { %v4236_v41 = vpack.c.bf16 %v8454_v61, %v8444_v13  ;;  %5444 = vpow2.f32 %v4097_v3  ;;  %v4165_v26 = vadd.f32 %v8651_v45, %v4164_v57  ;;  %v8673_v10 = vpop.eup %5420  ;;  %v4235_v13 = vpack.c.bf16 %v8449_v54, %v8439_v17 }
 0x941   : > { %4268 = vmatpush1.bf16.msra.mxu0 %v4237_v15  ;;  %5446 = vpow2.f32 %v4099_v30  ;;  %v4129_v22 = vadd.f32 %v8657_v43, %v4128_v12  ;;  %v8676_v55 = vpop.eup %5422  ;;  %v4234_v32 = vpack.c.bf16 %v8434_v23, %v8424_v33  ;;  %v4233_v54 = vpack.c.bf16 %v8429_v14, %v8419_v48 }
 0x942   : > { %4269 = vmatprep.subr.bf16.mxu0 %v4236_v41  ;;  %5448 = vpow2.f32 %v4101_v5  ;;  %v4166_v63 = vadd.f32 %v8660_v7, %v4165_v26  ;;  %v8681_v61 = vpop.eup %5424  ;;  %v4232_v23 = vpack.c.bf16 %v8413_v60, %v8401_v1  ;;  %v4231_v48 = vpack.c.bf16 %v8407_v9, %v8395_v19  ;;  %v9564_v19 = vld [vmem:[#allocation32_spill] sm:$0xff]  ;;  %v9565_v9 = vld [vmem:[#allocation30_spill] sm:$0xff] }
 0x943   : > { %5450 = vpow2.f32 %v4103_v20  ;;  %v4130_v50 = vadd.f32 %v8665_v59, %v4129_v22  ;;  %v8686_v18 = vpop.eup %5426  ;;  %v9563_v37 = vpack.c.bf16 %v8389_v24, %v8377_v38  ;;  %v9566_v22 = vpack.c.bf16 %v9564_v19, %v9565_v9 }
 0x944   : > { %v4167_v36 = vadd.f32 %v8670_v27, %v4166_v63  ;;  %v5429_v44 = vpop.eup %5428 }
 0x945   : > { %4270 = vmatpush1.bf16.msra.mxu0 %v4235_v13  ;;  %v4131_v31 = vadd.f32 %v8673_v10, %v4130_v50  ;;  %v5431_v40 = vpop.eup %5430 }
 0x946   : > { %4271 = vmatprep.subr.bf16.mxu0 %v4234_v32  ;;  %v4168_v17 = vadd.f32 %v8676_v55, %v4167_v36  ;;  %v5433_v16 = vpop.eup %5432  ;;  %v9567_v32 = vld [vmem:[#allocation35_spill] sm:$0xff]  ;;  %v9568_v36 = vld [vmem:[#allocation34_spill] sm:$0xff] }
 0x947   : > { %v4132_v4 = vadd.f32 %v8681_v61, %v4131_v31  ;;  %v5435_v33 = vpop.eup %5434  ;;  %v4255_v11 = vpack.c.bf16 %v5433_v16, %v5429_v44 }
 0x948   : > { %v4169_v35 = vadd.f32 %v8686_v18, %v4168_v17  ;;  %v4256_v34 = vpack.c.bf16 %v5435_v33, %v5431_v40 }
 0x949   : > { %4272 = vmatpush1.bf16.msra.mxu0 %v4233_v54  ;;  %v5437_v46 = vpop.eup %5436  ;;  %v4133_v51 = vadd.f32 %v5429_v44, %v4132_v4  ;;  %v9569_v44 = vsub.f32 %v9567_v32, %v9568_v36 }
 0x94a   : > { %4273 = vmatprep.subr.bf16.mxu0 %v4232_v23  ;;  %v5439_v8 = vpop.eup %5438  ;;  %v4170_v58 = vadd.f32 %v5431_v40, %v4169_v35 }
 0x94b   : > { %v5441_v14 = vpop.eup %5440  ;;  %v4134_v39 = vadd.f32 %v5433_v16, %v4133_v51  ;;  %v3900_v31 = vmul.f32 1.442695, %v9569_v44 }
 0x94c   : > { %v5443_v3 = vpop.eup %5442  ;;  %v4171_v6 = vadd.f32 %v5435_v33, %v4170_v58  ;;  %v4257_v1 = vpack.c.bf16 %v5441_v14, %v5437_v46 }
 0x94d   : > { %4274 = vmatpush1.bf16.msra.mxu0 %v4231_v48  ;;  %v5445_v60 = vpop.eup %5444  ;;  %v4135_v30 = vadd.f32 %v5437_v46, %v4134_v39  ;;  %v4258_v5 = vpack.c.bf16 %v5443_v3, %v5439_v8  ;;  %5452 = vpow2.f32 %v3900_v31  ;;  %v4254_v46 = vpack.c.bf16 %v8686_v18, %v8676_v55  ;;  %v4106_v18 = vld [vmem:[#allocation4 + $0x3] ss:$4 sm:$0x3] }
 0x94e   : > { %4275 = vmatprep.subr.bf16.mxu0 %v9563_v37  ;;  %v5447_v57 = vpop.eup %5446  ;;  %v4172_v15 = vadd.f32 %v5439_v8, %v4171_v6  ;;  %v4253_v48 = vpack.c.bf16 %v8681_v61, %v8673_v10  ;;  %v4252_v39 = vpack.c.bf16 %v8670_v27, %v8660_v7  ;;  %v4251_v6 = vpack.c.bf16 %v8665_v59, %v8657_v43  ;;  %v9577_v37 = vld [vmem:[#allocation52_spill] sm:$0xff] }
 0x94f   : > { %v5449_v20 = vpop.eup %5448  ;;  %v4136_v12 = vadd.f32 %v5441_v14, %v4135_v30  ;;  %v4249_v7 = vpack.c.bf16 %v8643_v2, %v8627_v62  ;;  %v4248_v27 = vpack.c.bf16 %v8619_v0, %v8603_v21  ;;  %v9572_v62 = vld [vmem:[#allocation51_spill] sm:$0xff]  ;;  %v9573_v21 = vld [vmem:[#allocation53_spill] sm:$0xff]  ;;  %v9574_v2 = vld [vmem:[#allocation48_spill] sm:$0xff] }
 0x950   : > { %v5451_v41 = vpop.eup %5450  ;;  %v4173_v26 = vadd.f32 %v5443_v3, %v4172_v15  ;;  %v4259_v63 = vpack.c.bf16 %v5449_v20, %v5445_v60  ;;  %v1079_v0 = vpack.c.bf16 %v9573_v21, %v9572_v62  ;;  %v9582_v15 = vld [vmem:[#allocation64_spill] sm:$0xff]  ;;  %v9599_v62 = vld [vmem:[#allocation15_spill] sm:$0xff] }
 0x951   : > { %4276 = vmatpush1.bf16.msra.mxu0 %v9566_v22  ;;  %v4137_v13 = vadd.f32 %v5445_v60, %v4136_v12  ;;  %v4260_v50 = vpack.c.bf16 %v5451_v41, %v5447_v57 }
 0x952   : > { %v4174_v38 = vadd.f32 %v5447_v57, %v4173_v26 }
 0x953   : > { %v4138_v24 = vadd.f32 %v5449_v20, %v4137_v13  ;;  %4277 = vmatprep.subr.bf16.mxu0 %v4260_v50 }
 0x954   : > { %v4175_v40 = vadd.f32 %v5451_v41, %v4174_v38 }
 0x955   : > { %4278 = vmatpush2.bf16.msra.mxu0 %v4259_v63  ;;  %v4139_v17 = vrot.slane %v4138_v24, 4 }
 0x956   : > { %4279 = vmatprep.subr.bf16.mxu0 %v4258_v5  ;;  %v4176_v54 = vrot.slane %v4175_v40, 4  ;;  %v9578_v5 = vld [vmem:[#allocation50_spill] sm:$0xff] }
 0x957   : > { %v4140_v16 = vadd.f32 %v4139_v17, %v4138_v24 }
 0x958   : > { %v4177_v4 = vadd.f32 %v4176_v54, %v4175_v40 }
 0x959   : > { %4280 = vmatpush2.bf16.msra.mxu0 %v4257_v1  ;;  %v4141_v23 = vrot.slane %v4140_v16, 2  ;;  %v9570_v1 = vld [vmem:[#allocation57_spill] sm:$0xff] }
 0x95a   : > { %4281 = vmatprep.subr.bf16.mxu0 %v4256_v34  ;;  %v4178_v33 = vrot.slane %v4177_v4, 2  ;;  %v5453_v55 = vpop.eup %5452 }
 0x95b   : > { %v4142_v35 = vadd.f32 %v4141_v23, %v4140_v16  ;;  %v4107_v10 = vmul.f32 %v5453_v55, %v4106_v18  ;;  %v4218_v20 = vrot.slane %v5453_v55, %v9582_v15 }
 0x95c   : > { %v4179_v51 = vadd.f32 %v4178_v33, %v4177_v4 }
 0x95d   : > { %4282 = vmatpush2.bf16.msra.mxu0 %v4255_v11  ;;  %v4143_v8 = vrot.slane %v4142_v35, 1  ;;  %v4250_v11 = vpack.c.bf16 %v8651_v45, %v8635_v29  ;;  %v4247_v29 = vpack.c.bf16 %v8611_v42, %v8595_v49  ;;  %v9575_v45 = vld [vmem:[#allocation46_spill] sm:$0xff]  ;;  %v9579_v49 = vpack.c.bf16 %v9577_v37, %v9578_v5 }
 0x95e   : > { %4283 = vmatprep.subr.bf16.mxu0 %v4254_v46  ;;  %v4180_v58 = vrot.slane %v4179_v51, 1  ;;  %v9576_v59 = vpack.c.bf16 %v9574_v2, %v9575_v45  ;;  %v9580_v42 = vmov 0   ;;  %v4222_v9 = vmul.f32 0.0, %v4218_v20  ;;  %v9602_v2 = vld [vmem:[#allocation10_spill] sm:$0xff] }
 0x95f   : > { %v4144_v14 = vadd.f32 %v4143_v8, %v4142_v35  ;;  %v9605_v37 = vld [vmem:[#allocation14_spill] sm:$0xff] }
 0x960   : > { %v4181_v3 = vadd.f32 %v4180_v58, %v4179_v51  ;;  %v9617_v20 = vld [vmem:[#allocation54_spill] sm:$0xff] }
 0x961   : > { %4284 = vmatpush2.bf16.msra.mxu0 %v4253_v48 }
 0x962   : > { %4285 = vmatprep.subr.bf16.mxu0 %v4252_v39  ;;  %v4184_v34 = vcombine.low %v4144_v14, %v4181_v3  ;;  %v9583_v39 = vld [vmem:[#allocation68_spill] sm:$0xff]  ;;  %v9584_v3 = vld [vmem:[#allocation67_spill] sm:$0xff] }
 0x964   : > { %v4191_v60 = vrot.slane %v4184_v34, %v9570_v1  ;;  %v9585_v34 = vpack.c.bf16 %v9583_v39, %v9584_v3 }
 0x965   : > { %4286 = vmatpush2.bf16.msra.mxu0 %v4251_v6  ;;  %v9586_v6 = vld [vmem:[#allocation49_spill] sm:$0xff] }
 0x966   : > { %4287 = vmatprep.subr.bf16.mxu0 %v4250_v11  ;;  %v4198_v61 = vrot.slane %v4191_v60, %v9570_v1  ;;  %v9589_v11 = vld [vmem:[#allocation36_spill] sm:$0xff]  ;;  %v9590_v1 = vld [vmem:[#allocation38_spill] sm:$0xff] }
 0x967   : > { %v9591_v60 = vpack.c.bf16 %v9589_v11, %v9590_v1 }
 0x968   : > { %v4200_v30 = vadd.f32 %v4198_v61, %v4107_v10  ;;  %v9592_v10 = vld [vmem:[#allocation17_spill] sm:$0xff]  ;;  %v9593_v61 = vld [vmem:[#allocation19_spill] sm:$0xff] }
 0x969   : > { %4288 = vmatpush2.bf16.msra.mxu0 %v4249_v7  ;;  %v9594_v7 = vpack.c.bf16 %v9592_v10, %v9593_v61 }
 0x96a   : > { %4289 = vmatprep.subr.bf16.mxu0 %v4248_v27  ;;  %4201 = vst.msk [vmem:[#allocation4 + $0x3] ss:$4 sm:$0x3] %vm6084_vm3, %v4200_v30  ;;  %v9595_v27 = vld [vmem:[#allocation66_spill] sm:$0xff]  ;;  %v9596_v30 = vld [vmem:[#allocation65_spill] sm:$0xff] }
 0x96b   : > { %v9597_v43 = vpack.c.bf16 %v9595_v27, %v9596_v30 }
 0x96d   : > { %4290 = vmatpush2.bf16.msra.mxu0 %v4247_v29  ;;  %v9598_v29 = vld [vmem:[#allocation9_spill] sm:$0xff] }
 0x96e   : > { %4291 = vmatprep.subr.bf16.mxu0 %v4246_v52  ;;  %v9600_v21 = vpack.c.bf16 %v9598_v29, %v9599_v62 }
 0x971   : > { %4292 = vmatpush2.bf16.msra.mxu0 %v4245_v28  ;;  %v4456_v53 = vld [vmem:[#allocation4 + $0x3] ss:$4 sm:$0x3]  ;;  %v9581_v28 = vld [vmem:[#allocation63_spill] sm:$0xff] }
 0x972   : > { %5454 = vrcp.f32 %v4456_v53  ;;  %v4214_v57 = vrot.slane %v5453_v55, %v9581_v28  ;;  %v9587_v55 = vld [vmem:[#allocation47_spill] sm:$0xff] }
 0x973   : > { %v9588_v18 = vpack.c.bf16 %v9586_v6, %v9587_v55 }
 0x974   : > { %4294 = vmatmul.mubr.bf16.vlgmr.msra.gmra.mxu0 %v9576_v59  ;;  %v4221_v19 = vmul.f32 0.0, %v4214_v57  ;;  %v9604_v59 = vld [vmem:[#allocation16_spill] sm:$0xff] }
 0x975   : > { %4303 = vmatprep.mubr.bf16.mxu0 %v1079_v0  ;;  %v9601_v0 = vld [vmem:[#allocation12_spill] sm:$0xff]  ;;  %v9606_v5 = vpack.c.bf16 %v9604_v59, %v9605_v37 }
 0x976   : > { %v9603_v45 = vpack.c.bf16 %v9601_v0, %v9602_v2 }
 0x97c   : > { %4304 = vmatmul.mubr.bf16.gmra.mxu0 %v9579_v49  ;;  %v9607_v49 = vld [vmem:[#allocation13_spill] sm:$0xff] }
 0x97d   : > { %4569 = vmatprep.mubr.bf16.mxu0 %v9580_v42  ;;  %v9608_v42 = vld [vmem:[#allocation11_spill] sm:$0xff] }
 0x97e   : > { %v9609_v53 = vpack.c.bf16 %v9607_v49, %v9608_v42 }
 0x97f   : > { %v5455_v26 = vpop.eup %5454 }
 0x980   : > { %v4463_v32 = vrot.slane %v5455_v26, %v9581_v28  ;;  %v4467_v38 = vrot.slane %v5455_v26, %v9582_v15  ;;  %v9614_v28 = vld [vmem:[#allocation59_spill] sm:$0xff] }
 0x981   : > { %v9616_v15 = vld [vmem:[#allocation55_spill] sm:$0xff] }
 0x982   : > { %v4535_v26 = vld [vmem:[%s5645_s21] sm:$0xff] }
 0xa34   : > { %v4295_v47 = vpop.f32.mrf.mxu0 }
 0xa35   : > { %v4314_v23 = vadd.f32 %v4295_v47, %v4221_v19  ;;  %v9610_v47 = vld [vmem:[#allocation33_spill] sm:$0xff] }
 0xa36   : > { %v4297_v52 = vpop.f32.mrf.mxu0 }
 0xa37   : > { %v4315_v31 = vadd.f32 %v4297_v52, %v4222_v9  ;;  %v4470_v48 = vmul.f32 %v4463_v32, %v4314_v23  ;;  %v9611_v52 = vld [vmem:[#allocation56_spill] sm:$0xff] }
 0xa38   : > { %v4299_v56 = vpop.f32.mrf.mxu0 }
 0xa39   : > { %v4316_v40 = vadd.f32 %v4299_v56, %v4221_v19  ;;  %v4471_v35 = vmul.f32 %v4467_v38, %v4315_v31  ;;  %v9612_v56 = vpack.c.bf16 %v9610_v47, %v9611_v52 }
 0xa3a   : > { %v4301_v25 = vpop.f32.mrf.mxu0 }
 0xa3b   : > { %v4317_v63 = vadd.f32 %v4301_v25, %v4222_v9  ;;  %v4472_v51 = vmul.f32 %v4463_v32, %v4316_v40  ;;  %v9613_v25 = vld [vmem:[#allocation62_spill] sm:$0xff] }
 0xa3c   : > { %v4305_v12 = vpop.f32.mrf.mxu0  ;;  %v9615_v57 = vpack.c.bf16 %v9613_v25, %v9614_v28 }
 0xa3d   : > { %v4318_v36 = vadd.f32 %v4305_v12, %v4221_v19  ;;  %v4473_v54 = vmul.f32 %v4467_v38, %v4317_v63  ;;  %v4531_v14 = vpack.c.bf16 %v4472_v51, %v4470_v48  ;;  %v9618_v12 = vpack.c.bf16 %v9616_v15, %v9617_v20  ;;  %v4582_v63 = vpop.permute.xlu0 %4581 }
 0xa3e   : > { %v4307_v41 = vpop.f32.mrf.mxu0 }
 0xa3f   : > { %v4319_v13 = vadd.f32 %v4307_v41, %v4222_v9  ;;  %v4474_v33 = vmul.f32 %v4463_v32, %v4318_v36  ;;  %v4532_v58 = vpack.c.bf16 %v4473_v54, %v4471_v35  ;;  %v4486_v41 = vld [vmem:[%s8837_s4] sm:$0xf] }
 0xa40   : > { %v4309_v22 = vpop.f32.mrf.mxu0 }
 0xa41   : > { %v4320_v50 = vadd.f32 %v4309_v22, %v4221_v19  ;;  %v4475_v16 = vmul.f32 %v4467_v38, %v4319_v13 }
 0xa42   : > { %v4311_v44 = vpop.f32.mrf.mxu0 }
 0xa43   : > { %v4321_v24 = vadd.f32 %v4311_v44, %v4222_v9  ;;  %v4476_v17 = vmul.f32 %v4463_v32, %v4320_v50  ;;  %v4536_v9 = vld [vmem:[%s5645_s21 + $0x8] sm:$0xff]  ;;  %s4589_s21 = scalar_lea.sflag [#allocation7], %s327_s16 }
 0xa45   : > { %v4477_v4 = vmul.f32 %v4467_v38, %v4321_v24  ;;  %v4533_v8 = vpack.c.bf16 %v4476_v17, %v4474_v33 }
 0xa47   : > { %v4534_v46 = vpack.c.bf16 %v4477_v4, %v4475_v16 }
 0xa49   : > { %4537 = vmatprep.subr.bf16.mxu0 %v4534_v46 }
 0xa4a   : > { %4538 = vmatpush1.bf16.msra.mxu0 %v4533_v8 }
 0xa4b   : > { %4539 = vmatprep.subr.bf16.mxu0 %v4532_v58 }
 0xa4e   : > { %4540 = vmatpush1.bf16.msra.mxu0 %v4531_v14 }
 0xa4f   : > { %4541 = vmatprep.subr.bf16.mxu0 %v9585_v34 }
 0xa52   : > { %4542 = vmatpush1.bf16.msra.mxu0 %v9588_v18 }
 0xa53   : > { %4543 = vmatprep.subr.bf16.mxu0 %v9591_v60 }
 0xa56   : > { %4544 = vmatpush1.bf16.msra.mxu0 %v9594_v7 }
 0xa57   : > { %4545 = vmatprep.subr.bf16.mxu0 %v9597_v43 }
 0xa5a   : > { %4546 = vmatpush1.bf16.msra.mxu0 %v9600_v21 }
 0xa5b   : > { %4547 = vmatprep.subr.bf16.mxu0 %v9603_v45 }
 0xa5e   : > { %4548 = vmatpush1.bf16.msra.mxu0 %v9606_v5 }
 0xa5f   : > { %4549 = vmatprep.subr.bf16.mxu0 %v9609_v53 }
 0xa62   : > { %4550 = vmatpush1.bf16.msra.mxu0 %v9612_v56 }
 0xa63   : > { %4551 = vmatprep.subr.bf16.mxu0 %v9615_v57 }
 0xa66   : > { %4552 = vmatpush1.bf16.msra.mxu0 %v9618_v12 }
 0xa69   : > { %4570 = vmatmul.mubr.bf16.vlgmr.msra.gmra.mxu0 %v4486_v41 }
 0xb29   : > { %v4571_v19 = vpop.f32.mrf.mxu0 }
 0xb2a   : > { %v4572_v22 = vadd.f32 %v4571_v19, %v4535_v26 }
 0xb2b   : > { %v4573_v13 = vpop.f32.mrf.mxu0 }
 0xb2c   : > { %v4584_v50 = vadd.f32 %v4582_v63, %v4572_v22  ;;  %v4574_v32 = vadd.f32 %v4573_v13, %v4536_v9 }
 0xb2d   : > { %v4575_v36 = vpop.f32.mrf.mxu0 }
 0xb2e   : > { %4586 = vst [vmem:[%s329_s19] sm:$0xff] %v4584_v50  ;;  %v4585_v44 = vadd.f32 %v4582_v63, %v4574_v32 }
 0xb2f   : > { %v4576_v31 = vpop.f32.mrf.mxu0 }
 0xb30   : > { %4587 = vst [vmem:[%s329_s19 + $0x8] sm:$0xff] %v4585_v44 }
 0xb31   : > { %5469 = shalt.err (!%p5466_p5)
}
 0xb32   : > { %s5470_s15 = scalar_lea.hbm %s8793_s30, 256  ;;  %s5474_s18 = scalar_lea.hbm %s8840_s7, 512 }
 0xb33   : > { %p5471_p6 = scmp.ne.s32.totalorder %s8793_s30, %s5470_s15  ;;  %p5475_p10 = scmp.lt.s32.totalorder %s8793_s30, %s8840_s7 }
 0xb34   : > { %p5476_p11 = scmp.lt.s32.totalorder %s5474_s18, %s5470_s15 }
 0xb35   : > { %p5472_p7 = pnand %p5471_p6, %p5619_p4 }
 0xb36   : > { %p5477_p12 = por %p5476_p11, %p5475_p10 }
 0xb37   : > { %p5473_p9 = pneg %p5472_p7 }
 0xb39   : > { %p5478_p13 = pnand %p5477_p12, %p5473_p9 }
 0xb3b   : > { %5481 = shalt.err (!%p5478_p13)
}
 0xb3c   : > { %4836 = dma.vmem_to_hbm [thread:$0]  (%p5619_p4), %s4606_s20, 256, %s8793_s30, %s4589_s21  }
 0xb3d PF: > { %p4842_p0 = scmp.ge.s32.totalorder %s5532_s29, 2  ;;  %s4617_s23 = sand.u32 1, %s5512_s24  }
 0xb3e   : > { %s4618_s8 = scalar_lea.sflag [#allocation7], %s4617_s23 }
 0xb3f   : > { %p4839_p1 = pnand %p4842_p0, %p5626_p8 }
 0xb41   : > { %p4840_p2 = pneg %p4839_p1 }
 0xb43   : > { %5507 = dma.done.wait (%p4840_p2), %s4618_s8, 256  }
 0xb44   : > { %5509 = vsyncadd (%p4840_p2), %s4618_s8, 4294967040  ;;  %s20_s29 = sadd.s32 1, %s5532_s29   ;;  %s9619_s24 = smov %s5516_s25 }
 0xb45   : > { %p17_p3 = scmp.ge.s32.totalorder %s20_s29, 4   ;;  %s9620_s25 = smov %s5520_s26 }
 0xb46   : > { %s9621_s26 = smov %s5632_s14  ;;  %s9622_s27 = smov %s5528_s28 }
 0xb47   : > { %s9623_s28 = smov %s9625_s9  ;;  %19 = sbr.rel (!%p17_p3) target bundleno = 4 (0x4), region = 100 }
 0xb4c   :  { %4623 = vsyncpa [#allocation7], 1 }
 0xb4d   :  { %4625 = vsyncpa [#allocation7 + $0x1], 1 }

</bundles_post_ra>
